<compile_context>
chip_gen: v7x
topology: tpu7x:2x2x1
jax: 0.10.0
libtpu: 0.0.40
codegen_flags: <defaults>
</compile_context>

<pallas_src>
import functools

import jax
import jax.numpy as jnp
from jax import lax
from jax.experimental import pallas as pl
from jax.experimental.pallas import tpu as pltpu

# ----------------------------- hyperparameters ------------------------------
NUM_KP = 4
NUM_CHANNELS = 3
BLOCK_EXPANSION = 8
NUM_BLOCKS = 2
MAX_FEATURES = 32
KP_VARIANCE = 0.01
USE_MASK = 1
USE_CORRECTION = 1
BG_INIT = 2
BN_EPS = 1e-5
KP_SLOTS = 8          # x0 channels (bg + K heatmaps = 5) padded to a sublane multiple


# ------------------------------ small helpers --------------------------------
def _im0(ndim):
    """index_map returning the (only) block for grid=(1,)."""
    return lambda i, _n=ndim: (0,) * _n


def _mod_const(x, m):
    """x % m for int32 vectors; bitwise AND fast-path for power-of-two m."""
    if m & (m - 1) == 0:
        return jnp.bitwise_and(x, m - 1)
    return x % m          # non power-of-two fallback (not exercised at h=w=16)


# ------------------------------ fused kernel ---------------------------------
def _dense_motion_fused_kernel(
        aux_ref, p1_ref, p2_ref, wts_ref, aff_ref, out_ref,
        *, num_kp, kp_slots, n_frames, h, w, kp_variance, bn_eps, layer_dims):
    K, S = num_kp, kp_slots
    f32 = jnp.float32
    hw0 = h * w
    h1, w1 = h // 2, w // 2
    hw1 = h1 * w1
    L0 = n_frames * hw0
    L1 = n_frames * hw1

    # static layout of the packed weight / affine tables
    (CE0, CIE0), (CE1, CIE1), (CD1, CID1), (CD0, CID0), (CF, CIF) = layer_dims
    OFF_E0 = 0
    OFF_E1 = OFF_E0 + CE0
    OFF_D1 = OFF_E1 + CE1
    OFF_D0 = OFF_D1 + CD1
    OFF_FIN = OFF_D0 + CD0
    NAFF = OFF_FIN + CF            # gamma rows; betas live at NAFF + same offset

    # static layout of the packed aux slab
    A_KPM, A_KPD, A_GRD = 0, 2 * S, 2 * S + 2 * (K + 1)

    lane0 = lax.broadcasted_iota(jnp.int32, (1, L0), 1)
    lane1 = lax.broadcasted_iota(jnp.int32, (1, L1), 1)

    # ---- hoisted per-resolution 3x3 border masks (computed once, reused) ----
    def tap_masks(lane, hh, ww):
        hhww = hh * ww
        rpos = _mod_const(lane, hhww)          # flat position inside the frame
        cpos = _mod_const(lane, ww)            # column inside the row
        row = {-1: rpos >= ww, 0: None, 1: rpos < hhww - ww}
        col = {-1: cpos >= 1, 0: None, 1: cpos <= ww - 2}
        masks = {}
        for dy in (-1, 0, 1):
            for dx in (-1, 0, 1):
                v = row[dy]
                c = col[dx]
                if c is not None:
                    v = c if v is None else jnp.logical_and(v, c)
                masks[(dy, dx)] = None if v is None else v.astype(f32)
        return masks

    masks0 = tap_masks(lane0, h, w)
    masks1 = tap_masks(lane1, h1, w1)

    def conv3x3(x, row_off, cout, cin, ww, masks):
        """3x3 / pad-1 conv with all 9 taps folded into ONE MXU matmul.

        x: (cin, L) channel-major activation.  Weight table slice
        wts_ref[row_off:row_off+cout, 0:9*cin] has column t*cin + ci with tap
        t = (dy+1)*3 + (dx+1).  Each tap is one lane roll of x (masked at
        spatial borders so wrap-around never contributes); the 9 rolled copies
        are stacked along sublanes and contracted in a single dot.
        """
        L = x.shape[1]
        taps = []
        for dy in (-1, 0, 1):
            for dx in (-1, 0, 1):
                amt = (-(dy * ww + dx)) % L    # result[j] = x[j + dy*ww + dx]
                xs = x if amt == 0 else pltpu.roll(x, shift=amt, axis=1)
                msk = masks[(dy, dx)]
                if msk is not None:
                    xs = xs * msk
                taps.append(xs)
        xstack = jnp.concatenate(taps, axis=0)                     # (9*cin, L)
        wmat = wts_ref[row_off:row_off + cout, 0:9 * cin]          # (cout, 9*cin)
        return jnp.dot(wmat, xstack, preferred_element_type=f32)

    def bn_relu(x, row_off, c):
        """Training-mode BatchNorm (batch stats over frames+pixels, biased var)
        + ReLU, folded into a single affine pass y = max(a*x + b, 0)."""
        gamma = aff_ref[row_off:row_off + c, :]
        beta = aff_ref[NAFF + row_off:NAFF + row_off + c, :]
        mean = jnp.mean(x, axis=1, keepdims=True)
        var = jnp.mean(x * x, axis=1, keepdims=True) - mean * mean
        a = gamma * lax.rsqrt(var + bn_eps)
        return jnp.maximum(a * x + (beta - a * mean), 0.0)

    # ---- mask_embedding: gaussian heatmaps, per-frame spatial-sum normalized ----
    grd = aux_ref[A_GRD:A_GRD + 2, :]
    gx, gy = grd[0:1, :], grd[1:2, :]
    kpm = aux_ref[A_KPM:A_KPM + 2 * S, :]
    mx, my = kpm[0:S, :], kpm[S:2 * S, :]
    d2 = (gx - mx) ** 2 + (gy - my) ** 2
    hraw = jnp.exp(-0.5 * d2 / kp_variance)                        # (S, L0)

    # norm_const='sum': per-frame spatial sums via two tiny matmuls against a
    # 0/1 frame-indicator matrix (no per-frame reduce/select loop).
    f_lo = lax.broadcasted_iota(jnp.int32, (n_frames, 1), 0) * hw0
    seg = jnp.logical_and(lane0 >= f_lo, lane0 < f_lo + hw0).astype(f32)   # (n, L0)
    sums = lax.dot_general(hraw, seg, (((1,), (1,)), ((), ())),
                           preferred_element_type=f32)             # (S, n)
    denom = jnp.dot(sums, seg, preferred_element_type=f32)         # (S, L0)
    slot = lax.broadcasted_iota(jnp.int32, (S, 1), 0)
    live = jnp.logical_and(slot >= 1, slot <= K).astype(f32)       # bg / pad slots -> 0
    x0 = (hraw / denom) * live                                     # hourglass input (S, L0)

    # ---- Hourglass encoder ----
    p1 = p1_ref[...].astype(f32)          # (L0, L1) avg-pool matrix (exact {0, 0.25})
    p2 = p2_ref[...].astype(f32)          # (L1, L2)
    e0 = bn_relu(conv3x3(x0, OFF_E0, CE0, CIE0, w, masks0), OFF_E0, CE0)
    e0p = jnp.dot(e0, p1, preferred_element_type=f32)              # pooled, (CE0, L1)
    e1 = bn_relu(conv3x3(e0p, OFF_E1, CE1, CIE1, w1, masks1), OFF_E1, CE1)
    e1p = jnp.dot(e1, p2, preferred_element_type=f32)              # (CE1, L2)

    # ---- Hourglass decoder (nearest 2x upsample == 4 * pool^T, reuses p1/p2) ----
    up1 = 4.0 * lax.dot_general(e1p, p2, (((1,), (1,)), ((), ())),
                                preferred_element_type=f32)        # (CE1, L1)
    d1 = bn_relu(conv3x3(up1, OFF_D1, CD1, CID1, w1, masks1), OFF_D1, CD1)
    cat1 = jnp.concatenate([d1, e0p], axis=0)                      # skip concat (CID0, L1)
    cat1u = 4.0 * lax.dot_general(cat1, p1, (((1,), (1,)), ((), ())),
                                  preferred_element_type=f32)      # (CID0, L0)
    d0 = bn_relu(conv3x3(cat1u, OFF_D0, CD0, CID0, w, masks0), OFF_D0, CD0)

    # final conv over concat([d0, x0]) (zero-init weight in __init__, bias = bg_init)
    cat0 = jnp.concatenate([d0, x0], axis=0)                       # (CIF, L0)
    bias = aff_ref[OFF_FIN:OFF_FIN + CF, :]
    pred = conv3x3(cat0, OFF_FIN, CF, CIF, w, masks0) + bias       # (K+3, L0)

    # ---- mask softmax + difference embedding + correction + coordinate grid ----
    logits = pred[0:K + 1, :]
    ex = jnp.exp(logits - jnp.max(logits, axis=0, keepdims=True))
    mask = ex / jnp.sum(ex, axis=0, keepdims=True)                 # (K+1, L0)
    kpd = aux_ref[A_KPD:A_KPD + 2 * (K + 1), :]
    defx = jnp.sum(kpd[0:K + 1, :] * mask, axis=0, keepdims=True)
    defy = jnp.sum(kpd[K + 1:2 * (K + 1), :] * mask, axis=0, keepdims=True)
    corr = pred[K + 1:K + 3, :]
    ox = defx + corr[0:1, :] + gx
    oy = defy + corr[1:2, :] + gy
    out_ref[...] = jnp.concatenate([ox, oy, jnp.zeros_like(ox)], axis=0)   # single store


# ------------------------------ parameters -----------------------------------
def init_params(key):
    """Channel-major conv params: w[tap, cout, cin], tap = ky*3 + kx."""
    def conv_w(k, cin, cout):
        bound = 1.0 / jnp.sqrt(9.0 * cin)
        return jax.random.uniform(k, (9, cout, cin), jnp.float32, -bound, bound)

    in_features = NUM_KP + 1  # mask_embedding.out_channels (bg + heatmaps)

    enc_specs, cin = [], in_features
    for i in range(NUM_BLOCKS):
        cout = min(MAX_FEATURES, BLOCK_EXPANSION * (2 ** (i + 1)))
        enc_specs.append((cin, cout))
        cin = cout
    dec_specs = []
    for i in reversed(range(NUM_BLOCKS)):
        cin_d = ((1 if i == NUM_BLOCKS - 1 else 2)
                 * min(MAX_FEATURES, BLOCK_EXPANSION * (2 ** (i + 1))))
        cout_d = min(MAX_FEATURES, BLOCK_EXPANSION * (2 ** i))
        dec_specs.append((cin_d, cout_d))

    keys = jax.random.split(key, len(enc_specs) + len(dec_specs))
    params = {"encoder": [], "decoder": []}
    ki = 0
    for cin_, cout_ in enc_specs:
        # NOTE: conv bias omitted — training-mode BatchNorm subtracts the batch
        # mean, so a conv bias cancels exactly and has no effect on the output.
        params["encoder"].append({"w": conv_w(keys[ki], cin_, cout_),
                                  "gamma": jnp.ones((cout_, 1), jnp.float32),
                                  "beta": jnp.zeros((cout_, 1), jnp.float32)})
        ki += 1
    for cin_, cout_ in dec_specs:
        params["decoder"].append({"w": conv_w(keys[ki], cin_, cout_),
                                  "gamma": jnp.ones((cout_, 1), jnp.float32),
                                  "beta": jnp.zeros((cout_, 1), jnp.float32)})
        ki += 1

    # __init__: final conv weight zeroed, bias = [bg_init] + [0]*K + [0, 0]
    final_cin = BLOCK_EXPANSION + in_features
    final_cout = (NUM_KP + 1) * USE_MASK + 2 * USE_CORRECTION
    bias_init = ([BG_INIT] + [0] * NUM_KP) * USE_MASK + [0, 0] * USE_CORRECTION
    params["final"] = {"w": jnp.zeros((9, final_cout, final_cin), jnp.float32),
                       "b": jnp.array(bias_init, jnp.float32).reshape(final_cout, 1)}
    return params


# ------------------------------- XLA glue -------------------------------------
def _pool_matrix(n, h, w):
    """AvgPool3d((1,2,2)) as an (n*h*w, n*(h//2)*(w//2)) matrix, bf16 (exact)."""
    hw_i = h * w
    h_o, w_o = h // 2, w // 2
    hw_o = h_o * w_o
    ji = jnp.arange(n * hw_i, dtype=jnp.int32)
    fr = ji // hw_i
    rr = (ji % hw_i) // w
    cc = ji % w
    jo = fr * hw_o + (rr // 2) * w_o + (cc // 2)
    onehot = (jo[:, None] == jnp.arange(n * hw_o, dtype=jnp.int32)[None, :])
    return (0.25 * onehot.astype(jnp.float32)).astype(jnp.bfloat16)


# ------------------------------ forward pass ----------------------------------
def dense_motion_forward(params, source_image, kp_driving_mean, kp_source_mean):
    """source_image: (bs, C, 1, h, w) (only its shape matters here —
    use_deformed_source_image=False); kp means: (bs, d|1, K, 2) in (x, y)."""
    assert NUM_BLOCKS == 2, "fused kernel is specialized to num_blocks=2"
    bs = source_image.shape[0]
    h, w = source_image.shape[-2], source_image.shape[-1]
    assert h % 4 == 0 and w % 4 == 0
    d = kp_driving_mean.shape[1]
    n = bs * d
    hw = h * w
    L0 = n * hw
    K, S = NUM_KP, KP_SLOTS

    # ---- lane-dense aux slab: [kp-mean slots | kp diffs | coordinate grid] ----
    xs = 2.0 * (jnp.arange(w, dtype=jnp.float32) / (w - 1)) - 1.0
    ys = 2.0 * (jnp.arange(h, dtype=jnp.float32) / (h - 1)) - 1.0
    gx1 = jnp.broadcast_to(xs[None, :], (h, w)).reshape(-1)
    gy1 = jnp.broadcast_to(ys[:, None], (h, w)).reshape(-1)
    grid_xy = jnp.stack([jnp.tile(gx1, n), jnp.tile(gy1, n)], axis=0)      # (2, L0)

    def per_pixel(v_nc):                       # (n, C) -> (C, n*hw), frame-major
        c = v_nc.shape[1]
        return jnp.broadcast_to(v_nc.T[:, :, None], (c, n, hw)).reshape(c, L0)

    kp = kp_driving_mean.reshape(n, K, 2)
    kp_slot = jnp.concatenate(                 # x0 slots: [bg, kp_1..K, pad]
        [jnp.zeros((n, 1, 2), jnp.float32), kp,
         jnp.zeros((n, S - K - 1, 2), jnp.float32)], axis=1)               # (n, S, 2)
    kpm_b = jnp.concatenate([per_pixel(kp_slot[:, :, 0]),
                             per_pixel(kp_slot[:, :, 1])], axis=0)         # (2S, L0)

    kp_diff = kp_source_mean - kp_driving_mean                             # bcast over d
    kp_diff = jnp.broadcast_to(kp_diff, (bs, d, K, 2)).reshape(n, K, 2)
    kp_diff = jnp.concatenate([jnp.zeros((n, 1, 2), jnp.float32), kp_diff], axis=1)
    kpd_b = jnp.concatenate([per_pixel(kp_diff[:, :, 0]),
                             per_pixel(kp_diff[:, :, 1])], axis=0)         # (2(K+1), L0)

    aux = jnp.concatenate([kpm_b, kpd_b, grid_xy], axis=0)                 # (2S+2K+4, L0)

    # ---- pooling matrices; nearest-2x upsample is derived in-kernel (4*p^T) ----
    p1 = _pool_matrix(n, h, w)                 # (L0, L1) bf16
    p2 = _pool_matrix(n, h // 2, w // 2)       # (L1, L2) bf16

    # ---- pack conv weights into one table (folded-tap layout, col = tap*cin+ci) ----
    pe0, pe1 = params["encoder"]
    pd1, pd0 = params["decoder"]
    pfin = params["final"]
    pad_x0 = S - (K + 1)                       # zero weights for padded x0 slots

    def flat_w(w9):                            # (9, cout, cin) -> (cout, 9*cin)
        _, cout, cin = w9.shape
        return jnp.transpose(w9, (1, 0, 2)).reshape(cout, 9 * cin)

    w_e0 = flat_w(jnp.pad(pe0["w"], ((0, 0), (0, 0), (0, pad_x0))))
    w_e1 = flat_w(pe1["w"])
    w_d1 = flat_w(pd1["w"])
    w_d0 = flat_w(pd0["w"])
    w_fn = flat_w(jnp.pad(pfin["w"], ((0, 0), (0, 0), (0, pad_x0))))
    w_list = [w_e0, w_e1, w_d1, w_d0, w_fn]
    wcols = max(x.shape[1] for x in w_list)
    wts = jnp.concatenate(
        [jnp.pad(x, ((0, 0), (0, wcols - x.shape[1]))) for x in w_list], axis=0)

    # ---- pack BN gammas/betas + final-conv bias into one (2*sum_cout, 1) table ----
    aff = jnp.concatenate(
        [pe0["gamma"], pe1["gamma"], pd1["gamma"], pd0["gamma"], pfin["b"],
         pe0["beta"], pe1["beta"], pd1["beta"], pd0["beta"],
         jnp.zeros_like(pfin["b"])], axis=0)

    layer_dims = tuple((int(x.shape[0]), int(x.shape[1]) // 9) for x in w_list)

    kernel = functools.partial(
        _dense_motion_fused_kernel,
        num_kp=K, kp_slots=S, n_frames=n, h=h, w=w,
        kp_variance=KP_VARIANCE, bn_eps=BN_EPS, layer_dims=layer_dims)

    ins = [aux, p1, p2, wts, aff]
    out3 = pl.pallas_call(
        kernel,
        out_shape=jax.ShapeDtypeStruct((3, L0), jnp.float32),
        grid=(1,),
        in_specs=[pl.BlockSpec(x.shape, _im0(x.ndim)) for x in ins],
        out_specs=pl.BlockSpec((3, L0), _im0(2)),
        compiler_params=pltpu.CompilerParams(dimension_semantics=("arbitrary",)),
    )(*ins)

    deformation = out3.reshape(3, bs, d, h, w).transpose(1, 2, 3, 4, 0)    # (bs,d,h,w,3)
    return deformation


# ----------------------------------- main --------------------------------------
if __name__ == "__main__":
    key = jax.random.PRNGKey(0)
    k_src, k_kpd, k_kps, k_par = jax.random.split(key, 4)

    bs, d, h, w = 2, 1, 16, 16
    source_image = jax.random.normal(k_src, (bs, NUM_CHANNELS, 1, h, w), jnp.float32)
    kp_driving_mean = jax.random.uniform(k_kpd, (bs, d, NUM_KP, 2), jnp.float32, -1.0, 1.0)
    kp_source_mean = jax.random.uniform(k_kps, (bs, 1, NUM_KP, 2), jnp.float32, -1.0, 1.0)

    params = init_params(k_par)

    fwd = jax.jit(dense_motion_forward)
    deformation = jax.block_until_ready(
        fwd(params, source_image, kp_driving_mean, kp_source_mean))

    assert deformation.shape == (bs, d, h, w, 3), deformation.shape
    assert bool(jnp.all(jnp.isfinite(deformation)))
    print("KERNEL_OK")
</pallas_src>

<mosaic_0001>
module attributes {stable_mosaic.version = 11 : i64} {
  func.func @_dense_motion_fused_kernel(%arg0: i32, %arg1: memref<28x512xf32, #tpu.memory_space<vmem>>, %arg2: memref<512x128xbf16, #tpu.memory_space<vmem>>, %arg3: memref<128x32xbf16, #tpu.memory_space<vmem>>, %arg4: memref<79x288xf32, #tpu.memory_space<vmem>>, %arg5: memref<158x1xf32, #tpu.memory_space<vmem>>, %arg6: memref<3x512xf32, #tpu.memory_space<vmem>>) attributes {dimension_semantics = [#tpu.dimension_semantics<arbitrary>], iteration_bounds = array<i64: 1>, scalar_prefetch = 0 : i64, scratch_operands = 0 : i64, tpu.core_type = #tpu.core_type<tc>, window_params = [{pipeline_mode = #tpu.pipeline_mode<synchronous>, transform_indices = @transform_0, window_bounds = array<i64: 28, 512>}, {pipeline_mode = #tpu.pipeline_mode<synchronous>, transform_indices = @transform_1, window_bounds = array<i64: 512, 128>}, {pipeline_mode = #tpu.pipeline_mode<synchronous>, transform_indices = @transform_2, window_bounds = array<i64: 128, 32>}, {pipeline_mode = #tpu.pipeline_mode<synchronous>, transform_indices = @transform_3, window_bounds = array<i64: 79, 288>}, {pipeline_mode = #tpu.pipeline_mode<synchronous>, transform_indices = @transform_4, window_bounds = array<i64: 158, 1>}, {pipeline_mode = #tpu.pipeline_mode<synchronous>, transform_indices = @transform_5, window_bounds = array<i64: 3, 512>}]} {
    %0 = tpu.iota {dimensions = array<i32: 1>} : vector<1x512xi32>
    %1 = tpu.iota {dimensions = array<i32: 1>} : vector<1x128xi32>
    %c255_i32 = arith.constant 255 : i32
    %2 = vector.broadcast %c255_i32 : i32 to vector<1x512xi32>
    %3 = arith.andi %0, %2 : vector<1x512xi32>
    %c15_i32 = arith.constant 15 : i32
    %4 = vector.broadcast %c15_i32 : i32 to vector<1x512xi32>
    %5 = arith.andi %0, %4 : vector<1x512xi32>
    %c16_i32 = arith.constant 16 : i32
    %6 = vector.broadcast %c16_i32 : i32 to vector<1x512xi32>
    %7 = arith.cmpi sge, %3, %6 : vector<1x512xi32>
    %c240_i32 = arith.constant 240 : i32
    %8 = vector.broadcast %c240_i32 : i32 to vector<1x512xi32>
    %9 = arith.cmpi slt, %3, %8 : vector<1x512xi32>
    %c1_i32 = arith.constant 1 : i32
    %10 = vector.broadcast %c1_i32 : i32 to vector<1x512xi32>
    %11 = arith.cmpi sge, %5, %10 : vector<1x512xi32>
    %c14_i32 = arith.constant 14 : i32
    %12 = vector.broadcast %c14_i32 : i32 to vector<1x512xi32>
    %13 = arith.cmpi sle, %5, %12 : vector<1x512xi32>
    %14 = arith.andi %7, %11 : vector<1x512xi1>
    %15 = arith.extui %14 : vector<1x512xi1> to vector<1x512xi32>
    %16 = arith.sitofp %15 : vector<1x512xi32> to vector<1x512xf32>
    %17 = arith.extui %7 : vector<1x512xi1> to vector<1x512xi32>
    %18 = arith.sitofp %17 : vector<1x512xi32> to vector<1x512xf32>
    %19 = arith.andi %7, %13 : vector<1x512xi1>
    %20 = arith.extui %19 : vector<1x512xi1> to vector<1x512xi32>
    %21 = arith.sitofp %20 : vector<1x512xi32> to vector<1x512xf32>
    %22 = arith.extui %11 : vector<1x512xi1> to vector<1x512xi32>
    %23 = arith.sitofp %22 : vector<1x512xi32> to vector<1x512xf32>
    %24 = arith.extui %13 : vector<1x512xi1> to vector<1x512xi32>
    %25 = arith.sitofp %24 : vector<1x512xi32> to vector<1x512xf32>
    %26 = arith.andi %9, %11 : vector<1x512xi1>
    %27 = arith.extui %26 : vector<1x512xi1> to vector<1x512xi32>
    %28 = arith.sitofp %27 : vector<1x512xi32> to vector<1x512xf32>
    %29 = arith.extui %9 : vector<1x512xi1> to vector<1x512xi32>
    %30 = arith.sitofp %29 : vector<1x512xi32> to vector<1x512xf32>
    %31 = arith.andi %9, %13 : vector<1x512xi1>
    %32 = arith.extui %31 : vector<1x512xi1> to vector<1x512xi32>
    %33 = arith.sitofp %32 : vector<1x512xi32> to vector<1x512xf32>
    %c63_i32 = arith.constant 63 : i32
    %34 = vector.broadcast %c63_i32 : i32 to vector<1x128xi32>
    %35 = arith.andi %1, %34 : vector<1x128xi32>
    %c7_i32 = arith.constant 7 : i32
    %36 = vector.broadcast %c7_i32 : i32 to vector<1x128xi32>
    %37 = arith.andi %1, %36 : vector<1x128xi32>
    %c8_i32 = arith.constant 8 : i32
    %38 = vector.broadcast %c8_i32 : i32 to vector<1x128xi32>
    %39 = arith.cmpi sge, %35, %38 : vector<1x128xi32>
    %c56_i32 = arith.constant 56 : i32
    %40 = vector.broadcast %c56_i32 : i32 to vector<1x128xi32>
    %41 = arith.cmpi slt, %35, %40 : vector<1x128xi32>
    %c1_i32_0 = arith.constant 1 : i32
    %42 = vector.broadcast %c1_i32_0 : i32 to vector<1x128xi32>
    %43 = arith.cmpi sge, %37, %42 : vector<1x128xi32>
    %c6_i32 = arith.constant 6 : i32
    %44 = vector.broadcast %c6_i32 : i32 to vector<1x128xi32>
    %45 = arith.cmpi sle, %37, %44 : vector<1x128xi32>
    %46 = arith.andi %39, %43 : vector<1x128xi1>
    %47 = arith.extui %46 : vector<1x128xi1> to vector<1x128xi32>
    %48 = arith.sitofp %47 : vector<1x128xi32> to vector<1x128xf32>
    %49 = arith.extui %39 : vector<1x128xi1> to vector<1x128xi32>
    %50 = arith.sitofp %49 : vector<1x128xi32> to vector<1x128xf32>
    %51 = arith.andi %39, %45 : vector<1x128xi1>
    %52 = arith.extui %51 : vector<1x128xi1> to vector<1x128xi32>
    %53 = arith.sitofp %52 : vector<1x128xi32> to vector<1x128xf32>
    %54 = arith.extui %43 : vector<1x128xi1> to vector<1x128xi32>
    %55 = arith.sitofp %54 : vector<1x128xi32> to vector<1x128xf32>
    %56 = arith.extui %45 : vector<1x128xi1> to vector<1x128xi32>
    %57 = arith.sitofp %56 : vector<1x128xi32> to vector<1x128xf32>
    %58 = arith.andi %41, %43 : vector<1x128xi1>
    %59 = arith.extui %58 : vector<1x128xi1> to vector<1x128xi32>
    %60 = arith.sitofp %59 : vector<1x128xi32> to vector<1x128xf32>
    %61 = arith.extui %41 : vector<1x128xi1> to vector<1x128xi32>
    %62 = arith.sitofp %61 : vector<1x128xi32> to vector<1x128xf32>
    %63 = arith.andi %41, %45 : vector<1x128xi1>
    %64 = arith.extui %63 : vector<1x128xi1> to vector<1x128xi32>
    %65 = arith.sitofp %64 : vector<1x128xi32> to vector<1x128xf32>
    %c26 = arith.constant 26 : index
    %c0 = arith.constant 0 : index
    %66 = vector.load %arg1[%c26, %c0] : memref<28x512xf32, #tpu.memory_space<vmem>>, vector<2x512xf32>
    %67 = vector.extract_strided_slice %66 {offsets = [0, 0], sizes = [1, 512], strides = [1, 1]} : vector<2x512xf32> to vector<1x512xf32>
    %68 = vector.extract_strided_slice %66 {offsets = [1, 0], sizes = [1, 512], strides = [1, 1]} : vector<2x512xf32> to vector<1x512xf32>
    %c0_1 = arith.constant 0 : index
    %c0_2 = arith.constant 0 : index
    %69 = vector.load %arg1[%c0_1, %c0_2] : memref<28x512xf32, #tpu.memory_space<vmem>>, vector<16x512xf32>
    %70 = vector.extract_strided_slice %69 {offsets = [0, 0], sizes = [8, 512], strides = [1, 1]} : vector<16x512xf32> to vector<8x512xf32>
    %71 = vector.extract_strided_slice %69 {offsets = [8, 0], sizes = [8, 512], strides = [1, 1]} : vector<16x512xf32> to vector<8x512xf32>
    %72 = vector.broadcast %67 : vector<1x512xf32> to vector<8x512xf32>
    %73 = arith.subf %72, %70 : vector<8x512xf32>
    %74 = arith.mulf %73, %73 : vector<8x512xf32>
    %75 = vector.broadcast %68 : vector<1x512xf32> to vector<8x512xf32>
    %76 = arith.subf %75, %71 : vector<8x512xf32>
    %77 = arith.mulf %76, %76 : vector<8x512xf32>
    %78 = arith.addf %74, %77 : vector<8x512xf32>
    %cst = arith.constant -5.000000e-01 : f32
    %79 = vector.broadcast %cst : f32 to vector<8x512xf32>
    %80 = arith.mulf %79, %78 : vector<8x512xf32>
    %cst_3 = arith.constant 0.00999999977 : f32
    %81 = vector.broadcast %cst_3 : f32 to vector<8x512xf32>
    %82 = arith.divf %80, %81 : vector<8x512xf32>
    %83 = math.exp %82 : vector<8x512xf32>
    %84 = tpu.iota {dimensions = array<i32: 0>} : vector<2x1xi32>
    %c256_i32 = arith.constant 256 : i32
    %85 = vector.broadcast %c256_i32 : i32 to vector<2x1xi32>
    %86 = arith.muli %84, %85 : vector<2x1xi32>
    %87 = vector.broadcast %0 : vector<1x512xi32> to vector<2x512xi32>
    %88 = vector.broadcast %86 : vector<2x1xi32> to vector<2x512xi32>
    %89 = arith.cmpi sge, %87, %88 : vector<2x512xi32>
    %c256_i32_4 = arith.constant 256 : i32
    %90 = vector.broadcast %c256_i32_4 : i32 to vector<2x1xi32>
    %91 = arith.addi %86, %90 : vector<2x1xi32>
    %92 = vector.broadcast %0 : vector<1x512xi32> to vector<2x512xi32>
    %93 = vector.broadcast %91 : vector<2x1xi32> to vector<2x512xi32>
    %94 = arith.cmpi slt, %92, %93 : vector<2x512xi32>
    %95 = arith.andi %89, %94 : vector<2x512xi1>
    %96 = arith.extui %95 : vector<2x512xi1> to vector<2x512xi32>
    %97 = arith.sitofp %96 : vector<2x512xi32> to vector<2x512xf32>
    %cst_5 = arith.constant dense<0.000000e+00> : vector<8x2xf32>
    %98 = tpu.matmul %83, %97, %cst_5 {dimension_numbers = #tpu.dot_dimension_numbers<[1], [1], [0], [0], [0, 0, 1, 0], [], []>} : vector<8x512xf32>, vector<2x512xf32>, vector<8x2xf32> -> vector<8x2xf32>
    %cst_6 = arith.constant dense<0.000000e+00> : vector<8x512xf32>
    %99 = tpu.matmul %98, %97, %cst_6 {dimension_numbers = #tpu.dot_dimension_numbers<[1], [0], [0], [1], [0, 0, 1, 1], [], []>} : vector<8x2xf32>, vector<2x512xf32>, vector<8x512xf32> -> vector<8x512xf32>
    %100 = tpu.iota {dimensions = array<i32: 0>} : vector<8x1xi32>
    %c1_i32_7 = arith.constant 1 : i32
    %101 = vector.broadcast %c1_i32_7 : i32 to vector<8x1xi32>
    %102 = arith.cmpi sge, %100, %101 : vector<8x1xi32>
    %c4_i32 = arith.constant 4 : i32
    %103 = vector.broadcast %c4_i32 : i32 to vector<8x1xi32>
    %104 = arith.cmpi sle, %100, %103 : vector<8x1xi32>
    %105 = arith.andi %102, %104 : vector<8x1xi1>
    %106 = arith.extui %105 : vector<8x1xi1> to vector<8x1xi32>
    %107 = arith.sitofp %106 : vector<8x1xi32> to vector<8x1xf32>
    %108 = arith.divf %83, %99 : vector<8x512xf32>
    %109 = vector.broadcast %107 : vector<8x1xf32> to vector<8x512xf32>
    %110 = arith.mulf %108, %109 : vector<8x512xf32>
    %c0_8 = arith.constant 0 : index
    %c0_9 = arith.constant 0 : index
    %111 = vector.load %arg2[%c0_8, %c0_9] : memref<512x128xbf16, #tpu.memory_space<vmem>>, vector<512x128xbf16>
    %112 = arith.extf %111 : vector<512x128xbf16> to vector<512x128xf32>
    %c0_10 = arith.constant 0 : index
    %c0_11 = arith.constant 0 : index
    %113 = vector.load %arg3[%c0_10, %c0_11] : memref<128x32xbf16, #tpu.memory_space<vmem>>, vector<128x32xbf16>
    %114 = arith.extf %113 : vector<128x32xbf16> to vector<128x32xf32>
    %c17_i32 = arith.constant 17 : i32
    %115 = tpu.dynamic_rotate %110 by %c17_i32 dim 1 : vector<8x512xf32>, i32 -> vector<8x512xf32>
    %116 = vector.broadcast %16 : vector<1x512xf32> to vector<8x512xf32>
    %117 = arith.mulf %115, %116 : vector<8x512xf32>
    %c16_i32_12 = arith.constant 16 : i32
    %118 = tpu.dynamic_rotate %110 by %c16_i32_12 dim 1 : vector<8x512xf32>, i32 -> vector<8x512xf32>
    %119 = vector.broadcast %18 : vector<1x512xf32> to vector<8x512xf32>
    %120 = arith.mulf %118, %119 : vector<8x512xf32>
    %c15_i32_13 = arith.constant 15 : i32
    %121 = tpu.dynamic_rotate %110 by %c15_i32_13 dim 1 : vector<8x512xf32>, i32 -> vector<8x512xf32>
    %122 = vector.broadcast %21 : vector<1x512xf32> to vector<8x512xf32>
    %123 = arith.mulf %121, %122 : vector<8x512xf32>
    %c1_i32_14 = arith.constant 1 : i32
    %124 = tpu.dynamic_rotate %110 by %c1_i32_14 dim 1 : vector<8x512xf32>, i32 -> vector<8x512xf32>
    %125 = vector.broadcast %23 : vector<1x512xf32> to vector<8x512xf32>
    %126 = arith.mulf %124, %125 : vector<8x512xf32>
    %c511_i32 = arith.constant 511 : i32
    %127 = tpu.dynamic_rotate %110 by %c511_i32 dim 1 : vector<8x512xf32>, i32 -> vector<8x512xf32>
    %128 = vector.broadcast %25 : vector<1x512xf32> to vector<8x512xf32>
    %129 = arith.mulf %127, %128 : vector<8x512xf32>
    %c497_i32 = arith.constant 497 : i32
    %130 = tpu.dynamic_rotate %110 by %c497_i32 dim 1 : vector<8x512xf32>, i32 -> vector<8x512xf32>
    %131 = vector.broadcast %28 : vector<1x512xf32> to vector<8x512xf32>
    %132 = arith.mulf %130, %131 : vector<8x512xf32>
    %c496_i32 = arith.constant 496 : i32
    %133 = tpu.dynamic_rotate %110 by %c496_i32 dim 1 : vector<8x512xf32>, i32 -> vector<8x512xf32>
    %134 = vector.broadcast %30 : vector<1x512xf32> to vector<8x512xf32>
    %135 = arith.mulf %133, %134 : vector<8x512xf32>
    %c495_i32 = arith.constant 495 : i32
    %136 = tpu.dynamic_rotate %110 by %c495_i32 dim 1 : vector<8x512xf32>, i32 -> vector<8x512xf32>
    %137 = vector.broadcast %33 : vector<1x512xf32> to vector<8x512xf32>
    %138 = arith.mulf %136, %137 : vector<8x512xf32>
    %139 = tpu.concatenate %117, %120, %123, %126, %110, %129, %132, %135, %138 in 0 : vector<8x512xf32>, vector<8x512xf32>, vector<8x512xf32>, vector<8x512xf32>, vector<8x512xf32>, vector<8x512xf32>, vector<8x512xf32>, vector<8x512xf32>, vector<8x512xf32> -> vector<72x512xf32>
    %c0_15 = arith.constant 0 : index
    %c0_16 = arith.constant 0 : index
    %140 = vector.load %arg4[%c0_15, %c0_16] : memref<79x288xf32, #tpu.memory_space<vmem>>, vector<16x72xf32>
    %cst_17 = arith.constant dense<0.000000e+00> : vector<16x512xf32>
    %141 = tpu.matmul %140, %139, %cst_17 {dimension_numbers = #tpu.dot_dimension_numbers<[1], [0], [0], [1], [0, 0, 1, 1], [], []>} : vector<16x72xf32>, vector<72x512xf32>, vector<16x512xf32> -> vector<16x512xf32>
    %c0_18 = arith.constant 0 : index
    %c0_19 = arith.constant 0 : index
    %142 = vector.load %arg5[%c0_18, %c0_19] : memref<158x1xf32, #tpu.memory_space<vmem>>, vector<16x1xf32>
    %c79 = arith.constant 79 : index
    %c0_20 = arith.constant 0 : index
    %143 = vector.load %arg5[%c79, %c0_20] : memref<158x1xf32, #tpu.memory_space<vmem>>, vector<16x1xf32>
    %cst_21 = arith.constant dense<0.000000e+00> : vector<16xf32>
    %144 = vector.multi_reduction <add>, %141, %cst_21 [1] : vector<16x512xf32> to vector<16xf32>
    %145 = vector.shape_cast %144 : vector<16xf32> to vector<16x1xf32>
    %cst_22 = arith.constant 5.120000e+02 : f32
    %146 = vector.broadcast %cst_22 : f32 to vector<16x1xf32>
    %147 = arith.divf %145, %146 : vector<16x1xf32>
    %148 = arith.mulf %141, %141 : vector<16x512xf32>
    %cst_23 = arith.constant dense<0.000000e+00> : vector<16xf32>
    %149 = vector.multi_reduction <add>, %148, %cst_23 [1] : vector<16x512xf32> to vector<16xf32>
    %150 = vector.shape_cast %149 : vector<16xf32> to vector<16x1xf32>
    %cst_24 = arith.constant 5.120000e+02 : f32
    %151 = vector.broadcast %cst_24 : f32 to vector<16x1xf32>
    %152 = arith.divf %150, %151 : vector<16x1xf32>
    %153 = arith.mulf %147, %147 : vector<16x1xf32>
    %154 = arith.subf %152, %153 : vector<16x1xf32>
    %cst_25 = arith.constant 9.99999974E-6 : f32
    %155 = vector.broadcast %cst_25 : f32 to vector<16x1xf32>
    %156 = arith.addf %154, %155 : vector<16x1xf32>
    %157 = math.rsqrt %156 : vector<16x1xf32>
    %158 = arith.mulf %142, %157 : vector<16x1xf32>
    %159 = vector.broadcast %158 : vector<16x1xf32> to vector<16x512xf32>
    %160 = arith.mulf %159, %141 : vector<16x512xf32>
    %161 = arith.mulf %158, %147 : vector<16x1xf32>
    %162 = arith.subf %143, %161 : vector<16x1xf32>
    %163 = vector.broadcast %162 : vector<16x1xf32> to vector<16x512xf32>
    %164 = arith.addf %160, %163 : vector<16x512xf32>
    %cst_26 = arith.constant 0.000000e+00 : f32
    %165 = vector.broadcast %cst_26 : f32 to vector<16x512xf32>
    %166 = arith.maximumf %164, %165 : vector<16x512xf32>
    %cst_27 = arith.constant dense<0.000000e+00> : vector<16x128xf32>
    %167 = tpu.matmul %166, %112, %cst_27 {dimension_numbers = #tpu.dot_dimension_numbers<[1], [0], [0], [1], [0, 0, 1, 1], [], []>} : vector<16x512xf32>, vector<512x128xf32>, vector<16x128xf32> -> vector<16x128xf32>
    %c9_i32 = arith.constant 9 : i32
    %168 = tpu.dynamic_rotate %167 by %c9_i32 dim 1 : vector<16x128xf32>, i32 -> vector<16x128xf32>
    %169 = vector.broadcast %48 : vector<1x128xf32> to vector<16x128xf32>
    %170 = arith.mulf %168, %169 : vector<16x128xf32>
    %c8_i32_28 = arith.constant 8 : i32
    %171 = tpu.dynamic_rotate %167 by %c8_i32_28 dim 1 : vector<16x128xf32>, i32 -> vector<16x128xf32>
    %172 = vector.broadcast %50 : vector<1x128xf32> to vector<16x128xf32>
    %173 = arith.mulf %171, %172 : vector<16x128xf32>
    %c7_i32_29 = arith.constant 7 : i32
    %174 = tpu.dynamic_rotate %167 by %c7_i32_29 dim 1 : vector<16x128xf32>, i32 -> vector<16x128xf32>
    %175 = vector.broadcast %53 : vector<1x128xf32> to vector<16x128xf32>
    %176 = arith.mulf %174, %175 : vector<16x128xf32>
    %c1_i32_30 = arith.constant 1 : i32
    %177 = tpu.dynamic_rotate %167 by %c1_i32_30 dim 1 : vector<16x128xf32>, i32 -> vector<16x128xf32>
    %178 = vector.broadcast %55 : vector<1x128xf32> to vector<16x128xf32>
    %179 = arith.mulf %177, %178 : vector<16x128xf32>
    %c127_i32 = arith.constant 127 : i32
    %180 = tpu.dynamic_rotate %167 by %c127_i32 dim 1 : vector<16x128xf32>, i32 -> vector<16x128xf32>
    %181 = vector.broadcast %57 : vector<1x128xf32> to vector<16x128xf32>
    %182 = arith.mulf %180, %181 : vector<16x128xf32>
    %c121_i32 = arith.constant 121 : i32
    %183 = tpu.dynamic_rotate %167 by %c121_i32 dim 1 : vector<16x128xf32>, i32 -> vector<16x128xf32>
    %184 = vector.broadcast %60 : vector<1x128xf32> to vector<16x128xf32>
    %185 = arith.mulf %183, %184 : vector<16x128xf32>
    %c120_i32 = arith.constant 120 : i32
    %186 = tpu.dynamic_rotate %167 by %c120_i32 dim 1 : vector<16x128xf32>, i32 -> vector<16x128xf32>
    %187 = vector.broadcast %62 : vector<1x128xf32> to vector<16x128xf32>
    %188 = arith.mulf %186, %187 : vector<16x128xf32>
    %c119_i32 = arith.constant 119 : i32
    %189 = tpu.dynamic_rotate %167 by %c119_i32 dim 1 : vector<16x128xf32>, i32 -> vector<16x128xf32>
    %190 = vector.broadcast %65 : vector<1x128xf32> to vector<16x128xf32>
    %191 = arith.mulf %189, %190 : vector<16x128xf32>
    %192 = tpu.concatenate %170, %173, %176, %179, %167, %182, %185, %188, %191 in 0 : vector<16x128xf32>, vector<16x128xf32>, vector<16x128xf32>, vector<16x128xf32>, vector<16x128xf32>, vector<16x128xf32>, vector<16x128xf32>, vector<16x128xf32>, vector<16x128xf32> -> vector<144x128xf32>
    %c16 = arith.constant 16 : index
    %c0_31 = arith.constant 0 : index
    %193 = vector.load %arg4[%c16, %c0_31] : memref<79x288xf32, #tpu.memory_space<vmem>>, vector<32x144xf32>
    %cst_32 = arith.constant dense<0.000000e+00> : vector<32x128xf32>
    %194 = tpu.matmul %193, %192, %cst_32 {dimension_numbers = #tpu.dot_dimension_numbers<[1], [0], [0], [1], [0, 0, 1, 1], [], []>} : vector<32x144xf32>, vector<144x128xf32>, vector<32x128xf32> -> vector<32x128xf32>
    %c16_33 = arith.constant 16 : index
    %c0_34 = arith.constant 0 : index
    %195 = vector.load %arg5[%c16_33, %c0_34] : memref<158x1xf32, #tpu.memory_space<vmem>>, vector<32x1xf32>
    %c95 = arith.constant 95 : index
    %c0_35 = arith.constant 0 : index
    %196 = vector.load %arg5[%c95, %c0_35] : memref<158x1xf32, #tpu.memory_space<vmem>>, vector<32x1xf32>
    %cst_36 = arith.constant dense<0.000000e+00> : vector<32xf32>
    %197 = vector.multi_reduction <add>, %194, %cst_36 [1] : vector<32x128xf32> to vector<32xf32>
    %198 = vector.shape_cast %197 : vector<32xf32> to vector<32x1xf32>
    %cst_37 = arith.constant 1.280000e+02 : f32
    %199 = vector.broadcast %cst_37 : f32 to vector<32x1xf32>
    %200 = arith.divf %198, %199 : vector<32x1xf32>
    %201 = arith.mulf %194, %194 : vector<32x128xf32>
    %cst_38 = arith.constant dense<0.000000e+00> : vector<32xf32>
    %202 = vector.multi_reduction <add>, %201, %cst_38 [1] : vector<32x128xf32> to vector<32xf32>
    %203 = vector.shape_cast %202 : vector<32xf32> to vector<32x1xf32>
    %cst_39 = arith.constant 1.280000e+02 : f32
    %204 = vector.broadcast %cst_39 : f32 to vector<32x1xf32>
    %205 = arith.divf %203, %204 : vector<32x1xf32>
    %206 = arith.mulf %200, %200 : vector<32x1xf32>
    %207 = arith.subf %205, %206 : vector<32x1xf32>
    %cst_40 = arith.constant 9.99999974E-6 : f32
    %208 = vector.broadcast %cst_40 : f32 to vector<32x1xf32>
    %209 = arith.addf %207, %208 : vector<32x1xf32>
    %210 = math.rsqrt %209 : vector<32x1xf32>
    %211 = arith.mulf %195, %210 : vector<32x1xf32>
    %212 = vector.broadcast %211 : vector<32x1xf32> to vector<32x128xf32>
    %213 = arith.mulf %212, %194 : vector<32x128xf32>
    %214 = arith.mulf %211, %200 : vector<32x1xf32>
    %215 = arith.subf %196, %214 : vector<32x1xf32>
    %216 = vector.broadcast %215 : vector<32x1xf32> to vector<32x128xf32>
    %217 = arith.addf %213, %216 : vector<32x128xf32>
    %cst_41 = arith.constant 0.000000e+00 : f32
    %218 = vector.broadcast %cst_41 : f32 to vector<32x128xf32>
    %219 = arith.maximumf %217, %218 : vector<32x128xf32>
    %cst_42 = arith.constant dense<0.000000e+00> : vector<32x32xf32>
    %220 = tpu.matmul %219, %114, %cst_42 {dimension_numbers = #tpu.dot_dimension_numbers<[1], [0], [0], [1], [0, 0, 1, 1], [], []>} : vector<32x128xf32>, vector<128x32xf32>, vector<32x32xf32> -> vector<32x32xf32>
    %cst_43 = arith.constant dense<0.000000e+00> : vector<32x128xf32>
    %221 = tpu.matmul %220, %114, %cst_43 {dimension_numbers = #tpu.dot_dimension_numbers<[1], [1], [0], [0], [0, 0, 1, 0], [], []>} : vector<32x32xf32>, vector<128x32xf32>, vector<32x128xf32> -> vector<32x128xf32>
    %cst_44 = arith.constant 4.000000e+00 : f32
    %222 = vector.broadcast %cst_44 : f32 to vector<32x128xf32>
    %223 = arith.mulf %222, %221 : vector<32x128xf32>
    %c9_i32_45 = arith.constant 9 : i32
    %224 = tpu.dynamic_rotate %223 by %c9_i32_45 dim 1 : vector<32x128xf32>, i32 -> vector<32x128xf32>
    %225 = vector.broadcast %48 : vector<1x128xf32> to vector<32x128xf32>
    %226 = arith.mulf %224, %225 : vector<32x128xf32>
    %c8_i32_46 = arith.constant 8 : i32
    %227 = tpu.dynamic_rotate %223 by %c8_i32_46 dim 1 : vector<32x128xf32>, i32 -> vector<32x128xf32>
    %228 = vector.broadcast %50 : vector<1x128xf32> to vector<32x128xf32>
    %229 = arith.mulf %227, %228 : vector<32x128xf32>
    %c7_i32_47 = arith.constant 7 : i32
    %230 = tpu.dynamic_rotate %223 by %c7_i32_47 dim 1 : vector<32x128xf32>, i32 -> vector<32x128xf32>
    %231 = vector.broadcast %53 : vector<1x128xf32> to vector<32x128xf32>
    %232 = arith.mulf %230, %231 : vector<32x128xf32>
    %c1_i32_48 = arith.constant 1 : i32
    %233 = tpu.dynamic_rotate %223 by %c1_i32_48 dim 1 : vector<32x128xf32>, i32 -> vector<32x128xf32>
    %234 = vector.broadcast %55 : vector<1x128xf32> to vector<32x128xf32>
    %235 = arith.mulf %233, %234 : vector<32x128xf32>
    %c127_i32_49 = arith.constant 127 : i32
    %236 = tpu.dynamic_rotate %223 by %c127_i32_49 dim 1 : vector<32x128xf32>, i32 -> vector<32x128xf32>
    %237 = vector.broadcast %57 : vector<1x128xf32> to vector<32x128xf32>
    %238 = arith.mulf %236, %237 : vector<32x128xf32>
    %c121_i32_50 = arith.constant 121 : i32
    %239 = tpu.dynamic_rotate %223 by %c121_i32_50 dim 1 : vector<32x128xf32>, i32 -> vector<32x128xf32>
    %240 = vector.broadcast %60 : vector<1x128xf32> to vector<32x128xf32>
    %241 = arith.mulf %239, %240 : vector<32x128xf32>
    %c120_i32_51 = arith.constant 120 : i32
    %242 = tpu.dynamic_rotate %223 by %c120_i32_51 dim 1 : vector<32x128xf32>, i32 -> vector<32x128xf32>
    %243 = vector.broadcast %62 : vector<1x128xf32> to vector<32x128xf32>
    %244 = arith.mulf %242, %243 : vector<32x128xf32>
    %c119_i32_52 = arith.constant 119 : i32
    %245 = tpu.dynamic_rotate %223 by %c119_i32_52 dim 1 : vector<32x128xf32>, i32 -> vector<32x128xf32>
    %246 = vector.broadcast %65 : vector<1x128xf32> to vector<32x128xf32>
    %247 = arith.mulf %245, %246 : vector<32x128xf32>
    %248 = tpu.concatenate %226, %229, %232, %235, %223, %238, %241, %244, %247 in 0 : vector<32x128xf32>, vector<32x128xf32>, vector<32x128xf32>, vector<32x128xf32>, vector<32x128xf32>, vector<32x128xf32>, vector<32x128xf32>, vector<32x128xf32>, vector<32x128xf32> -> vector<288x128xf32>
    %c48 = arith.constant 48 : index
    %c0_53 = arith.constant 0 : index
    %249 = vector.load %arg4[%c48, %c0_53] : memref<79x288xf32, #tpu.memory_space<vmem>>, vector<16x288xf32>
    %cst_54 = arith.constant dense<0.000000e+00> : vector<16x128xf32>
    %250 = tpu.matmul %249, %248, %cst_54 {dimension_numbers = #tpu.dot_dimension_numbers<[1], [0], [0], [1], [0, 0, 1, 1], [], []>} : vector<16x288xf32>, vector<288x128xf32>, vector<16x128xf32> -> vector<16x128xf32>
    %c48_55 = arith.constant 48 : index
    %c0_56 = arith.constant 0 : index
    %251 = vector.load %arg5[%c48_55, %c0_56] : memref<158x1xf32, #tpu.memory_space<vmem>>, vector<16x1xf32>
    %c127 = arith.constant 127 : index
    %c0_57 = arith.constant 0 : index
    %252 = vector.load %arg5[%c127, %c0_57] : memref<158x1xf32, #tpu.memory_space<vmem>>, vector<16x1xf32>
    %cst_58 = arith.constant dense<0.000000e+00> : vector<16xf32>
    %253 = vector.multi_reduction <add>, %250, %cst_58 [1] : vector<16x128xf32> to vector<16xf32>
    %254 = vector.shape_cast %253 : vector<16xf32> to vector<16x1xf32>
    %cst_59 = arith.constant 1.280000e+02 : f32
    %255 = vector.broadcast %cst_59 : f32 to vector<16x1xf32>
    %256 = arith.divf %254, %255 : vector<16x1xf32>
    %257 = arith.mulf %250, %250 : vector<16x128xf32>
    %cst_60 = arith.constant dense<0.000000e+00> : vector<16xf32>
    %258 = vector.multi_reduction <add>, %257, %cst_60 [1] : vector<16x128xf32> to vector<16xf32>
    %259 = vector.shape_cast %258 : vector<16xf32> to vector<16x1xf32>
    %cst_61 = arith.constant 1.280000e+02 : f32
    %260 = vector.broadcast %cst_61 : f32 to vector<16x1xf32>
    %261 = arith.divf %259, %260 : vector<16x1xf32>
    %262 = arith.mulf %256, %256 : vector<16x1xf32>
    %263 = arith.subf %261, %262 : vector<16x1xf32>
    %cst_62 = arith.constant 9.99999974E-6 : f32
    %264 = vector.broadcast %cst_62 : f32 to vector<16x1xf32>
    %265 = arith.addf %263, %264 : vector<16x1xf32>
    %266 = math.rsqrt %265 : vector<16x1xf32>
    %267 = arith.mulf %251, %266 : vector<16x1xf32>
    %268 = vector.broadcast %267 : vector<16x1xf32> to vector<16x128xf32>
    %269 = arith.mulf %268, %250 : vector<16x128xf32>
    %270 = arith.mulf %267, %256 : vector<16x1xf32>
    %271 = arith.subf %252, %270 : vector<16x1xf32>
    %272 = vector.broadcast %271 : vector<16x1xf32> to vector<16x128xf32>
    %273 = arith.addf %269, %272 : vector<16x128xf32>
    %cst_63 = arith.constant 0.000000e+00 : f32
    %274 = vector.broadcast %cst_63 : f32 to vector<16x128xf32>
    %275 = arith.maximumf %273, %274 : vector<16x128xf32>
    %276 = tpu.concatenate %275, %167 in 0 : vector<16x128xf32>, vector<16x128xf32> -> vector<32x128xf32>
    %cst_64 = arith.constant dense<0.000000e+00> : vector<32x512xf32>
    %277 = tpu.matmul %276, %112, %cst_64 {dimension_numbers = #tpu.dot_dimension_numbers<[1], [1], [0], [0], [0, 0, 1, 0], [], []>} : vector<32x128xf32>, vector<512x128xf32>, vector<32x512xf32> -> vector<32x512xf32>
    %cst_65 = arith.constant 4.000000e+00 : f32
    %278 = vector.broadcast %cst_65 : f32 to vector<32x512xf32>
    %279 = arith.mulf %278, %277 : vector<32x512xf32>
    %c17_i32_66 = arith.constant 17 : i32
    %280 = tpu.dynamic_rotate %279 by %c17_i32_66 dim 1 : vector<32x512xf32>, i32 -> vector<32x512xf32>
    %281 = vector.broadcast %16 : vector<1x512xf32> to vector<32x512xf32>
    %282 = arith.mulf %280, %281 : vector<32x512xf32>
    %c16_i32_67 = arith.constant 16 : i32
    %283 = tpu.dynamic_rotate %279 by %c16_i32_67 dim 1 : vector<32x512xf32>, i32 -> vector<32x512xf32>
    %284 = vector.broadcast %18 : vector<1x512xf32> to vector<32x512xf32>
    %285 = arith.mulf %283, %284 : vector<32x512xf32>
    %c15_i32_68 = arith.constant 15 : i32
    %286 = tpu.dynamic_rotate %279 by %c15_i32_68 dim 1 : vector<32x512xf32>, i32 -> vector<32x512xf32>
    %287 = vector.broadcast %21 : vector<1x512xf32> to vector<32x512xf32>
    %288 = arith.mulf %286, %287 : vector<32x512xf32>
    %c1_i32_69 = arith.constant 1 : i32
    %289 = tpu.dynamic_rotate %279 by %c1_i32_69 dim 1 : vector<32x512xf32>, i32 -> vector<32x512xf32>
    %290 = vector.broadcast %23 : vector<1x512xf32> to vector<32x512xf32>
    %291 = arith.mulf %289, %290 : vector<32x512xf32>
    %c511_i32_70 = arith.constant 511 : i32
    %292 = tpu.dynamic_rotate %279 by %c511_i32_70 dim 1 : vector<32x512xf32>, i32 -> vector<32x512xf32>
    %293 = vector.broadcast %25 : vector<1x512xf32> to vector<32x512xf32>
    %294 = arith.mulf %292, %293 : vector<32x512xf32>
    %c497_i32_71 = arith.constant 497 : i32
    %295 = tpu.dynamic_rotate %279 by %c497_i32_71 dim 1 : vector<32x512xf32>, i32 -> vector<32x512xf32>
    %296 = vector.broadcast %28 : vector<1x512xf32> to vector<32x512xf32>
    %297 = arith.mulf %295, %296 : vector<32x512xf32>
    %c496_i32_72 = arith.constant 496 : i32
    %298 = tpu.dynamic_rotate %279 by %c496_i32_72 dim 1 : vector<32x512xf32>, i32 -> vector<32x512xf32>
    %299 = vector.broadcast %30 : vector<1x512xf32> to vector<32x512xf32>
    %300 = arith.mulf %298, %299 : vector<32x512xf32>
    %c495_i32_73 = arith.constant 495 : i32
    %301 = tpu.dynamic_rotate %279 by %c495_i32_73 dim 1 : vector<32x512xf32>, i32 -> vector<32x512xf32>
    %302 = vector.broadcast %33 : vector<1x512xf32> to vector<32x512xf32>
    %303 = arith.mulf %301, %302 : vector<32x512xf32>
    %304 = tpu.concatenate %282, %285, %288, %291, %279, %294, %297, %300, %303 in 0 : vector<32x512xf32>, vector<32x512xf32>, vector<32x512xf32>, vector<32x512xf32>, vector<32x512xf32>, vector<32x512xf32>, vector<32x512xf32>, vector<32x512xf32>, vector<32x512xf32> -> vector<288x512xf32>
    %c64 = arith.constant 64 : index
    %c0_74 = arith.constant 0 : index
    %305 = vector.load %arg4[%c64, %c0_74] : memref<79x288xf32, #tpu.memory_space<vmem>>, vector<8x288xf32>
    %cst_75 = arith.constant dense<0.000000e+00> : vector<8x512xf32>
    %306 = tpu.matmul %305, %304, %cst_75 {dimension_numbers = #tpu.dot_dimension_numbers<[1], [0], [0], [1], [0, 0, 1, 1], [], []>} : vector<8x288xf32>, vector<288x512xf32>, vector<8x512xf32> -> vector<8x512xf32>
    %c64_76 = arith.constant 64 : index
    %c0_77 = arith.constant 0 : index
    %307 = vector.load %arg5[%c64_76, %c0_77] : memref<158x1xf32, #tpu.memory_space<vmem>>, vector<8x1xf32>
    %c143 = arith.constant 143 : index
    %c0_78 = arith.constant 0 : index
    %308 = vector.load %arg5[%c143, %c0_78] : memref<158x1xf32, #tpu.memory_space<vmem>>, vector<8x1xf32>
    %cst_79 = arith.constant dense<0.000000e+00> : vector<8xf32>
    %309 = vector.multi_reduction <add>, %306, %cst_79 [1] : vector<8x512xf32> to vector<8xf32>
    %310 = vector.shape_cast %309 : vector<8xf32> to vector<8x1xf32>
    %cst_80 = arith.constant 5.120000e+02 : f32
    %311 = vector.broadcast %cst_80 : f32 to vector<8x1xf32>
    %312 = arith.divf %310, %311 : vector<8x1xf32>
    %313 = arith.mulf %306, %306 : vector<8x512xf32>
    %cst_81 = arith.constant dense<0.000000e+00> : vector<8xf32>
    %314 = vector.multi_reduction <add>, %313, %cst_81 [1] : vector<8x512xf32> to vector<8xf32>
    %315 = vector.shape_cast %314 : vector<8xf32> to vector<8x1xf32>
    %cst_82 = arith.constant 5.120000e+02 : f32
    %316 = vector.broadcast %cst_82 : f32 to vector<8x1xf32>
    %317 = arith.divf %315, %316 : vector<8x1xf32>
    %318 = arith.mulf %312, %312 : vector<8x1xf32>
    %319 = arith.subf %317, %318 : vector<8x1xf32>
    %cst_83 = arith.constant 9.99999974E-6 : f32
    %320 = vector.broadcast %cst_83 : f32 to vector<8x1xf32>
    %321 = arith.addf %319, %320 : vector<8x1xf32>
    %322 = math.rsqrt %321 : vector<8x1xf32>
    %323 = arith.mulf %307, %322 : vector<8x1xf32>
    %324 = vector.broadcast %323 : vector<8x1xf32> to vector<8x512xf32>
    %325 = arith.mulf %324, %306 : vector<8x512xf32>
    %326 = arith.mulf %323, %312 : vector<8x1xf32>
    %327 = arith.subf %308, %326 : vector<8x1xf32>
    %328 = vector.broadcast %327 : vector<8x1xf32> to vector<8x512xf32>
    %329 = arith.addf %325, %328 : vector<8x512xf32>
    %cst_84 = arith.constant 0.000000e+00 : f32
    %330 = vector.broadcast %cst_84 : f32 to vector<8x512xf32>
    %331 = arith.maximumf %329, %330 : vector<8x512xf32>
    %332 = tpu.concatenate %331, %110 in 0 : vector<8x512xf32>, vector<8x512xf32> -> vector<16x512xf32>
    %c72 = arith.constant 72 : index
    %c0_85 = arith.constant 0 : index
    %333 = vector.load %arg5[%c72, %c0_85] : memref<158x1xf32, #tpu.memory_space<vmem>>, vector<7x1xf32>
    %c17_i32_86 = arith.constant 17 : i32
    %334 = tpu.dynamic_rotate %332 by %c17_i32_86 dim 1 : vector<16x512xf32>, i32 -> vector<16x512xf32>
    %335 = vector.broadcast %16 : vector<1x512xf32> to vector<16x512xf32>
    %336 = arith.mulf %334, %335 : vector<16x512xf32>
    %c16_i32_87 = arith.constant 16 : i32
    %337 = tpu.dynamic_rotate %332 by %c16_i32_87 dim 1 : vector<16x512xf32>, i32 -> vector<16x512xf32>
    %338 = vector.broadcast %18 : vector<1x512xf32> to vector<16x512xf32>
    %339 = arith.mulf %337, %338 : vector<16x512xf32>
    %c15_i32_88 = arith.constant 15 : i32
    %340 = tpu.dynamic_rotate %332 by %c15_i32_88 dim 1 : vector<16x512xf32>, i32 -> vector<16x512xf32>
    %341 = vector.broadcast %21 : vector<1x512xf32> to vector<16x512xf32>
    %342 = arith.mulf %340, %341 : vector<16x512xf32>
    %c1_i32_89 = arith.constant 1 : i32
    %343 = tpu.dynamic_rotate %332 by %c1_i32_89 dim 1 : vector<16x512xf32>, i32 -> vector<16x512xf32>
    %344 = vector.broadcast %23 : vector<1x512xf32> to vector<16x512xf32>
    %345 = arith.mulf %343, %344 : vector<16x512xf32>
    %c511_i32_90 = arith.constant 511 : i32
    %346 = tpu.dynamic_rotate %332 by %c511_i32_90 dim 1 : vector<16x512xf32>, i32 -> vector<16x512xf32>
    %347 = vector.broadcast %25 : vector<1x512xf32> to vector<16x512xf32>
    %348 = arith.mulf %346, %347 : vector<16x512xf32>
    %c497_i32_91 = arith.constant 497 : i32
    %349 = tpu.dynamic_rotate %332 by %c497_i32_91 dim 1 : vector<16x512xf32>, i32 -> vector<16x512xf32>
    %350 = vector.broadcast %28 : vector<1x512xf32> to vector<16x512xf32>
    %351 = arith.mulf %349, %350 : vector<16x512xf32>
    %c496_i32_92 = arith.constant 496 : i32
    %352 = tpu.dynamic_rotate %332 by %c496_i32_92 dim 1 : vector<16x512xf32>, i32 -> vector<16x512xf32>
    %353 = vector.broadcast %30 : vector<1x512xf32> to vector<16x512xf32>
    %354 = arith.mulf %352, %353 : vector<16x512xf32>
    %c495_i32_93 = arith.constant 495 : i32
    %355 = tpu.dynamic_rotate %332 by %c495_i32_93 dim 1 : vector<16x512xf32>, i32 -> vector<16x512xf32>
    %356 = vector.broadcast %33 : vector<1x512xf32> to vector<16x512xf32>
    %357 = arith.mulf %355, %356 : vector<16x512xf32>
    %358 = tpu.concatenate %336, %339, %342, %345, %332, %348, %351, %354, %357 in 0 : vector<16x512xf32>, vector<16x512xf32>, vector<16x512xf32>, vector<16x512xf32>, vector<16x512xf32>, vector<16x512xf32>, vector<16x512xf32>, vector<16x512xf32>, vector<16x512xf32> -> vector<144x512xf32>
    %c72_94 = arith.constant 72 : index
    %c0_95 = arith.constant 0 : index
    %359 = vector.load %arg4[%c72_94, %c0_95] : memref<79x288xf32, #tpu.memory_space<vmem>>, vector<7x144xf32>
    %cst_96 = arith.constant dense<0.000000e+00> : vector<7x512xf32>
    %360 = tpu.matmul %359, %358, %cst_96 {dimension_numbers = #tpu.dot_dimension_numbers<[1], [0], [0], [1], [0, 0, 1, 1], [], []>} : vector<7x144xf32>, vector<144x512xf32>, vector<7x512xf32> -> vector<7x512xf32>
    %361 = vector.broadcast %333 : vector<7x1xf32> to vector<7x512xf32>
    %362 = arith.addf %360, %361 : vector<7x512xf32>
    %363 = vector.extract_strided_slice %362 {offsets = [0, 0], sizes = [5, 512], strides = [1, 1]} : vector<7x512xf32> to vector<5x512xf32>
    %cst_97 = arith.constant dense<0xFF800000> : vector<512xf32>
    %364 = vector.multi_reduction <maximumf>, %363, %cst_97 [0] : vector<5x512xf32> to vector<512xf32>
    %365 = vector.shape_cast %364 : vector<512xf32> to vector<1x512xf32>
    %366 = vector.broadcast %365 : vector<1x512xf32> to vector<5x512xf32>
    %367 = arith.subf %363, %366 : vector<5x512xf32>
    %368 = math.exp %367 : vector<5x512xf32>
    %cst_98 = arith.constant dense<0.000000e+00> : vector<512xf32>
    %369 = vector.multi_reduction <add>, %368, %cst_98 [0] : vector<5x512xf32> to vector<512xf32>
    %370 = vector.shape_cast %369 : vector<512xf32> to vector<1x512xf32>
    %371 = vector.broadcast %370 : vector<1x512xf32> to vector<5x512xf32>
    %372 = arith.divf %368, %371 : vector<5x512xf32>
    %c16_99 = arith.constant 16 : index
    %c0_100 = arith.constant 0 : index
    %373 = vector.load %arg1[%c16_99, %c0_100] : memref<28x512xf32, #tpu.memory_space<vmem>>, vector<10x512xf32>
    %374 = vector.extract_strided_slice %373 {offsets = [0, 0], sizes = [5, 512], strides = [1, 1]} : vector<10x512xf32> to vector<5x512xf32>
    %375 = arith.mulf %374, %372 : vector<5x512xf32>
    %cst_101 = arith.constant dense<0.000000e+00> : vector<512xf32>
    %376 = vector.multi_reduction <add>, %375, %cst_101 [0] : vector<5x512xf32> to vector<512xf32>
    %377 = vector.shape_cast %376 : vector<512xf32> to vector<1x512xf32>
    %378 = vector.extract_strided_slice %373 {offsets = [5, 0], sizes = [5, 512], strides = [1, 1]} : vector<10x512xf32> to vector<5x512xf32>
    %379 = arith.mulf %378, %372 : vector<5x512xf32>
    %cst_102 = arith.constant dense<0.000000e+00> : vector<512xf32>
    %380 = vector.multi_reduction <add>, %379, %cst_102 [0] : vector<5x512xf32> to vector<512xf32>
    %381 = vector.shape_cast %380 : vector<512xf32> to vector<1x512xf32>
    %382 = vector.extract_strided_slice %362 {offsets = [5, 0], sizes = [2, 512], strides = [1, 1]} : vector<7x512xf32> to vector<2x512xf32>
    %383 = vector.extract_strided_slice %382 {offsets = [0, 0], sizes = [1, 512], strides = [1, 1]} : vector<2x512xf32> to vector<1x512xf32>
    %384 = arith.addf %377, %383 : vector<1x512xf32>
    %385 = arith.addf %384, %67 : vector<1x512xf32>
    %386 = vector.extract_strided_slice %382 {offsets = [1, 0], sizes = [1, 512], strides = [1, 1]} : vector<2x512xf32> to vector<1x512xf32>
    %387 = arith.addf %381, %386 : vector<1x512xf32>
    %388 = arith.addf %387, %68 : vector<1x512xf32>
    %cst_103 = arith.constant 0.000000e+00 : f32
    %389 = vector.broadcast %cst_103 : f32 to vector<1x512xf32>
    %390 = tpu.concatenate %385, %388, %389 in 0 : vector<1x512xf32>, vector<1x512xf32>, vector<1x512xf32> -> vector<3x512xf32>
    %c0_104 = arith.constant 0 : index
    %c0_105 = arith.constant 0 : index
    %391 = vector.load %arg6[%c0_104, %c0_105] : memref<3x512xf32, #tpu.memory_space<vmem>>, vector<3x512xf32>
    tpu.vector_store %arg6[%c0_104, %c0_105], %390 {strides = array<i32>} : memref<3x512xf32, #tpu.memory_space<vmem>>, vector<3x512xf32>,
    return
  }
  func.func @transform_0(%arg0: i32) -> (i32, i32) {
    %c0_i32 = arith.constant 0 : i32
    %c0_i32_0 = arith.constant 0 : i32
    %c0_i32_1 = arith.constant 0 : i32
    return %c0_i32, %c0_i32_0 : i32, i32
  }
  func.func @transform_1(%arg0: i32) -> (i32, i32) {
    %c0_i32 = arith.constant 0 : i32
    %c0_i32_0 = arith.constant 0 : i32
    %c0_i32_1 = arith.constant 0 : i32
    return %c0_i32, %c0_i32_0 : i32, i32
  }
  func.func @transform_2(%arg0: i32) -> (i32, i32) {
    %c0_i32 = arith.constant 0 : i32
    %c0_i32_0 = arith.constant 0 : i32
    %c0_i32_1 = arith.constant 0 : i32
    return %c0_i32, %c0_i32_0 : i32, i32
  }
  func.func @transform_3(%arg0: i32) -> (i32, i32) {
    %c0_i32 = arith.constant 0 : i32
    %c0_i32_0 = arith.constant 0 : i32
    %c0_i32_1 = arith.constant 0 : i32
    return %c0_i32, %c0_i32_0 : i32, i32
  }
  func.func @transform_4(%arg0: i32) -> (i32, i32) {
    %c0_i32 = arith.constant 0 : i32
    %c0_i32_0 = arith.constant 0 : i32
    %c0_i32_1 = arith.constant 0 : i32
    return %c0_i32, %c0_i32_0 : i32, i32
  }
  func.func @transform_5(%arg0: i32) -> (i32, i32) {
    %c0_i32 = arith.constant 0 : i32
    %c0_i32_0 = arith.constant 0 : i32
    %c0_i32_1 = arith.constant 0 : i32
    return %c0_i32, %c0_i32_0 : i32, i32
  }
}

</mosaic_0001>

<bundles_post_ra>
// kernel: tile.9
= control target key start
LH: loop header
LB: loop body
LE: loop exit
PB: predicated region body
PF: predicated region fallthrough
CT: control target
= control target key end

     0   :  { %s7_s6 = smov 3  ;;  %s21_s9 = smov 3  ;;  %vm4_vm0 = vcmask 130048   ;;  %vm11_vm1 = vcmask 1048448   ;;  %vm18_vm2 = vcmask 917248   ;;  %vm25_vm3 = vcmask 786048   ;;  %s119_s0 = inlined_call_operand.vmem [shape: f32[16,16], index: 0, kind: input, shape index: {}]   ;;  %s120_s1 = inlined_call_operand.vmem [shape: f32[256], index: 1, kind: output, shape index: {}]  }
   0x1   :  { %v61_v0 = vld [vmem:[%s119_s0 + $0x7] ss:$8 sm:%s7_s6]   ;;  %s75_s10 = smov 112   ;;  %v63_v1 = vld [vmem:[%s119_s0 + $0x5] ss:$8 sm:%s21_s9]   ;;  %s14_s13 = smov 3 }
   0x2   :  { %9 = vrot.lane.b32.xlu0 %v61_v0, %s75_s10  ;;  %s76_s14 = smov 80   ;;  %v62_v2 = vld [vmem:[%s119_s0 + $0x6] ss:$8 sm:%s14_s13]   ;;  %s28_s17 = smov 3  ;;  %vm32_vm4 = vcmask 654848   ;;  %vm39_vm5 = vcmask 523648  }
   0x3   :  { %23 = vrot.lane.b32.xlu1 %v63_v1, %s76_s14  ;;  %v64_v3 = vld [vmem:[%s119_s0 + $0x4] ss:$8 sm:%s28_s17]   ;;  %s35_s20 = smov 3  ;;  %s42_s21 = smov 3  ;;  %vm46_vm6 = vcmask 392448   ;;  %vm53_vm7 = vcmask 261248  }
   0x4   :  { %s77_s22 = smov 96   ;;  %s78_s23 = smov 64   ;;  %v65_v4 = vld [vmem:[%s119_s0 + $0x3] ss:$8 sm:%s35_s20]   ;;  %v66_v5 = vld [vmem:[%s119_s0 + $0x2] ss:$8 sm:%s42_s21]  }
   0x5   :  { %s2_s26 = smov 3  ;;  %s49_s29 = smov 3 }
   0x6   :  { %16 = vrot.lane.b32.xlu0 %v62_v2, %s77_s22  ;;  %v3_v6 = vld [vmem:[%s119_s0] ss:$8 sm:%s2_s26]   ;;  %s79_s3 = smov 48   ;;  %s80_s4 = smov 32  }
   0x7   :  { %30 = vrot.lane.b32.xlu1 %v64_v3, %s78_s23  ;;  %5 = vst.msk [vmem:[#allocation0] sm:$0x3] %vm4_vm0, %v3_v6   ;;  %v67_v7 = vld [vmem:[%s119_s0 + $0x1] ss:$8 sm:%s49_s29]   ;;  %s81_s0 = smov 16  }
   0xa   :  { %37 = vrot.lane.b32.xlu0 %v65_v4, %s79_s3 }
   0xb   :  { %44 = vrot.lane.b32.xlu1 %v66_v5, %s80_s4 }
   0xe   :  { %51 = vrot.lane.b32.xlu0 %v67_v7, %s81_s0 }
  0x74   :  { %v10_v8 = vpop.permute.xlu0 %9  }
  0x75   :  { %12 = vst.msk [vmem:[#allocation0] sm:$0x3] %vm11_vm1, %v10_v8   ;;  %v24_v9 = vpop.permute.xlu1 %23  }
  0x78   :  { %v17_v10 = vpop.permute.xlu0 %16  }
  0x79   :  { %19 = vst.msk [vmem:[#allocation0] sm:$0x3] %vm18_vm2, %v17_v10   ;;  %v31_v11 = vpop.permute.xlu1 %30  }
  0x7a   :  { %26 = vst.msk [vmem:[#allocation0] sm:$0x3] %vm25_vm3, %v24_v9  }
  0x7b   :  { %33 = vst.msk [vmem:[#allocation0] sm:$0x3] %vm32_vm4, %v31_v11  }
  0x7c   :  { %v38_v12 = vpop.permute.xlu0 %37  }
  0x7d   :  { %40 = vst.msk [vmem:[#allocation0] sm:$0x3] %vm39_vm5, %v38_v12   ;;  %v45_v13 = vpop.permute.xlu1 %44  }
  0x7e   :  { %47 = vst.msk [vmem:[#allocation0] sm:$0x3] %vm46_vm6, %v45_v13  }
  0x80   :  { %v52_v14 = vpop.permute.xlu0 %51  }
  0x81   :  { %54 = vst.msk [vmem:[#allocation0] sm:$0x3] %vm53_vm7, %v52_v14  }
  0x88   :  { %v58_v15 = vld [vmem:[#allocation0] sm:$0x3] }
  0x89   :  { %60 = vst [vmem:[%s120_s1] sm:$0x3] %v58_v15 }

// kernel: dense_motion_forward.1
= control target key start
LH: loop header
LB: loop body
LE: loop exit
PB: predicated region body
PF: predicated region fallthrough
CT: control target
= control target key end

     0   :  { %v20_v0 = vlaneseq  ;;  %v7761_v1 = vmov 0.0   ;;  %v4921_v26 = vmov 1.0   ;;  %vm7756_vm9 = vcmask 1041408   ;;  %s4922_s17 = smov 16   ;;  %s4923_s18 = smov 17   ;;  %s7750_s0 = inlined_call_operand.vmem [shape: f32[28,512], index: 0, kind: input, shape index: {}]   ;;  %s7751_s3 = inlined_call_operand.vmem [shape: f32[79,288], index: 3, kind: input, shape index: {}]   ;;  %s7752_s1 = inlined_call_operand.vmem [shape: bf16[512,128], index: 1, kind: input, shape index: {}]   ;;  %s7753_s4 = inlined_call_operand.vmem [shape: f32[158,1], index: 4, kind: input, shape index: {}]   ;;  %s7754_s2 = inlined_call_operand.vmem [shape: bf16[128,32], index: 2, kind: input, shape index: {}]   ;;  %s7755_s5 = inlined_call_operand.vmem [shape: f32[3,512], index: 5, kind: output, shape index: {}]  }
   0x1   :  { %481 = vmatprep.mubr.f32.mxu1 %v7761_v1  ;;  %v156_v4 = vld [vmem:[%s7750_s0 + $0x68] sm:$0xc]  ;;  %v157_v7 = vld [vmem:[%s7750_s0 + $0x70] sm:$0xc]  ;;  %v155_v20 = vld [vmem:[%s7750_s0 + $0x60] sm:$0xc] }
   0x2   :  { %v4969_v2 = vand.u32 127, %v20_v0  ;;  %v4971_v3 = vshrl.u32 %v20_v0, 7  ;;  %v160_v11 = vld [vmem:[%s7750_s0 + $0x8] sm:$0xff]  ;;  %v161_v12 = vld [vmem:[%s7750_s0 + $0x10] sm:$0xff]  ;;  %v159_v24 = vld [vmem:[%s7750_s0] sm:$0xff]  ;;  %vm400_vm13 = vcmask 15360  }
   0x3   :  { %v164_v14 = vld [vmem:[%s7750_s0 + $0x28] sm:$0xff]  ;;  %v165_v15 = vld [vmem:[%s7750_s0 + $0x30] sm:$0xff]  ;;  %v163_v25 = vld [vmem:[%s7750_s0 + $0x20] sm:$0xff]  ;;  %s4924_s19 = smov 15   ;;  %s4925_s20 = smov 1  }
   0x4   :  { %v4977_v5 = vadd.s32 128, %v4969_v2  ;;  %v4980_v6 = vmul.u32 256, %v4971_v3  ;;  %v169_v8 = vsub.s32 2, %v4971_v3  ;;  %v193_v9 = vsub.s32 3, %v4971_v3  ;;  %v158_v43 = vld [vmem:[%s7750_s0 + $0x78] sm:$0xc] }
   0x5   :  { %v5001_v13 = vadd.s32 384, %v4969_v2  ;;  %v162_v46 = vld [vmem:[%s7750_s0 + $0x18] sm:$0xff]  ;;  %vm559_vm14 = vcmp.ge.s32.totalorder %v4971_v3, 1  ;;  %vm560_vm15 = vcmp.le.s32.totalorder %v4971_v3, 4  ;;  %s4926_s21 = smov 127   ;;  %s4927_s22 = smov 113  }
   0x6   :  { %vm240_vm0 = vcmp.ge.s32.totalorder %v4977_v5, %v4980_v6  ;;  %v4990_v10 = vadd.s32 256, %v4980_v6  ;;  %vm239_vm1 = vcmp.ge.s32.totalorder %v4969_v2, %v4980_v6  ;;  %v174_v16 = vrot.slane %v156_v4, %v169_v8  ;;  %v166_v47 = vld [vmem:[%s7750_s0 + $0x38] sm:$0xff]  ;;  %s4928_s23 = smov 112   ;;  %s4929_s24 = smov 111  }
   0x7   :  { %v178_v17 = vrot.slane %v157_v7, %v169_v8  ;;  %v198_v18 = vrot.slane %v156_v4, %v193_v9  ;;  %v202_v19 = vrot.slane %v157_v7, %v193_v9  ;;  %v170_v30 = vrot.slane %v155_v20, %v169_v8  ;;  %s4931_s8 = smov 9   ;;  %s4933_s9 = smov 8  }
   0x8   :  { %vm245_vm2 = vcmp.lt.s32.totalorder %v4977_v5, %v4990_v10  ;;  %vm244_vm3 = vcmp.lt.s32.totalorder %v4969_v2, %v4990_v10  ;;  %v184_v22 = vsub.f32 %v174_v16, %v160_v11  ;;  %v194_v31 = vrot.slane %v155_v20, %v193_v9  ;;  %s4934_s10 = smov 121   ;;  %s4935_s11 = smov 7  }
   0x9   :  { %vm5019_vm4 = vmand %vm240_vm0, %vm245_vm2  ;;  %v185_v23 = vsub.f32 %v178_v17, %v161_v12  ;;  %v208_v28 = vsub.f32 %v198_v18, %v164_v14  ;;  %v209_v29 = vsub.f32 %v202_v19, %v165_v15  ;;  %vm242_vm6 = vcmp.ge.s32.totalorder %v5001_v13, %v4980_v6  ;;  %s4936_s12 = smov 120   ;;  %s4937_s13 = smov 119  }
   0xa   :  { %3731 = vmatprep.subr.msk.mxu0 %vm5019_vm4, %v4921_v26  ;;  %vm5034_vm5 = vmand %vm239_vm1, %vm244_vm3  ;;  %v188_v32 = vmul.f32 %v184_v22, %v184_v22  ;;  %v183_v36 = vsub.f32 %v170_v30, %v159_v24  ;;  %v207_v37 = vsub.f32 %v194_v31, %v163_v25  ;;  %vm247_vm7 = vcmp.lt.s32.totalorder %v5001_v13, %v4990_v10 }
   0xb   :  { %3732 = vmatpush1.xpose.msk.msra.mxu0 %vm5034_vm5, %v4921_v26  ;;  %v189_v33 = vmul.f32 %v185_v23, %v185_v23  ;;  %v212_v34 = vmul.f32 %v208_v28, %v208_v28  ;;  %v213_v35 = vmul.f32 %v209_v29, %v209_v29  ;;  %vm5044_vm8 = vmand %vm242_vm6, %vm247_vm7  ;;  %v182_v48 = vrot.slane %v158_v43, %v169_v8 }
   0xc   :  { %v187_v40 = vmul.f32 %v183_v36, %v183_v36  ;;  %v211_v41 = vmul.f32 %v207_v37, %v207_v37  ;;  %3733 = vmatprep.subr.msk.mxu0 %vm5044_vm8, %v4921_v26  ;;  %v206_v49 = vrot.slane %v158_v43, %v193_v9  ;;  %v3728_v50 = vsel %vm5019_vm4, 1.0, %v7761_v1  ;;  %vm561_vm0 = vmand %vm559_vm14, %vm560_vm15 }
   0xd   :  { %v216_v38 = vadd.f32 %v212_v34, %v188_v32  ;;  %v217_v39 = vadd.f32 %v213_v35, %v189_v33  ;;  %3735 = vmatprep.subr.msk.mxu1 %vm7756_vm9, %v3728_v50  ;;  %v186_v54 = vsub.f32 %v182_v48, %v162_v46  ;;  %v5064_v4 = vadd.s32 256, %v4969_v2 }
   0xe   :  { %v215_v45 = vadd.f32 %v211_v41, %v187_v40  ;;  %v210_v55 = vsub.f32 %v206_v49, %v166_v47  ;;  %v3741_v23 = vsel %vm561_vm0, 1.0, %v7761_v1  ;;  %v30_v40 = vand.u32 15, %v4977_v5 }
   0xf   :  { %v220_v44 = vmul.f32 -0.5, %v216_v38  ;;  %v221_v51 = vmul.f32 -0.5, %v217_v39  ;;  %v190_v58 = vmul.f32 %v186_v54, %v186_v54  ;;  %vm241_vm10 = vcmp.ge.s32.totalorder %v5064_v4, %v4980_v6 }
  0x10   :  { %v219_v53 = vmul.f32 -0.5, %v215_v45  ;;  %v214_v59 = vmul.f32 %v210_v55, %v210_v55  ;;  %vm246_vm11 = vcmp.lt.s32.totalorder %v5064_v4, %v4990_v10  ;;  %v3727_v6 = vsel %vm5034_vm5, 1.0, %v7761_v1 }
  0x11   :  { %v225_v52 = vmul.f32 100.0, %v220_v44  ;;  %v226_v60 = vmul.f32 100.0, %v221_v51  ;;  %vm250_vm12 = vmand %vm241_vm10, %vm246_vm11  ;;  %3736 = vmatpush1.msk.msra.mxu1 %vm7756_vm9, %v3727_v6  ;;  %v3730_v10 = vsel %vm5044_vm8, 1.0, %v7761_v1  ;;  %vm5175_vm1 = vcmp.ge.s32.totalorder %v30_v40, 1 }
  0x12   :  { %v224_v57 = vmul.f32 100.0, %v219_v53  ;;  %v218_v62 = vadd.f32 %v214_v59, %v190_v58  ;;  %3738 = vmatprep.subr.msk.mxu1 %vm7756_vm9, %v3730_v10  ;;  %v3729_v15 = vsel %vm250_vm12, 1.0, %v7761_v1  ;;  %vm744_vm2 = vcmp.lt.s32.totalorder %v4969_v2, 17 }
  0x13   :  { %v230_v56 = vmul.f32 1.442695, %v225_v52  ;;  %v232_v0 = vmul.f32 1.442695, %v226_v60  ;;  %vm7757_vm3 = vcmp.lt.s32.totalorder %v4969_v2, 16  ;;  %v5186_v46 = vsel %vm5175_vm1, 1.0, %v7761_v1 }
  0x14   :  { %v228_v61 = vmul.f32 1.442695, %v224_v57  ;;  %v222_v63 = vmul.f32 -0.5, %v218_v62  ;;  %v32_v55 = vand.u32 15, %v5001_v13  ;;  %v27_v57 = vand.u32 255, %v5064_v4 }
  0x15   :  { %4850 = vpow2.f32 %v230_v56  ;;  %v31_v56 = vand.u32 15, %v5064_v4  ;;  %v29_v58 = vand.u32 15, %v4969_v2  ;;  %vm5219_vm4 = vcmp.le.s32.totalorder %v30_v40, 14 }
  0x16   :  { %4852 = vpow2.f32 %v228_v61  ;;  %v227_v7 = vmul.f32 100.0, %v222_v63  ;;  %v25_v61 = vand.u32 255, %v4969_v2  ;;  %vm5223_vm5 = vcmp.ge.s32.totalorder %v32_v55, 1 }
  0x17   :  { %4854 = vpow2.f32 %v232_v0  ;;  %vm5227_vm6 = vcmp.le.s32.totalorder %v32_v55, 14  ;;  %vm7758_vm7 = vcmp.lt.s32.totalorder %v4969_v2, 1  ;;  %v26_v4 = vand.u32 255, %v4977_v5 }
  0x18   :  { %v234_v8 = vmul.f32 1.442695, %v227_v7  ;;  %vm5233_vm8 = vcmp.ge.s32.totalorder %v31_v56, 1  ;;  %vm5237_vm10 = vcmp.ge.s32.totalorder %v27_v57, 16  ;;  %vm5241_vm11 = vcmp.le.s32.totalorder %v31_v56, 14 }
  0x19   :  { %vm5252_vm14 = vcmp.ge.s32.totalorder %v25_v61, 16  ;;  %vm5256_vm15 = vcmp.ge.s32.totalorder %v29_v58, 1  ;;  %v5263_v10 = vsel %vm5219_vm4, 1.0, %v7761_v1  ;;  %vm51_vm0 = vmand %vm5237_vm10, %vm5233_vm8  ;;  %v5345_v40 = vsel %vm5241_vm11, 1.0, %v7761_v1 }
  0x1a   :  { %4856 = vpow2.f32 %v234_v8  ;;  %7923 = vst [vmem:[#allocation8_spill] sm:$0xff] %v5263_v10  ;;  %7935 = vst [vmem:[#allocation17_spill] sm:$0xff] %v5345_v40  ;;  %v5363_v55 = vsel %vm5252_vm14, 1.0, %v7761_v1 }
  0x1b   :  { %7938 = vst [vmem:[#allocation20_spill] sm:$0xff] %v5363_v55 }
  0x1f   :  { %v4851_v9 = vpop.eup %4850 }
  0x20   :  { %324 = vmatprep.mubr.f32.mxu0 %v4851_v9  ;;  %v4853_v11 = vpop.eup %4852 }
  0x21   :  { %325 = vmatmul.mubr.f32.vlgmr.msra.gmra.mrb[0].mxu0 %v4853_v11  ;;  %v4855_v12 = vpop.eup %4854 }
  0x22   :  { %3734 = vmatpush1.xpose.msk.msra.mxu0 %vm250_vm12, %v4921_v26  ;;  %vm7759_vm12 = vcmp.lt.s32.totalorder %v4969_v2, 15 }
  0x24   :  { %v4857_v14 = vpop.eup %4856 }
  0x25   :  { %394 = vmatprep.mubr.f32.mxu0 %v4857_v14 }
  0x29   :  { %395 = vmatmul.mubr.f32.vlgmr.msra.gmra.mrb[0].mxu0 %v4855_v12 }
  0x2a   :  { %1022 = vmatprep.mubr.f32.mxu0 %v7761_v1 }
  0xfc   :  { %v396_v16 = vpop.f32.mrb[0].mxu0 }
  0xfd   :  { %v398_v17 = vpop.f32.mrb[1].mxu0  ;;  %3737 = vmatmul.mubr.msk.f32.vlgmr.msra.gmra.mrb[0].mxu1 %vm400_vm13, %v396_v16 }
  0xfe   :  { %3739 = vmatpush1.msk.msra.mxu1 %vm7756_vm9, %v3729_v15  ;;  %552 = vmatprep.mubr.f32.mxu1 %v7761_v1  ;;  %v5268_v15 = vsel %vm5223_vm5, 1.0, %v7761_v1  ;;  %vm7933_vm9 = vcmp.lt.s32.totalorder %v4969_v2, 16 }
  0xff   :  { %7924 = vst [vmem:[#allocation9_spill] sm:$0xff] %v5268_v15 }
 0x101   :  { %3740 = vmatmul.mubr.msk.f32.vlgmr.msra.gmra.mrb[2].mxu1 %vm400_vm13, %v396_v16  ;;  %vm5246_vm13 = vcmp.le.s32.totalorder %v29_v58, 14  ;;  %v5273_v16 = vsel %vm5227_vm6, 1.0, %v7761_v1 }
 0x102   :  { %945 = vmatprep.mubr.f32.mxu1 %v7761_v1  ;;  %7925 = vst [vmem:[#allocation10_spill] sm:$0xff] %v5273_v16 }
 0x1d0   :  { %v483_v18 = vpop.f32.mrb[0].mxu1 }
 0x1d1   :  { %4858 = vrcp.f32 %v483_v18  ;;  %v485_v19 = vpop.f32.mrb[1].mxu1  ;;  %v5286_v18 = vsel %vm5233_vm8, 1.0, %v7761_v1  ;;  %vm49_vm8 = vmand %vm5252_vm14, %vm5256_vm15 }
 0x1d2   :  { %4860 = vrcp.f32 %v485_v19  ;;  %7926 = vst [vmem:[#allocation11_spill] sm:$0xff] %v5286_v18  ;;  %v5291_v19 = vsel %vm5237_vm10, 1.0, %v7761_v1 }
 0x1d3   :  { %7927 = vst [vmem:[#allocation12_spill] sm:$0xff] %v5291_v19 }
 0x1d4   :  { %v554_v20 = vpop.f32.mrb[2].mxu1 }
 0x1d5   :  { %v556_v21 = vpop.f32.mrb[3].mxu1  ;;  %4862 = vrcp.f32 %v554_v20 }
 0x1d6   :  { %4864 = vrcp.f32 %v556_v21 }
 0x1db   :  { %v4859_v22 = vpop.eup %4858 }
 0x1dc   :  { %v4861_v24 = vpop.eup %4860  ;;  %v565_v25 = vmul.f32 %v4859_v22, %v4853_v11  ;;  %v5309_v22 = vsel %vm5246_vm13, 1.0, %v7761_v1 }
 0x1dd   :  { %v567_v27 = vmul.f32 %v4861_v24, %v4851_v9  ;;  %7930 = vst [vmem:[#allocation13_spill] sm:$0xff] %v5309_v22  ;;  %v28_v24 = vand.u32 255, %v5001_v13 }
 0x1de   :  { %v5086_v26 = vmul.f32 %v3741_v23, %v565_v25 }
 0x1df   :  { %v5092_v3 = vmul.f32 %v3741_v23, %v567_v27  ;;  %v4863_v28 = vpop.eup %4862  ;;  %v5326_v27 = vsel %vm51_vm0, 1.0, %v7761_v1 }
 0x1e0   :  { %7897 = vst [vmem:[#allocation2_spill] sm:$0xff] %v5086_v26  ;;  %753 = vrot.lane.b32.xlu1 %v5086_v26, %s4922_s17  ;;  %736 = vrot.lane.b32.xlu0 %v5086_v26, %s4923_s18  ;;  %v569_v29 = vmul.f32 %v4863_v28, %v4855_v12  ;;  %v4865_v31 = vpop.eup %4864 }
 0x1e1   :  { %7898 = vst [vmem:[#allocation3_spill] sm:$0xff] %v5092_v3  ;;  %v571_v32 = vmul.f32 %v4865_v31, %v4857_v14 }
 0x1e2   :  { %v5106_v30 = vmul.f32 %v3741_v23, %v569_v29 }
 0x1e3   :  { %v5128_v33 = vmul.f32 %v3741_v23, %v571_v32 }
 0x1e4   :  { %770 = vrot.lane.b32.xlu0 %v5086_v26, %s4924_s19  ;;  %755 = vrot.lane.b32.xlu1 %v5092_v3, %s4922_s17  ;;  %7899 = vst [vmem:[#allocation4_spill] sm:$0xff] %v5106_v30 }
 0x1e5   :  { %7900 = vst [vmem:[#allocation5_spill] sm:$0xff] %v5128_v33 }
 0x1e8   :  { %787 = vrot.lane.b32.xlu0 %v5086_v26, %s4925_s20  ;;  %772 = vrot.lane.b32.xlu1 %v5092_v3, %s4924_s19 }
 0x1ec   :  { %804 = vrot.lane.b32.xlu0 %v5086_v26, %s4926_s21  ;;  %789 = vrot.lane.b32.xlu1 %v5092_v3, %s4925_s20 }
 0x1f0   :  { %738 = vrot.lane.b32.xlu0 %v5092_v3, %s4923_s18  ;;  %757 = vrot.lane.b32.xlu1 %v5106_v30, %s4922_s17 }
 0x1f4   :  { %806 = vrot.lane.b32.xlu0 %v5092_v3, %s4926_s21  ;;  %791 = vrot.lane.b32.xlu1 %v5106_v30, %s4925_s20 }
 0x1f8   :  { %823 = vrot.lane.b32.xlu0 %v5092_v3, %s4927_s22  ;;  %808 = vrot.lane.b32.xlu1 %v5106_v30, %s4926_s21 }
 0x1fc   :  { %840 = vrot.lane.b32.xlu0 %v5092_v3, %s4928_s23  ;;  %825 = vrot.lane.b32.xlu1 %v5106_v30, %s4927_s22 }
 0x200   :  { %842 = vrot.lane.b32.xlu1 %v5106_v30, %s4928_s23  ;;  %740 = vrot.lane.b32.xlu0 %v5106_v30, %s4923_s18 }
 0x204   :  { %774 = vrot.lane.b32.xlu0 %v5106_v30, %s4924_s19  ;;  %742 = vrot.lane.b32.xlu1 %v5128_v33, %s4923_s18 }
 0x208   :  { %759 = vrot.lane.b32.xlu0 %v5128_v33, %s4922_s17  ;;  %793 = vrot.lane.b32.xlu1 %v5128_v33, %s4925_s20 }
 0x20c   :  { %776 = vrot.lane.b32.xlu0 %v5128_v33, %s4924_s19  ;;  %810 = vrot.lane.b32.xlu1 %v5128_v33, %s4926_s21 }
 0x210   :  { %821 = vrot.lane.b32.xlu0 %v5086_v26, %s4927_s22  ;;  %827 = vrot.lane.b32.xlu1 %v5128_v33, %s4927_s22 }
 0x214   :  { %838 = vrot.lane.b32.xlu0 %v5086_v26, %s4928_s23  ;;  %844 = vrot.lane.b32.xlu1 %v5128_v33, %s4928_s23 }
 0x218   :  { %857 = vrot.lane.b32.xlu0 %v5092_v3, %s4929_s24  ;;  %859 = vrot.lane.b32.xlu1 %v5106_v30, %s4929_s24 }
 0x21c   :  { %855 = vrot.lane.b32.xlu0 %v5086_v26, %s4929_s24  ;;  %861 = vrot.lane.b32.xlu1 %v5128_v33, %s4929_s24 }
 0x252   :  { %v5158_v34 = vpop.permute.xlu1 %753  ;;  %v5160_v35 = vpop.permute.xlu0 %736 }
 0x256   :  { %v5162_v36 = vpop.permute.xlu0 %770  ;;  %v5164_v37 = vpop.permute.xlu1 %755 }
 0x257   :  { %v5198_v49 = vsel %vm7757_vm3, %v5158_v34, %v5164_v37  ;;  %vm5294_vm3 = vcmp.lt.s32.totalorder %v26_v4, 240 }
 0x258   :  { %7904 = vst [vmem:[#allocation7_spill] sm:$0xff] %v5198_v49  ;;  %v5314_v23 = vsel %vm5294_vm3, 1.0, %v7761_v1 }
 0x259   :  { %7931 = vst [vmem:[#allocation14_spill] sm:$0xff] %v5314_v23 }
 0x25a   :  { %v5166_v38 = vpop.permute.xlu0 %787  ;;  %v5168_v39 = vpop.permute.xlu1 %772 }
 0x25b   :  { %v781_v21 = vsel %vm7759_vm12, %v5162_v36, %v5168_v39  ;;  %vm69_vm12 = vmand %vm5252_vm14, %vm5246_vm13  ;;  %vm7950_vm14 = vcmp.lt.s32.totalorder %v4969_v2, 1 }
 0x25c   :  { %v5372_v58 = vsel %vm69_vm12, 1.0, %v7761_v1  ;;  %vm7947_vm12 = vcmp.lt.s32.totalorder %v4969_v2, 16 }
 0x25d   :  { %7940 = vst [vmem:[#allocation22_spill] sm:$0xff] %v5372_v58  ;;  %vm7949_vm13 = vmmov %vm7947_vm12 }
 0x25e   :  { %v5171_v41 = vpop.permute.xlu0 %804  ;;  %v5173_v42 = vpop.permute.xlu1 %789 }
 0x25f   :  { %v798_v17 = vsel %vm7758_vm7, %v5166_v38, %v5173_v42  ;;  %vm71_vm7 = vmand %vm5237_vm10, %vm5241_vm11  ;;  %vm829_vm10 = vcmp.lt.s32.totalorder %v4969_v2, 113  ;;  %vm7946_vm11 = vcmp.lt.s32.totalorder %v4969_v2, 15 }
 0x260   :  { %v5322_v25 = vmul.f32 %v5186_v46, %v798_v17  ;;  %v5340_v32 = vsel %vm71_vm7, 1.0, %v7761_v1  ;;  %vm7944_vm7 = vcmp.lt.s32.totalorder %v4969_v2, 127 }
 0x261   :  { %7934 = vst [vmem:[#allocation16_spill] sm:$0xff] %v5340_v32  ;;  %vm7954_vm0 = vmmov %vm7944_vm7 }
 0x262   :  { %v739_v44 = vpop.permute.xlu0 %738  ;;  %v5181_v45 = vpop.permute.xlu1 %757  ;;  %7932 = vst [vmem:[#allocation15_spill] sm:$0xff] %v5322_v25 }
 0x263   :  { %v747_v47 = vsel %vm744_vm2, %v5160_v35, %v739_v44  ;;  %v763_v13 = vsel %vm7933_vm9, %v5164_v37, %v5181_v45  ;;  %v5358_v37 = vsel %vm5256_vm15, 1.0, %v7761_v1  ;;  %vm5374_vm9 = vcmp.lt.s32.totalorder %v28_v24, 240  ;;  %vm7953_vm15 = vmmov %vm7950_vm14 }
 0x264   :  { %v5192_v48 = vmul.f32 %v5186_v46, %v747_v47  ;;  %v5350_v47 = vmul.f32 %v5263_v10, %v781_v21  ;;  %7937 = vst [vmem:[#allocation19_spill] sm:$0xff] %v5358_v37  ;;  %v5379_v4 = vmul.f32 %v5291_v19, %v763_v13 }
 0x266   :  { %7903 = vst [vmem:[#allocation6_spill] sm:$0xff] %v5192_v48  ;;  %v5200_v50 = vpop.permute.xlu0 %806  ;;  %v5202_v51 = vpop.permute.xlu1 %791  ;;  %v4301_v52 = vpack.c.bf16 %v5198_v49, %v5192_v48  ;;  %7936 = vst [vmem:[#allocation18_spill] sm:$0xff] %v5350_v47  ;;  %v4305_v11 = vpack.c.bf16 %v5322_v25, %v5350_v47 }
 0x267   :  { %7943 = vst [vmem:[#allocation23_spill] sm:$0xff] %v5379_v4 }
 0x268   :  { %4302 = vmatprep.subr.bf16.mxu1 %v4301_v52  ;;  %v5353_v52 = vsel %vm49_vm8, 1.0, %v7761_v1  ;;  %vm7955_vm8 = vmmov %vm7950_vm14 }
 0x26a   :  { %v5206_v53 = vpop.permute.xlu0 %823  ;;  %v5208_v54 = vpop.permute.xlu1 %808 }
 0x26b   :  { %v814_v7 = vsel %vm7944_vm7, %v5200_v50, %v5208_v54  ;;  %vm98_vm7 = vmand %vm5294_vm3, %vm5175_vm1  ;;  %vm863_vm1 = vcmp.lt.s32.totalorder %v4969_v2, 111 }
 0x26e   :  { %v5214_v59 = vpop.permute.xlu0 %840  ;;  %v5216_v60 = vpop.permute.xlu1 %825 }
 0x272   :  { %v5250_v12 = vpop.permute.xlu1 %842  ;;  %v741_v5 = vpop.permute.xlu0 %740 }
 0x273   :  { %v746_v28 = vsel %vm744_vm2, %v739_v44, %v741_v5 }
 0x274   :  { %v5366_v56 = vmul.f32 %v5326_v27, %v746_v28  ;;  %v5424_v28 = vmul.f32 %v5263_v10, %v814_v7 }
 0x276   :  { %v775_v29 = vpop.permute.xlu0 %774  ;;  %v743_v31 = vpop.permute.xlu1 %742  ;;  %7939 = vst [vmem:[#allocation21_spill] sm:$0xff] %v5366_v56  ;;  %7956 = vst [vmem:[#allocation28_spill] sm:$0xff] %v5424_v28 }
 0x277   :  { %v745_v44 = vsel %vm744_vm2, %v741_v5, %v743_v31  ;;  %v748_v57 = vsel %vm744_vm2, %v743_v31, %v5160_v35  ;;  %v780_v5 = vsel %vm7946_vm11, %v5168_v39, %v775_v29  ;;  %v4319_v31 = vpack.c.bf16 %v5379_v4, %v5366_v56 }
 0x278   :  { %v5386_v8 = vmul.f32 %v5268_v15, %v745_v44  ;;  %v5405_v21 = vmul.f32 %v5353_v52, %v748_v57  ;;  %vm7957_vm11 = vcmp.lt.s32.totalorder %v4969_v2, 112  ;;  %v5437_v13 = vmul.f32 %v5340_v32, %v780_v5 }
 0x27a   :  { %7945 = vst [vmem:[#allocation24_spill] sm:$0xff] %v5386_v8  ;;  %v760_v9 = vpop.permute.xlu0 %759  ;;  %v794_v35 = vpop.permute.xlu1 %793  ;;  %7951 = vst [vmem:[#allocation26_spill] sm:$0xff] %v5405_v21 }
 0x27b   :  { %v5396_v14 = vsel %vm7947_vm12, %v5181_v45, %v760_v9  ;;  %v765_v6 = vsel %vm7949_vm13, %v760_v9, %v5158_v34  ;;  %v799_v17 = vsel %vm7950_vm14, %v794_v35, %v5166_v38  ;;  %v796_v39 = vsel %vm7953_vm15, %v5202_v51, %v794_v35  ;;  %7958 = vst [vmem:[#allocation29_spill] sm:$0xff] %v5437_v13  ;;  %vm7963_vm14 = vmmov %vm7954_vm0 }
 0x27c   :  { %7948 = vst [vmem:[#allocation25_spill] sm:$0xff] %v5396_v14  ;;  %v5408_v24 = vmul.f32 %v5363_v55, %v765_v6  ;;  %v4317_v45 = vpack.c.bf16 %v5396_v14, %v5386_v8  ;;  %v815_v34 = vsel %vm7954_vm0, %v5171_v41, %v5200_v50  ;;  %v797_v38 = vsel %vm7955_vm8, %v5173_v42, %v5202_v51  ;;  %vm7966_vm15 = vmmov %vm7954_vm0 }
 0x27d   :  { %v848_v50 = vsel %vm7957_vm11, %v5214_v59, %v5250_v12  ;;  %v5442_v51 = vmul.f32 %v5358_v37, %v799_v17  ;;  %v5445_v7 = vmul.f32 %v5268_v15, %v796_v39  ;;  %vm7961_vm12 = vcmp.lt.s32.totalorder %v4969_v2, 15  ;;  %vm100_vm0 = vmand %vm5374_vm9, %vm5223_vm5 }
 0x27e   :  { %7952 = vst [vmem:[#allocation27_spill] sm:$0xff] %v5408_v24  ;;  %v4303_v42 = vpack.c.bf16 %v5408_v24, %v5405_v21  ;;  %v777_v44 = vpop.permute.xlu0 %776  ;;  %4318 = vmatprep.subr.bf16.mxu0 %v4317_v45  ;;  %v811_v57 = vpop.permute.xlu1 %810  ;;  %vm7962_vm13 = vmmov %vm7961_vm12  ;;  %v831_v45 = vsel %vm829_vm10, %v5206_v53, %v5216_v60  ;;  %v5494_v63 = vmul.f32 %v5314_v23, %v848_v50 }
 0x27f   :  { %7959 = vst [vmem:[#allocation30_spill] sm:$0xff] %v5442_v51  ;;  %7960 = vst [vmem:[#allocation31_spill] sm:$0xff] %v5445_v7  ;;  %v779_v9 = vsel %vm7961_vm12, %v775_v29, %v777_v44  ;;  %v782_v35 = vsel %vm7962_vm13, %v777_v44, %v5162_v36  ;;  %v816_v5 = vsel %vm7963_vm14, %v811_v57, %v5171_v41  ;;  %4320 = vmatpush1.bf16.msra.mxu0 %v4319_v31 }
 0x280   :  { %v5456_v6 = vmul.f32 %v5372_v58, %v782_v35  ;;  %v5459_v17 = vmul.f32 %v5273_v16, %v779_v9  ;;  %v813_v39 = vsel %vm7966_vm15, %v5208_v54, %v811_v57  ;;  %v5465_v29 = vmul.f32 %v5273_v16, %v816_v5  ;;  %4304 = vmatpush1.bf16.msra.mxu1 %v4303_v42  ;;  %vm118_vm5 = vmand %vm5294_vm3, %vm5219_vm4 }
 0x281   :  { %v5468_v36 = vmul.f32 %v5286_v18, %v797_v38  ;;  %v5476_v41 = vsel %vm98_vm7, 1.0, %v7761_v1  ;;  %4306 = vmatprep.subr.bf16.mxu1 %v4305_v11  ;;  %v5483_v54 = vmul.f32 %v5309_v22, %v815_v34  ;;  %7971 = vst [vmem:[#allocation38_spill] sm:$0xff] %v5494_v63  ;;  %v5499_v42 = vmul.f32 %v5345_v40, %v813_v39  ;;  %vm7976_vm8 = vmmov %vm7957_vm11 }
 0x282   :  { %7964 = vst [vmem:[#allocation32_spill] sm:$0xff] %v5456_v6  ;;  %7965 = vst [vmem:[#allocation33_spill] sm:$0xff] %v5459_v17  ;;  %v4307_v43 = vpack.c.bf16 %v5442_v51, %v5456_v6  ;;  %v822_v38 = vpop.permute.xlu0 %821  ;;  %v828_v31 = vpop.permute.xlu1 %827  ;;  %v4321_v11 = vpack.c.bf16 %v5445_v7, %v5459_v17  ;;  %v4309_v44 = vpack.c.bf16 %v5424_v28, %v5092_v3  ;;  %v5504_v57 = vsel %vm100_vm0, 1.0, %v7761_v1 }
 0x283   :  { %7967 = vst [vmem:[#allocation34_spill] sm:$0xff] %v5465_v29  ;;  %7968 = vst [vmem:[#allocation35_spill] sm:$0xff] %v5468_v36  ;;  %v4323_v34 = vpack.c.bf16 %v5468_v36, %v5437_v13  ;;  %v4325_v9 = vpack.c.bf16 %v5465_v29, %v5128_v33  ;;  %v5509_v50 = vmul.f32 %v5476_v41, %v831_v45  ;;  %v5519_v39 = vsel %vm5374_vm9, 1.0, %v7761_v1 }
 0x284   :  { %7969 = vst [vmem:[#allocation36_spill] sm:$0xff] %v5476_v41  ;;  %7970 = vst [vmem:[#allocation37_spill] sm:$0xff] %v5483_v54  ;;  %4308 = vmatpush1.bf16.msra.mxu1 %v4307_v43  ;;  %4322 = vmatprep.subr.bf16.mxu0 %v4321_v11  ;;  %v832_v35 = vsel %vm829_vm10, %v822_v38, %v5206_v53  ;;  %v833_v5 = vsel %vm829_vm10, %v828_v31, %v822_v38  ;;  %v4930_v33 = vmov 0  }
 0x285   :  { %7972 = vst [vmem:[#allocation39_spill] sm:$0xff] %v5499_v42  ;;  %7973 = vst [vmem:[#allocation40_spill] sm:$0xff] %v5504_v57  ;;  %4310 = vmatprep.subr.bf16.mxu1 %v4309_v44  ;;  %4324 = vmatpush1.bf16.msra.mxu0 %v4323_v34  ;;  %v4311_v43 = vpack.c.bf16 %v5483_v54, %v5086_v26  ;;  %v830_v45 = vsel %vm829_vm10, %v5216_v60, %v828_v31 }
 0x286   :  { %7974 = vst [vmem:[#allocation41_spill] sm:$0xff] %v5509_v50  ;;  %7975 = vst [vmem:[#allocation42_spill] sm:$0xff] %v5519_v39  ;;  %v839_v11 = vpop.permute.xlu0 %838  ;;  %4326 = vmatprep.subr.bf16.mxu0 %v4325_v9  ;;  %v845_v53 = vpop.permute.xlu1 %844  ;;  %v4327_v38 = vpack.c.bf16 %v5499_v42, %v5106_v30  ;;  %v4313_v31 = vpack.c.bf16 %v5494_v63, %v5509_v50  ;;  %v5543_v44 = vmul.f32 %v5358_v37, %v832_v35 }
 0x287   :  { %v5536_v34 = vsel %vm7976_vm8, %v839_v11, %v5214_v59  ;;  %vm7978_vm7 = vmmov %vm7976_vm8  ;;  %v5546_v62 = vmul.f32 %v5504_v57, %v833_v5  ;;  %v5557_v9 = vmul.f32 %v5286_v18, %v830_v45  ;;  %v5560_v35 = vsel %vm118_vm5, 1.0, %v7761_v1  ;;  %4848 = vset.pattern.permute.xlu1 %v4930_v33  ;;  %4849 = vset.pattern.permute.xlu0 %v4930_v33  ;;  %v5670_v33 = vld [vmem:[%s7752_s1 + $0xc8] sm:$0xff]  }
 0x288   :  { %7977 = vst [vmem:[#allocation43_spill] sm:$0xff] %v5536_v34  ;;  %v850_v60 = vsel %vm7978_vm7, %v845_v53, %v839_v11  ;;  %7979 = vst [vmem:[#allocation44_spill] sm:$0xff] %v5543_v44  ;;  %4312 = vmatpush1.bf16.msra.mxu1 %v4311_v43  ;;  %v4315_v5 = vpack.c.bf16 %v5536_v34, %v5543_v44 }
 0x289   :  { %7980 = vst [vmem:[#allocation45_spill] sm:$0xff] %v5546_v62  ;;  %vm7981_vm3 = vmmov %vm7978_vm7  ;;  %v5554_v59 = vmul.f32 %v5519_v39, %v850_v60  ;;  %4314 = vmatprep.subr.bf16.mxu1 %v4313_v31  ;;  %4328 = vmatpush1.bf16.msra.mxu0 %v4327_v38  ;;  %vm1636_vm7 = vcmask 261120  }
 0x28a   :  { %v5551_v20 = vsel %vm7981_vm3, %v5250_v12, %v845_v53  ;;  %7984 = vst [vmem:[#allocation48_spill] sm:$0xff] %v5557_v9  ;;  %7985 = vst [vmem:[#allocation49_spill] sm:$0xff] %v5560_v35  ;;  %v858_v11 = vpop.permute.xlu0 %857  ;;  %v860_v63 = vpop.permute.xlu1 %859 }
 0x28b   :  { %7982 = vst [vmem:[#allocation46_spill] sm:$0xff] %v5551_v20  ;;  %7983 = vst [vmem:[#allocation47_spill] sm:$0xff] %v5554_v59  ;;  %v4329_v12 = vpack.c.bf16 %v5554_v59, %v5546_v62  ;;  %v4331_v43 = vpack.c.bf16 %v5551_v20, %v5557_v9  ;;  %v865_v45 = vsel %vm863_vm1, %v858_v11, %v860_v63 }
 0x28c   :  { %vm120_vm4 = vmand %vm5374_vm9, %vm5227_vm6  ;;  %4316 = vmatpush1.bf16.msra.mxu1 %v4315_v5  ;;  %v5575_v53 = vmul.f32 %v5560_v35, %v865_v45  ;;  %vm874_vm6 = vcmask 588800   ;;  %vm1336_vm9 = vcmask 130048  }
 0x28d   :  { %4330 = vmatprep.subr.bf16.mxu0 %v4329_v12  ;;  %v5578_v38 = vsel %vm120_vm4, 1.0, %v7761_v1  ;;  %v872_v1 = vld [vmem:[%s7751_s3] sm:$0xff]  ;;  %vm6066_vm3 = vmpackc.low %vm1636_vm7, %vm1636_vm7  ;;  %vm8056_vm4 = vcmp.lt.s32.totalorder %v4969_v2, 16 }
 0x28e   :  { %7986 = vst [vmem:[#allocation50_spill] sm:$0xff] %v5575_v53  ;;  %4332 = vmatpush1.bf16.msra.mxu0 %v4331_v43  ;;  %7987 = vst [vmem:[#allocation51_spill] sm:$0xff] %v5578_v38  ;;  %v856_v60 = vpop.permute.xlu0 %855  ;;  %897 = vmatprep.subr.mxu1 %v5575_v53  ;;  %v862_v0 = vpop.permute.xlu1 %861 }
 0x28f   :  { %v866_v61 = vsel %vm863_vm1, %v856_v60, %v858_v11  ;;  %v864_v31 = vsel %vm863_vm1, %v860_v63, %v862_v0  ;;  %v867_v5 = vsel %vm863_vm1, %v862_v0, %v856_v60  ;;  %v7991_v63 = vmov 0.0   ;;  %v873_v11 = vld [vmem:[%s7751_s3 + $0x18] sm:$0xff] }
 0x290   :  { %v5588_v12 = vmul.f32 %v5309_v22, %v866_v61  ;;  %v5591_v43 = vmul.f32 %v5345_v40, %v864_v31  ;;  %v5594_v45 = vmul.f32 %v5578_v38, %v867_v5 }
 0x292   :  { %7988 = vst [vmem:[#allocation52_spill] sm:$0xff] %v5588_v12  ;;  %7989 = vst [vmem:[#allocation53_spill] sm:$0xff] %v5591_v43  ;;  %898 = vmatpush1.msra.mxu1 %v5588_v12  ;;  %974 = vmatprep.subr.mxu0 %v5594_v45 }
 0x293   :  { %7990 = vst [vmem:[#allocation54_spill] sm:$0xff] %v5594_v45  ;;  %3742 = vmatmul.mubr.msk.f32.vlgmr.msra.gmra.mrb[4].mxu1 %vm874_vm6, %v872_v1  ;;  %975 = vmatpush1.msra.mxu0 %v5591_v43 }
 0x294   :  { %3744 = vmatmul.mubr.msk.f32.vlgmr.msra.gmra.mrb[2].mxu0 %vm874_vm6, %v872_v1  ;;  %951 = vmatprep.mubr.f32.mxu1 %v7991_v63 }
 0x295   :  { %1028 = vmatprep.mubr.f32.mxu0 %v7991_v63 }
 0x297   :  { %3743 = vmatmul.mubr.msk.f32.gmra.mrb[6].mxu1 %vm874_vm6, %v873_v11 }
 0x298   :  { %3745 = vmatmul.mubr.msk.f32.gmra.mrb[4].mxu0 %vm874_vm6, %v873_v11  ;;  %vm8058_vm6 = vmmov %vm8056_vm4 }
 0x366   :  { %v5607_v60 = vpop.f32.mrb[4].mxu1 }
 0x367   :  { %v1052_v0 = vmul.f32 %v5607_v60, %v5607_v60  ;;  %v5611_v61 = vpop.f32.mrb[5].mxu1  ;;  %v5613_v31 = vpop.f32.mrb[2].mxu0 }
 0x368   :  { %v1039_v1 = vadd.f32 %v5611_v61, %v5607_v60  ;;  %v1053_v5 = vmul.f32 %v5611_v61, %v5611_v61  ;;  %v5619_v12 = vpop.f32.mrb[3].mxu0  ;;  %v1054_v11 = vmul.f32 %v5613_v31, %v5613_v31 }
 0x36a   :  { %v5623_v45 = vpop.f32.mrb[6].mxu1  ;;  %v1040_v53 = vadd.f32 %v1039_v1, %v5613_v31  ;;  %v1060_v43 = vadd.f32 %v1053_v5, %v1052_v0  ;;  %v1055_v0 = vmul.f32 %v5619_v12, %v5619_v12 }
 0x36b   :  { %v1056_v20 = vmul.f32 %v5623_v45, %v5623_v45  ;;  %v5628_v34 = vpop.f32.mrb[7].mxu1  ;;  %v5630_v59 = vpop.f32.mrb[4].mxu0 }
 0x36c   :  { %v1044_v44 = vadd.f32 %v5628_v34, %v5623_v45  ;;  %v1057_v62 = vmul.f32 %v5628_v34, %v5628_v34  ;;  %v1058_v50 = vmul.f32 %v5630_v59, %v5630_v59  ;;  %v1041_v9 = vadd.f32 %v1040_v53, %v5619_v12  ;;  %v5639_v1 = vpop.f32.mrb[5].mxu0 }
 0x36d   :  { %v1061_v5 = vadd.f32 %v1060_v43, %v1054_v11  ;;  %v1059_v29 = vmul.f32 %v5639_v1, %v5639_v1  ;;  %v3946_v43 = vld [vmem:[%s7752_s1 + $0x58] sm:$0xff]  }
 0x36e   :  { %1042 = vadd.xlane.f32.xlu0 %v1041_v9  ;;  %v1045_v54 = vadd.f32 %v1044_v44, %v5630_v59  ;;  %v1065_v28 = vadd.f32 %v1057_v62, %v1056_v20  ;;  %v3943_v9 = vld [vmem:[%s7752_s1 + $0x40] sm:$0xff]   ;;  %v3937_v62 = vld [vmem:[%s7752_s1 + $0x10] sm:$0xff]   ;;  %v5706_v11 = vld [vmem:[%s7752_s1 + $0xd8] sm:$0xff]  }
 0x36f   :  { %v1062_v42 = vadd.f32 %v1061_v5, %v1055_v0  ;;  %v5653_v44 = vld [vmem:[%s7752_s1 + $0xc0] sm:$0xff]   ;;  %4334 = vmatprep.subr.bf16.mxu1 %v3943_v9  ;;  %v5698_v20 = vld [vmem:[%s7752_s1 + $0x90] sm:$0xff]   ;;  %v3938_v0 = vld [vmem:[%s7752_s1 + $0x18] sm:$0xff]  }
 0x370   :  { %v1046_v30 = vadd.f32 %v1045_v54, %v5639_v1  ;;  %v1066_v26 = vadd.f32 %v1065_v28, %v1058_v50  ;;  %v3777_v28 = vld [vmem:[%s7752_s1] sm:$0xff]   ;;  %4366 = vmatprep.subr.bf16.mxu0 %v5653_v44  ;;  %v5680_v54 = vld [vmem:[%s7752_s1 + $0x88] sm:$0xff]   ;;  %v5688_v50 = vld [vmem:[%s7752_s1 + $0xd0] sm:$0xff]  }
 0x371   :  { %1063 = vadd.xlane.f32.xlu1 %v1062_v42  ;;  %4336 = vmatpush3.bf16.msra.mxu1 %v3777_v28  ;;  %v3945_v42 = vld [vmem:[%s7752_s1 + $0x50] sm:$0xff]   ;;  %v5716_v5 = vld [vmem:[%s7752_s1 + $0x98] sm:$0xff]   ;;  %v5724_v9 = vld [vmem:[%s7752_s1 + $0xe0] sm:$0xff]  }
 0x372   :  { %1047 = vadd.xlane.f32.xlu0 %v1046_v30  ;;  %v1067_v53 = vadd.f32 %v1066_v26, %v1059_v29  ;;  %v5662_v26 = vld [vmem:[%s7752_s1 + $0x80] sm:$0xff]   ;;  %v3944_v30 = vld [vmem:[%s7752_s1 + $0x48] sm:$0xff]  }
 0x373   :  { %4368 = vmatpush3.bf16.msra.mxu0 %v5662_v26  ;;  %4338 = vmatprep.subr.bf16.mxu1 %v3944_v30  ;;  %v3936_v29 = vld [vmem:[%s7752_s1 + $0x8] sm:$0xff]   ;;  %v3939_v28 = vld [vmem:[%s7752_s1 + $0x20] sm:$0xff]  }
 0x374   :  { %4370 = vmatprep.subr.bf16.mxu0 %v5670_v33  ;;  %v5734_v30 = vld [vmem:[%s7752_s1 + $0xa0] sm:$0xff]  }
 0x375   :  { %4340 = vmatpush3.bf16.msra.mxu1 %v3936_v29  ;;  %v3948_v29 = vld [vmem:[%s7752_s1 + $0x68] sm:$0xff]  }
 0x376   :  { %1068 = vadd.xlane.f32.xlu0 %v1067_v53  ;;  %4342 = vmatprep.subr.bf16.mxu1 %v3945_v42  ;;  %v3947_v53 = vld [vmem:[%s7752_s1 + $0x60] sm:$0xff]   ;;  %v5742_v42 = vld [vmem:[%s7752_s1 + $0xe8] sm:$0xff]  }
 0x377   :  { %4372 = vmatpush3.bf16.msra.mxu0 %v5680_v54 }
 0x378   :  { %4374 = vmatprep.subr.bf16.mxu0 %v5688_v50 }
 0x379   :  { %4344 = vmatpush3.bf16.msra.mxu1 %v3937_v62  ;;  %v3940_v62 = vld [vmem:[%s7752_s1 + $0x28] sm:$0xff]  }
 0x37a   :  { %4346 = vmatprep.subr.bf16.mxu1 %v3946_v43  ;;  %v5752_v43 = vld [vmem:[%s7752_s1 + $0xa8] sm:$0xff]  }
 0x37b   :  { %4376 = vmatpush3.bf16.msra.mxu0 %v5698_v20 }
 0x37c   :  { %4378 = vmatprep.subr.bf16.mxu0 %v5706_v11 }
 0x37d   :  { %4348 = vmatpush3.bf16.msra.mxu1 %v3938_v0 }
 0x37e   :  { %4350 = vmatprep.subr.bf16.mxu1 %v3947_v53 }
 0x37f   :  { %4380 = vmatpush3.bf16.msra.mxu0 %v5716_v5 }
 0x380   :  { %4382 = vmatprep.subr.bf16.mxu0 %v5724_v9 }
 0x381   :  { %4352 = vmatpush3.bf16.msra.mxu1 %v3939_v28 }
 0x382   :  { %4354 = vmatprep.subr.bf16.mxu1 %v3948_v29 }
 0x383   :  { %4384 = vmatpush3.bf16.msra.mxu0 %v5734_v30 }
 0x384   :  { %4386 = vmatprep.subr.bf16.mxu0 %v5742_v42 }
 0x385   :  { %4356 = vmatpush3.bf16.msra.mxu1 %v3940_v62  ;;  %v1035_v62 = vld [vmem:[%s7753_s4] sm:$0xff] }
 0x387   :  { %4388 = vmatpush3.bf16.msra.mxu0 %v5752_v43 }
 0x3fb   :  { %v1043_v0 = vpop.xlane.xlu0 %1042 }
 0x3fc   :  { %v1050_v53 = vmul.f32 0.001953125, %v1043_v0 }
 0x3fe   :  { %v1072_v28 = vmul.f32 %v1050_v53, %v1050_v53  ;;  %v1064_v3 = vpop.xlane.xlu1 %1063 }
 0x3ff   :  { %v1070_v7 = vmul.f32 0.001953125, %v1064_v3  ;;  %v1048_v29 = vpop.xlane.xlu0 %1047  ;;  %v1037_v3 = vld [vmem:[%s7753_s4 + $0x4f] sm:$0xff] }
 0x400   :  { %v1051_v36 = vmul.f32 0.001953125, %v1048_v29  ;;  %v5791_v29 = vld [vmem:[%s7752_s1 + $0xf8] sm:$0xff]  }
 0x401   :  { %v1074_v51 = vsub.f32 %v1070_v7, %v1072_v28  ;;  %v3950_v28 = vld [vmem:[%s7752_s1 + $0x78] sm:$0xff]  }
 0x402   :  { %v1073_v25 = vmul.f32 %v1051_v36, %v1051_v36 }
 0x403   :  { %v1076_v17 = vadd.f32 1e-05, %v1074_v51  ;;  %v1069_v13 = vpop.xlane.xlu0 %1068  ;;  %v1036_v51 = vld [vmem:[%s7753_s4 + $0x8] sm:$0xff] }
 0x404   :  { %v1071_v6 = vmul.f32 0.001953125, %v1069_v13 }
 0x405   :  { %4866 = vrsqrt.f32 %v1076_v17 }
 0x406   :  { %v1075_v47 = vsub.f32 %v1071_v6, %v1073_v25  ;;  %v3949_v25 = vld [vmem:[%s7752_s1 + $0x70] sm:$0xff]  }
 0x407   :  { %4358 = vmatprep.subr.bf16.mxu1 %v3949_v25 }
 0x408   :  { %v1077_v4 = vadd.f32 1e-05, %v1075_v47  ;;  %v5770_v47 = vld [vmem:[%s7752_s1 + $0xf0] sm:$0xff]  }
 0x409   :  { %4390 = vmatprep.subr.bf16.mxu0 %v5770_v47 }
 0x40a   :  { %4868 = vrsqrt.f32 %v1077_v4  ;;  %v3941_v4 = vld [vmem:[%s7752_s1 + $0x30] sm:$0xff]  }
 0x40b   :  { %4360 = vmatpush3.bf16.msra.mxu1 %v3941_v4 }
 0x40c   :  { %4362 = vmatprep.subr.bf16.mxu1 %v3950_v28 }
 0x40f   :  { %v4867_v24 = vpop.eup %4866 }
 0x410   :  { %v1080_v0 = vmul.f32 %v4867_v24, %v1035_v62  ;;  %v5779_v24 = vld [vmem:[%s7752_s1 + $0xb0] sm:$0xff]  }
 0x411   :  { %4392 = vmatpush3.bf16.msra.mxu0 %v5779_v24 }
 0x412   :  { %1084 = vperm.xlu1 %4848, %v1080_v0   ;;  %v1100_v13 = vmul.f32 %v1080_v0, %v1050_v53  ;;  %v1038_v53 = vld [vmem:[%s7753_s4 + $0x57] sm:$0xff]  ;;  %4394 = vmatprep.subr.bf16.mxu0 %v5791_v29 }
 0x413   :  { %v3942_v0 = vld [vmem:[%s7752_s1 + $0x38] sm:$0xff]  }
 0x414   :  { %v4869_v7 = vpop.eup %4868  ;;  %v1102_v6 = vsub.f32 %v1037_v3, %v1100_v13  ;;  %v5799_v3 = vld [vmem:[%s7752_s1 + $0xb8] sm:$0xff]   ;;  %4364 = vmatpush3.bf16.msra.mxu1 %v3942_v0 }
 0x415   :  { %v1081_v17 = vmul.f32 %v4869_v7, %v1036_v51  ;;  %4396 = vmatpush3.bf16.msra.mxu0 %v5799_v3 }
 0x416   :  { %1106 = vperm.xlu0 %4849, %v1102_v6  }
 0x417   :  { %1089 = vperm.xlu1 %4848, %v1081_v17   ;;  %v1101_v62 = vmul.f32 %v1081_v17, %v1051_v36 }
 0x419   :  { %v1103_v51 = vsub.f32 %v1038_v53, %v1101_v62 }
 0x41b   :  { %1111 = vperm.xlu1 %4848, %v1103_v51  }
 0x491   :  { %v1085_v13 = vpop.permute.xlu1 %1084 }
 0x492   :  { %v1092_v36 = vmul.f32 %v1085_v13, %v5607_v60  ;;  %v1094_v25 = vmul.f32 %v1085_v13, %v5613_v31  ;;  %v1093_v4 = vmul.f32 %v1085_v13, %v5611_v61  ;;  %v1095_v7 = vmul.f32 %v1085_v13, %v5619_v12 }
 0x495   :  { %v1107_v6 = vpop.permute.xlu0 %1106 }
 0x496   :  { %v1114_v17 = vadd.f32 %v1107_v6, %v1092_v36  ;;  %v1116_v28 = vadd.f32 %v1107_v6, %v1094_v25  ;;  %v1090_v14 = vpop.permute.xlu1 %1089  ;;  %v1115_v49 = vadd.f32 %v1107_v6, %v1093_v4  ;;  %v1117_v8 = vadd.f32 %v1107_v6, %v1095_v7 }
 0x497   :  { %v1097_v51 = vmul.f32 %v1090_v14, %v5628_v34  ;;  %v1099_v60 = vmul.f32 %v1090_v14, %v5639_v1  ;;  %v1096_v31 = vmul.f32 %v1090_v14, %v5623_v45  ;;  %v1098_v12 = vmul.f32 %v1090_v14, %v5630_v59 }
 0x498   :  { %v1122_v0 = vmax.f32 %v1114_v17, 0.0  ;;  %v1124_v53 = vmax.f32 %v1116_v28, 0.0  ;;  %v1123_v62 = vmax.f32 %v1115_v49, 0.0  ;;  %v1125_v56 = vmax.f32 %v1117_v8, 0.0 }
 0x49a   :  { %1194 = vmatprep.mubr.f32.mxu1 %v1123_v62  ;;  %1269 = vmatprep.mubr.f32.mxu0 %v1125_v56  ;;  %v1112_v61 = vpop.permute.xlu1 %1111 }
 0x49b   :  { %1195 = vmatmul.mubr.f32.vlgmr.msra.gmra.mrb[8].mxu1 %v1122_v0  ;;  %1270 = vmatmul.mubr.f32.vlgmr.msra.gmra.mrb[6].mxu0 %v1124_v53  ;;  %v1119_v13 = vadd.f32 %v1112_v61, %v1097_v51  ;;  %v1121_v36 = vadd.f32 %v1112_v61, %v1099_v60  ;;  %v1118_v25 = vadd.f32 %v1112_v61, %v1096_v31  ;;  %v4932_v31 = vmov 0.0|0.0  }
 0x49c   :  { %v1120_v4 = vadd.f32 %v1112_v61, %v1098_v12  ;;  %4397 = vmatprep.subr.bf16.mxu1 %v4932_v31  ;;  %v1329_v12 = vld [vmem:[%s7751_s3 + $0x38] sm:$0xff] }
 0x49d   :  { %v1127_v7 = vmax.f32 %v1119_v13, 0.0  ;;  %v1129_v49 = vmax.f32 %v1121_v36, 0.0  ;;  %v1126_v8 = vmax.f32 %v1118_v25, 0.0  ;;  %v130_v13 = vand.u32 7, %v4969_v2 }
 0x49e   :  { %v1128_v6 = vmax.f32 %v1120_v4, 0.0  ;;  %v129_v36 = vand.u32 63, %v4969_v2 }
 0x49f   :  { %1199 = vmatprep.mubr.f32.mxu1 %v1127_v7  ;;  %1274 = vmatprep.mubr.f32.mxu0 %v1129_v49  ;;  %vm5854_vm11 = vcmp.ge.s32.totalorder %v130_v13, 1  ;;  %vm5871_vm14 = vcmp.le.s32.totalorder %v130_v13, 6 }
 0x4a0   :  { %1200 = vmatmul.mubr.f32.gmra.mrb[10].mxu1 %v1126_v8  ;;  %1275 = vmatmul.mubr.f32.gmra.mrb[8].mxu0 %v1128_v6  ;;  %vm5858_vm12 = vcmp.ge.s32.totalorder %v129_v36, 8  ;;  %v5895_v7 = vsel %vm5854_vm11, 1.0, %v7991_v63  ;;  %vm5901_vm0 = vcmp.lt.s32.totalorder %v129_v36, 56 }
 0x4a1   :  { %3746 = vmatprep.mubr.msk.f32.mxu1 %vm1336_vm9, %v1329_v12  ;;  %vm135_vm13 = vmand %vm5858_vm12, %vm5854_vm11 }
 0x4a2   :  { %v5867_v6 = vsel %vm135_vm13, 1.0, %v7991_v63  ;;  %vm140_vm15 = vmand %vm5858_vm12, %vm5871_vm14 }
 0x4a3   :  { %vm147_vm5 = vmand %vm5901_vm0, %vm5854_vm11 }
 0x4a4   :  { %vm152_vm8 = vmand %vm5901_vm0, %vm5871_vm14 }
 0x4a5   :  { %vm8059_vm11 = vmmov %vm8056_vm4 }
 0x4a6   :  { %vm8061_vm13 = vmmov %vm8056_vm4 }
 0x56e   :  { %v4006_v34 = vpop.f32.mrb[8].mxu1  ;;  %v4044_v45 = vpop.f32.mrb[6].mxu0 }
 0x56f   :  { %v4007_v56 = vpop.f32.mrb[9].mxu1  ;;  %v4045_v1 = vpop.f32.mrb[7].mxu0 }
 0x570   :  { %v4008_v17 = vadd.f32 %v4007_v56, %v4006_v34  ;;  %v4046_v14 = vadd.f32 %v4045_v1, %v4044_v45 }
 0x572   :  { %v5811_v59 = vadd.f32 %v4046_v14, %v4008_v17  ;;  %v5878_v17 = vsel %vm5858_vm12, 1.0, %v7991_v63  ;;  %vm8060_vm12 = vmmov %vm8056_vm4 }
 0x573   :  { %v4009_v28 = vpop.f32.mrb[10].mxu1  ;;  %v4047_v0 = vpop.f32.mrb[8].mxu0 }
 0x574   :  { %1298 = vrot.lane.b32.xlu0 %v5811_v59, %s4925_s20  ;;  %1280 = vrot.lane.b32.xlu1 %v5811_v59, %s4931_s8  ;;  %v4010_v53 = vpop.f32.mrb[11].mxu1  ;;  %v4048_v62 = vpop.f32.mrb[9].mxu0 }
 0x575   :  { %v4011_v51 = vadd.f32 %v4010_v53, %v4009_v28  ;;  %v4049_v60 = vadd.f32 %v4048_v62, %v4047_v0 }
 0x577   :  { %v5818_v61 = vadd.f32 %v4049_v60, %v4011_v51  ;;  %v5887_v51 = vsel %vm140_vm15, 1.0, %v7991_v63  ;;  %vm8063_vm15 = vcmp.lt.s32.totalorder %v4969_v2, 15 }
 0x578   :  { %1304 = vrot.lane.b32.xlu0 %v5811_v59, %s4926_s21  ;;  %1286 = vrot.lane.b32.xlu1 %v5811_v59, %s4933_s9 }
 0x57c   :  { %1310 = vrot.lane.b32.xlu0 %v5811_v59, %s4934_s10  ;;  %1292 = vrot.lane.b32.xlu1 %v5811_v59, %s4935_s11 }
 0x580   :  { %1316 = vrot.lane.b32.xlu0 %v5811_v59, %s4936_s12  ;;  %1282 = vrot.lane.b32.xlu1 %v5818_v61, %s4931_s8 }
 0x584   :  { %1322 = vrot.lane.b32.xlu0 %v5811_v59, %s4937_s13  ;;  %1288 = vrot.lane.b32.xlu1 %v5818_v61, %s4933_s9 }
 0x588   :  { %1294 = vrot.lane.b32.xlu1 %v5818_v61, %s4935_s11 }
 0x58c   :  { %1300 = vrot.lane.b32.xlu1 %v5818_v61, %s4925_s20 }
 0x590   :  { %1306 = vrot.lane.b32.xlu1 %v5818_v61, %s4926_s21 }
 0x594   :  { %1312 = vrot.lane.b32.xlu1 %v5818_v61, %s4934_s10 }
 0x598   :  { %1318 = vrot.lane.b32.xlu1 %v5818_v61, %s4936_s12 }
 0x59c   :  { %1324 = vrot.lane.b32.xlu1 %v5818_v61, %s4937_s13 }
 0x5e6   :  { %v1281_v25 = vpop.permute.xlu1 %1280  ;;  %v1299_v62 = vpop.permute.xlu0 %1298 }
 0x5e7   :  { %v1284_v45 = vmul.f32 %v5867_v6, %v1281_v25 }
 0x5ea   :  { %v1287_v49 = vpop.permute.xlu1 %1286 }
 0x5eb   :  { %v1290_v0 = vmul.f32 %v5878_v17, %v1287_v49 }
 0x5ee   :  { %v1293_v8 = vpop.permute.xlu1 %1292 }
 0x5ef   :  { %v1296_v13 = vmul.f32 %v5887_v51, %v1293_v8 }
 0x5f2   :  { %v1283_v34 = vpop.permute.xlu1 %1282 }
 0x5f3   :  { %v1285_v56 = vmul.f32 %v5867_v6, %v1283_v34  ;;  %v1305_v34 = vpop.permute.xlu0 %1304 }
 0x5f5   :  { %v4398_v14 = vpack.c.bf16 %v1285_v56, %v1284_v45  ;;  %v1302_v56 = vmul.f32 %v5895_v7, %v1299_v62  ;;  %v4410_v62 = vpack.c.bf16 %v5818_v61, %v5811_v59 }
 0x5f6   :  { %v1289_v28 = vpop.permute.xlu1 %1288 }
 0x5f7   :  { %v1291_v53 = vmul.f32 %v5878_v17, %v1289_v28  ;;  %4399 = vmatpush1.bf16.msra.mxu1 %v4398_v14 }
 0x5f8   :  { %4400 = vmatprep.subr.bf16.mxu1 %v4932_v31 }
 0x5f9   :  { %v4401_v60 = vpack.c.bf16 %v1291_v53, %v1290_v0  ;;  %v5908_v53 = vsel %vm5871_vm14, 1.0, %v7991_v63  ;;  %vm8062_vm14 = vmmov %vm8056_vm4 }
 0x5fa   :  { %v1295_v12 = vpop.permute.xlu1 %1294 }
 0x5fb   :  { %v1297_v25 = vmul.f32 %v5887_v51, %v1295_v12  ;;  %4402 = vmatpush1.bf16.msra.mxu1 %v4401_v60  ;;  %v1311_v60 = vpop.permute.xlu0 %1310 }
 0x5fc   :  { %4403 = vmatprep.subr.bf16.mxu1 %v4932_v31 }
 0x5fd   :  { %v4404_v49 = vpack.c.bf16 %v1297_v25, %v1296_v13  ;;  %v1308_v13 = vmul.f32 %v5908_v53, %v1305_v34  ;;  %v5920_v25 = vsel %vm147_vm5, 1.0, %v7991_v63  ;;  %vm8065_vm5 = vmmov %vm8063_vm15 }
 0x5fe   :  { %v1301_v45 = vpop.permute.xlu1 %1300 }
 0x5ff   :  { %v1303_v14 = vmul.f32 %v5895_v7, %v1301_v45  ;;  %4405 = vmatpush1.bf16.msra.mxu1 %v4404_v49  ;;  %v1317_v45 = vpop.permute.xlu0 %1316 }
 0x600   :  { %4406 = vmatprep.subr.bf16.mxu1 %v4932_v31 }
 0x601   :  { %v4407_v8 = vpack.c.bf16 %v1303_v14, %v1302_v56  ;;  %v1314_v14 = vmul.f32 %v5920_v25, %v1311_v60  ;;  %v5938_v60 = vsel %vm152_vm8, 1.0, %v7991_v63 }
 0x602   :  { %v1307_v0 = vpop.permute.xlu1 %1306 }
 0x603   :  { %4408 = vmatpush1.bf16.msra.mxu1 %v4407_v8  ;;  %v1309_v36 = vmul.f32 %v5908_v53, %v1307_v0  ;;  %v5928_v8 = vsel %vm5901_vm0, 1.0, %v7991_v63  ;;  %vm8064_vm0 = vmmov %vm8056_vm4 }
 0x604   :  { %4409 = vmatprep.subr.bf16.mxu1 %v4932_v31  ;;  %vm8067_vm8 = vmmov %vm8064_vm0 }
 0x605   :  { %v4413_v49 = vpack.c.bf16 %v1309_v36, %v1308_v13 }
 0x606   :  { %v1313_v12 = vpop.permute.xlu1 %1312 }
 0x607   :  { %4411 = vmatpush1.bf16.msra.mxu1 %v4410_v62  ;;  %v1315_v4 = vmul.f32 %v5920_v25, %v1313_v12  ;;  %v1320_v62 = vmul.f32 %v5928_v8, %v1317_v45  ;;  %v1323_v12 = vpop.permute.xlu0 %1322  ;;  %v1331_v45 = vld [vmem:[%s7751_s3 + $0x50] sm:$0xff] }
 0x608   :  { %4412 = vmatprep.subr.bf16.mxu1 %v4932_v31  ;;  %v1326_v1 = vmul.f32 %v5938_v60, %v1323_v12 }
 0x609   :  { %v4416_v34 = vpack.c.bf16 %v1315_v4, %v1314_v14  ;;  %v1328_v4 = vld [vmem:[%s7751_s3 + $0x30] sm:$0xff]  ;;  %v1332_v14 = vld [vmem:[%s7751_s3 + $0x60] sm:$0xff] }
 0x60a   :  { %v1319_v56 = vpop.permute.xlu1 %1318 }
 0x60b   :  { %4414 = vmatpush1.bf16.msra.mxu1 %v4413_v49  ;;  %v1321_v0 = vmul.f32 %v5928_v8, %v1319_v56  ;;  %v1330_v56 = vld [vmem:[%s7751_s3 + $0x48] sm:$0xff] }
 0x60c   :  { %4415 = vmatprep.subr.bf16.mxu1 %v4932_v31 }
 0x60d   :  { %v4419_v13 = vpack.c.bf16 %v1321_v0, %v1320_v62  ;;  %v1334_v0 = vld [vmem:[%s7751_s3 + $0x78] sm:$0xff] }
 0x60e   :  { %v1325_v36 = vpop.permute.xlu1 %1324 }
 0x60f   :  { %4417 = vmatpush1.bf16.msra.mxu1 %v4416_v34  ;;  %v1327_v49 = vmul.f32 %v5938_v60, %v1325_v36  ;;  %v1335_v34 = vld [vmem:[%s7751_s3 + $0x80] sm:$0xff] }
 0x610   :  { %4418 = vmatprep.subr.bf16.mxu1 %v4932_v31 }
 0x611   :  { %v4422_v28 = vpack.c.bf16 %v1327_v49, %v1326_v1 }
 0x613   :  { %4420 = vmatpush1.bf16.msra.mxu1 %v4419_v13 }
 0x614   :  { %4421 = vmatprep.subr.bf16.mxu1 %v4932_v31  ;;  %v1333_v31 = vld [vmem:[%s7751_s3 + $0x68] sm:$0xff] }
 0x617   :  { %4423 = vmatpush1.bf16.msra.mxu1 %v4422_v28 }
 0x61a   :  { %1414 = vmatmul.mubr.f32.vlgmr.msra.gmra.mrb[12].mxu1 %v1328_v4 }
 0x61b   :  { %3747 = vmatprep.mubr.msk.f32.mxu1 %vm1336_vm9, %v1331_v45 }
 0x61e   :  { %1419 = vmatmul.mubr.f32.gmra.mrb[14].mxu1 %v1330_v56 }
 0x61f   :  { %3748 = vmatprep.mubr.msk.f32.mxu1 %vm1336_vm9, %v1333_v31 }
 0x622   :  { %1424 = vmatmul.mubr.f32.gmra.mrb[16].mxu1 %v1332_v14 }
 0x623   :  { %3749 = vmatprep.mubr.msk.f32.mxu1 %vm1336_vm9, %v1335_v34  ;;  %v5991_v34 = vld [vmem:[%s7754_s2] sm:$0xff]  }
 0x624   :  { %4425 = vmatprep.subr.bf16.mxu0 %v5991_v34 }
 0x625   :  { %4427 = vmatpush3.bf16.msra.mxu0 %v5991_v34 }
 0x626   :  { %1429 = vmatmul.mubr.f32.gmra.mrb[18].mxu1 %v1334_v0  ;;  %v5996_v0 = vld [vmem:[%s7754_s2 + $0x8] sm:$0xff]  }
 0x627   :  { %4429 = vmatprep.subr.bf16.mxu0 %v5996_v0 }
 0x629   :  { %4431 = vmatpush3.bf16.msra.mxu0 %v5996_v0 }
 0x6ed   :  { %v5968_v36 = vpop.f32.mrb[12].mxu1 }
 0x6ee   :  { %1442 = vadd.xlane.f32.xlu0 %v5968_v36  ;;  %v1417_v62 = vpop.f32.mrb[13].mxu1  ;;  %v1455_v12 = vmul.f32 %v5968_v36, %v5968_v36 }
 0x6ef   :  { %v6004_v62 = vld [vmem:[%s7754_s2 + $0x10] sm:$0xff]  }
 0x6f0   :  { %4433 = vmatprep.subr.bf16.mxu0 %v6004_v62 }
 0x6f1   :  { %v5973_v13 = vpop.f32.mrb[14].mxu1  ;;  %4435 = vmatpush3.bf16.msra.mxu0 %v6004_v62 }
 0x6f2   :  { %1459 = vadd.xlane.f32.xlu0 %v1455_v12  ;;  %1444 = vadd.xlane.f32.xlu1 %v5973_v13  ;;  %v1422_v49 = vpop.f32.mrb[15].mxu1  ;;  %v1456_v1 = vmul.f32 %v5973_v13, %v5973_v13  ;;  %v6011_v12 = vld [vmem:[%s7754_s2 + $0x18] sm:$0xff]  }
 0x6f3   :  { %4437 = vmatprep.subr.bf16.mxu0 %v6011_v12  ;;  %v6018_v49 = vld [vmem:[%s7754_s2 + $0x20] sm:$0xff]  }
 0x6f5   :  { %v5978_v28 = vpop.f32.mrb[16].mxu1  ;;  %4439 = vmatpush3.bf16.msra.mxu0 %v6011_v12 }
 0x6f6   :  { %1461 = vadd.xlane.f32.xlu0 %v1456_v1  ;;  %1446 = vadd.xlane.f32.xlu1 %v5978_v28  ;;  %v1427_v4 = vpop.f32.mrb[17].mxu1  ;;  %v1457_v45 = vmul.f32 %v5978_v28, %v5978_v28 }
 0x6f7   :  { %4441 = vmatprep.subr.bf16.mxu0 %v6018_v49 }
 0x6f9   :  { %v5983_v56 = vpop.f32.mrb[18].mxu1  ;;  %4443 = vmatpush3.bf16.msra.mxu0 %v6018_v49 }
 0x6fa   :  { %1463 = vadd.xlane.f32.xlu1 %v1457_v45  ;;  %1448 = vadd.xlane.f32.xlu0 %v5983_v56  ;;  %v1458_v31 = vmul.f32 %v5983_v56, %v5983_v56  ;;  %v1432_v14 = vpop.f32.mrb[19].mxu1 }
 0x6fe   :  { %1465 = vadd.xlane.f32.xlu0 %v1458_v31 }
 0x77b   :  { %v1443_v1 = vpop.xlane.xlu0 %1442 }
 0x77c   :  { %v1451_v4 = vmul.f32 0.0078125, %v1443_v1 }
 0x77e   :  { %v1471_v14 = vmul.f32 %v1451_v4, %v1451_v4 }
 0x77f   :  { %v1460_v45 = vpop.xlane.xlu0 %1459  ;;  %v1445_v31 = vpop.xlane.xlu1 %1444 }
 0x780   :  { %v1467_v21 = vmul.f32 0.0078125, %v1460_v45  ;;  %v1452_v48 = vmul.f32 0.0078125, %v1445_v31 }
 0x782   :  { %v1475_v63 = vsub.f32 %v1467_v21, %v1471_v14  ;;  %v1472_v38 = vmul.f32 %v1452_v48, %v1452_v48 }
 0x783   :  { %v1462_v39 = vpop.xlane.xlu0 %1461  ;;  %v1447_v35 = vpop.xlane.xlu1 %1446 }
 0x784   :  { %v1479_v57 = vadd.f32 1e-05, %v1475_v63  ;;  %v1468_v23 = vmul.f32 0.0078125, %v1462_v39  ;;  %v1453_v41 = vmul.f32 0.0078125, %v1447_v35  ;;  %v1434_v39 = vld [vmem:[%s7753_s4 + $0x10] sm:$0xff] }
 0x785   :  { %v6048_v63 = vld [vmem:[%s7754_s2 + $0x30] sm:$0xff]  }
 0x786   :  { %4870 = vrsqrt.f32 %v1479_v57  ;;  %v1476_v40 = vsub.f32 %v1468_v23, %v1472_v38  ;;  %v1473_v22 = vmul.f32 %v1453_v41, %v1453_v41  ;;  %v1436_v38 = vld [vmem:[%s7753_s4 + $0x20] sm:$0xff] }
 0x787   :  { %v1464_v18 = vpop.xlane.xlu1 %1463  ;;  %v1449_v37 = vpop.xlane.xlu0 %1448 }
 0x788   :  { %v1480_v16 = vadd.f32 1e-05, %v1476_v40  ;;  %v1469_v58 = vmul.f32 0.0078125, %v1464_v18  ;;  %v1454_v1 = vmul.f32 0.0078125, %v1449_v37  ;;  %v1438_v18 = vld [vmem:[%s7753_s4 + $0x5f] sm:$0xff] }
 0x78a   :  { %4872 = vrsqrt.f32 %v1480_v16  ;;  %v1477_v32 = vsub.f32 %v1469_v58, %v1473_v22  ;;  %v1474_v10 = vmul.f32 %v1454_v1, %v1454_v1  ;;  %v1435_v16 = vld [vmem:[%s7753_s4 + $0x18] sm:$0xff]  ;;  %v1439_v58 = vld [vmem:[%s7753_s4 + $0x67] sm:$0xff] }
 0x78b   :  { %v1466_v45 = vpop.xlane.xlu0 %1465 }
 0x78c   :  { %v1481_v31 = vadd.f32 1e-05, %v1477_v32  ;;  %v1470_v21 = vmul.f32 0.0078125, %v1466_v45 }
 0x78e   :  { %4874 = vrsqrt.f32 %v1481_v31  ;;  %v1478_v14 = vsub.f32 %v1470_v21, %v1474_v10  ;;  %v6035_v10 = vld [vmem:[%s7754_s2 + $0x28] sm:$0xff]  }
 0x78f   :  { %4445 = vmatprep.subr.bf16.mxu0 %v6035_v10 }
 0x790   :  { %v4871_v57 = vpop.eup %4870  ;;  %v1482_v23 = vadd.f32 1e-05, %v1478_v14  ;;  %4447 = vmatpush3.bf16.msra.mxu0 %v6035_v10  ;;  %v1440_v14 = vld [vmem:[%s7753_s4 + $0x6f] sm:$0xff] }
 0x791   :  { %v1487_v35 = vmul.f32 %v4871_v57, %v1434_v39  ;;  %4449 = vmatprep.subr.bf16.mxu0 %v6048_v63  ;;  %v1437_v39 = vld [vmem:[%s7753_s4 + $0x28] sm:$0xff]  ;;  %v3973_v57 = vld [vmem:[%s7754_s2 + $0x38] sm:$0xff]  }
 0x792   :  { %4876 = vrsqrt.f32 %v1482_v23 }
 0x793   :  { %1493 = vperm.xlu1 %4848, %v1487_v35   ;;  %v1515_v22 = vmul.f32 %v1487_v35, %v1451_v4 }
 0x794   :  { %v4873_v32 = vpop.eup %4872  ;;  %4451 = vmatpush3.bf16.msra.mxu0 %v6048_v63 }
 0x795   :  { %v1519_v40 = vsub.f32 %v1438_v18, %v1515_v22  ;;  %v1488_v37 = vmul.f32 %v4873_v32, %v1435_v16  ;;  %4453 = vmatprep.subr.bf16.mxu0 %v3973_v57  ;;  %v1441_v16 = vld [vmem:[%s7753_s4 + $0x77] sm:$0xff] }
 0x797   :  { %1525 = vperm.xlu1 %4848, %v1519_v40   ;;  %1498 = vperm.xlu0 %4849, %v1488_v37   ;;  %v1516_v4 = vmul.f32 %v1488_v37, %v1452_v48 }
 0x798   :  { %v4875_v45 = vpop.eup %4874  ;;  %4455 = vmatpush3.bf16.msra.mxu0 %v3973_v57 }
 0x799   :  { %v1520_v31 = vsub.f32 %v1439_v58, %v1516_v4  ;;  %v1489_v21 = vmul.f32 %v4875_v45, %v1436_v38  ;;  %4458 = vmatprep.subr.msk.bf16.mxu0 %vm6066_vm3, %v5991_v34 }
 0x79b   :  { %1530 = vperm.xlu1 %4848, %v1520_v31   ;;  %1503 = vperm.xlu0 %4849, %v1489_v21   ;;  %v1517_v48 = vmul.f32 %v1489_v21, %v1453_v41 }
 0x79c   :  { %v4877_v23 = vpop.eup %4876 }
 0x79d   :  { %v1521_v35 = vsub.f32 %v1440_v14, %v1517_v48  ;;  %v1490_v18 = vmul.f32 %v4877_v23, %v1437_v39 }
 0x79f   :  { %1535 = vperm.xlu0 %4849, %v1521_v35   ;;  %1508 = vperm.xlu1 %4848, %v1490_v18   ;;  %v1518_v22 = vmul.f32 %v1490_v18, %v1454_v1 }
 0x7a1   :  { %v1522_v32 = vsub.f32 %v1441_v16, %v1518_v22 }
 0x7a3   :  { %1540 = vperm.xlu1 %4848, %v1522_v32  }
 0x812   :  { %v1494_v41 = vpop.permute.xlu1 %1493 }
 0x813   :  { %v1511_v37 = vmul.f32 %v1494_v41, %v5968_v36 }
 0x816   :  { %v1526_v58 = vpop.permute.xlu1 %1525  ;;  %v1499_v38 = vpop.permute.xlu0 %1498 }
 0x817   :  { %v1543_v4 = vadd.f32 %v1526_v58, %v1511_v37  ;;  %v1512_v45 = vmul.f32 %v1499_v38, %v5973_v13 }
 0x819   :  { %v1547_v1 = vmax.f32 %v1543_v4, 0.0 }
 0x81a   :  { %v1531_v31 = vpop.permute.xlu1 %1530  ;;  %v1504_v21 = vpop.permute.xlu0 %1503 }
 0x81b   :  { %v1544_v14 = vadd.f32 %v1531_v31, %v1512_v45  ;;  %4246 = vmatprep.mubr.f32.mxu0 %v1547_v1  ;;  %v1513_v48 = vmul.f32 %v1504_v21, %v5978_v28 }
 0x81d   :  { %v1548_v39 = vmax.f32 %v1544_v14, 0.0 }
 0x81e   :  { %v1509_v23 = vpop.permute.xlu1 %1508  ;;  %v1536_v35 = vpop.permute.xlu0 %1535 }
 0x81f   :  { %v1545_v18 = vadd.f32 %v1536_v35, %v1513_v48  ;;  %4247 = vmatmul.mubr.f32.vlgmr.msra.gmra.mrb[10].mxu0 %v1548_v39  ;;  %v1514_v36 = vmul.f32 %v1509_v23, %v5983_v56 }
 0x820   :  { %4461 = vmatpush3.bf16.xpose.msk.msra.mxu0 %vm6066_vm3, %v5991_v34 }
 0x821   :  { %v1549_v16 = vmax.f32 %v1545_v18, 0.0  ;;  %4464 = vmatprep.subr.msk.bf16.mxu0 %vm6066_vm3, %v5996_v0 }
 0x822   :  { %v1541_v13 = vpop.permute.xlu1 %1540 }
 0x823   :  { %v1546_v22 = vadd.f32 %v1541_v13, %v1514_v36  ;;  %4249 = vmatprep.mubr.f32.mxu0 %v1549_v16 }
 0x825   :  { %v1550_v32 = vmax.f32 %v1546_v22, 0.0 }
 0x827   :  { %4250 = vmatmul.mubr.f32.gmra.mrb[12].mxu0 %v1550_v32 }
 0x828   :  { %4467 = vmatpush3.bf16.xpose.msk.msra.mxu0 %vm6066_vm3, %v5996_v0 }
 0x829   :  { %4470 = vmatprep.subr.msk.bf16.mxu0 %vm6066_vm3, %v6004_v62 }
 0x830   :  { %4473 = vmatpush3.bf16.xpose.msk.msra.mxu0 %vm6066_vm3, %v6004_v62 }
 0x831   :  { %4476 = vmatprep.subr.msk.bf16.mxu0 %vm6066_vm3, %v6011_v12 }
 0x838   :  { %4479 = vmatpush3.bf16.xpose.msk.msra.mxu0 %vm6066_vm3, %v6011_v12 }
 0x839   :  { %4482 = vmatprep.subr.msk.bf16.mxu0 %vm6066_vm3, %v6018_v49 }
 0x840   :  { %4485 = vmatpush3.bf16.xpose.msk.msra.mxu0 %vm6066_vm3, %v6018_v49 }
 0x841   :  { %4488 = vmatprep.subr.msk.bf16.mxu0 %vm6066_vm3, %v6035_v10 }
 0x848   :  { %4491 = vmatpush3.bf16.xpose.msk.msra.mxu0 %vm6066_vm3, %v6035_v10 }
 0x849   :  { %4494 = vmatprep.subr.msk.bf16.mxu0 %vm6066_vm3, %v6048_v63 }
 0x850   :  { %4497 = vmatpush3.bf16.xpose.msk.msra.mxu0 %vm6066_vm3, %v6048_v63 }
 0x851   :  { %4500 = vmatprep.subr.msk.bf16.mxu0 %vm6066_vm3, %v3973_v57 }
 0x858   :  { %4503 = vmatpush3.bf16.xpose.msk.msra.mxu0 %vm6066_vm3, %v3973_v57  ;;  %vm8069_vm3 = vmmov %vm8065_vm5 }
 0x859   :  { %4577 = vmatprep.subr.bf16.mxu0 %v5653_v44 }
 0x8f2   :  { %v4248_v28 = vpop.f32.mrb[10].mxu0 }
 0x8f3   :  { %v1617_v56 = vpop.f32.mrb[11].mxu0 }
 0x8f4   :  { %4284 = vmatprep.mubr.msk.f32.mxu0 %vm1636_vm7, %v1617_v56 }
 0x8f5   :  { %4285 = vmatmul.mubr.msk.f32.vlgmr.msra.gmra.mrb[14].mxu0 %vm1636_vm7, %v4248_v28 }
 0x8f6   :  { %4579 = vmatpush3.bf16.xpose.msra.mxu0 %v5662_v26 }
 0x8f7   :  { %4581 = vmatprep.subr.bf16.mxu0 %v5670_v33 }
 0x8fa   :  { %v4251_v34 = vpop.f32.mrb[12].mxu0 }
 0x8fb   :  { %v1627_v0 = vpop.f32.mrb[13].mxu0 }
 0x8fc   :  { %4287 = vmatprep.mubr.msk.f32.mxu0 %vm1636_vm7, %v1627_v0 }
 0x8fd   :  { %4288 = vmatmul.mubr.msk.f32.gmra.mrb[16].mxu0 %vm1636_vm7, %v4251_v34 }
 0x8fe   :  { %4583 = vmatpush3.bf16.xpose.msra.mxu0 %v5680_v54 }
 0x8ff   :  { %4585 = vmatprep.subr.bf16.mxu0 %v5688_v50 }
 0x906   :  { %4587 = vmatpush3.bf16.xpose.msra.mxu0 %v5698_v20 }
 0x907   :  { %4589 = vmatprep.subr.bf16.mxu0 %v5706_v11 }
 0x90e   :  { %4591 = vmatpush3.bf16.xpose.msra.mxu0 %v5716_v5 }
 0x90f   :  { %4593 = vmatprep.subr.bf16.mxu0 %v5724_v9 }
 0x916   :  { %4595 = vmatpush3.bf16.xpose.msra.mxu0 %v5734_v30 }
 0x917   :  { %4597 = vmatprep.subr.bf16.mxu0 %v5742_v42  ;;  %v1883_v42 = vld [vmem:[%s7751_s3 + $0x98] sm:$0xff] }
 0x918   :  { %1958 = vmatprep.mubr.f32.mxu1 %v1883_v42 }
 0x91e   :  { %4599 = vmatpush3.bf16.xpose.msra.mxu0 %v5752_v43 }
 0x91f   :  { %4601 = vmatprep.subr.bf16.mxu0 %v5770_v47 }
 0x926   :  { %4603 = vmatpush3.bf16.xpose.msra.mxu0 %v5779_v24 }
 0x927   :  { %4605 = vmatprep.subr.bf16.mxu0 %v5791_v29 }
 0x92e   :  { %4607 = vmatpush3.bf16.xpose.msra.mxu0 %v5799_v3 }
 0x9c8   :  { %v4286_v44 = vpop.f32.mrb[14].mxu0 }
 0x9c9   :  { %v1783_v26 = vmul.f32 4.0, %v4286_v44  ;;  %v1763_v33 = vpop.f32.mrb[15].mxu0 }
 0x9ca   :  { %v1782_v54 = vmul.f32 4.0, %v1763_v33 }
 0x9cb   :  { %1788 = vrot.lane.b32.xlu1 %v1783_v26, %s4931_s8 }
 0x9cc   :  { %1786 = vrot.lane.b32.xlu0 %v1782_v54, %s4931_s8  ;;  %v4504_v50 = vpack.c.bf16 %v1783_v26, %v1782_v54 }
 0x9ce   :  { %4505 = vmatprep.subr.bf16.mxu1 %v4504_v50 }
 0x9cf   :  { %1836 = vrot.lane.b32.xlu1 %v1783_v26, %s4926_s21 }
 0x9d0   :  { %1834 = vrot.lane.b32.xlu0 %v1782_v54, %s4926_s21  ;;  %v4289_v20 = vpop.f32.mrb[16].mxu0 }
 0x9d1   :  { %v1785_v11 = vmul.f32 4.0, %v4289_v20  ;;  %v1773_v5 = vpop.f32.mrb[17].mxu0 }
 0x9d2   :  { %v1784_v9 = vmul.f32 4.0, %v1773_v5 }
 0x9d3   :  { %1800 = vrot.lane.b32.xlu1 %v1783_v26, %s4933_s9 }
 0x9d4   :  { %1798 = vrot.lane.b32.xlu0 %v1782_v54, %s4933_s9  ;;  %v4508_v30 = vpack.c.bf16 %v1785_v11, %v1784_v9 }
 0x9d7   :  { %1848 = vrot.lane.b32.xlu1 %v1783_v26, %s4934_s10 }
 0x9d8   :  { %1846 = vrot.lane.b32.xlu0 %v1782_v54, %s4934_s10 }
 0x9db   :  { %1812 = vrot.lane.b32.xlu1 %v1783_v26, %s4935_s11 }
 0x9dc   :  { %1810 = vrot.lane.b32.xlu0 %v1782_v54, %s4935_s11 }
 0x9df   :  { %1860 = vrot.lane.b32.xlu1 %v1783_v26, %s4936_s12 }
 0x9e0   :  { %1858 = vrot.lane.b32.xlu0 %v1782_v54, %s4936_s12 }
 0x9e3   :  { %1824 = vrot.lane.b32.xlu1 %v1783_v26, %s4925_s20 }
 0x9e4   :  { %1822 = vrot.lane.b32.xlu0 %v1782_v54, %s4925_s20 }
 0x9e7   :  { %1792 = vrot.lane.b32.xlu1 %v1785_v11, %s4931_s8 }
 0x9e8   :  { %1790 = vrot.lane.b32.xlu0 %v1784_v9, %s4931_s8 }
 0x9eb   :  { %1840 = vrot.lane.b32.xlu1 %v1785_v11, %s4926_s21 }
 0x9ec   :  { %1838 = vrot.lane.b32.xlu0 %v1784_v9, %s4926_s21 }
 0x9ef   :  { %1804 = vrot.lane.b32.xlu1 %v1785_v11, %s4933_s9 }
 0x9f0   :  { %1802 = vrot.lane.b32.xlu0 %v1784_v9, %s4933_s9 }
 0x9f3   :  { %1852 = vrot.lane.b32.xlu1 %v1785_v11, %s4934_s10 }
 0x9f4   :  { %1850 = vrot.lane.b32.xlu0 %v1784_v9, %s4934_s10 }
 0x9f7   :  { %1816 = vrot.lane.b32.xlu1 %v1785_v11, %s4935_s11 }
 0x9f8   :  { %1814 = vrot.lane.b32.xlu0 %v1784_v9, %s4935_s11 }
 0x9fb   :  { %1864 = vrot.lane.b32.xlu1 %v1785_v11, %s4936_s12 }
 0x9fc   :  { %1862 = vrot.lane.b32.xlu0 %v1784_v9, %s4936_s12 }
 0x9ff   :  { %1828 = vrot.lane.b32.xlu1 %v1785_v11, %s4925_s20 }
 0xa00   :  { %1826 = vrot.lane.b32.xlu0 %v1784_v9, %s4925_s20 }
 0xa03   :  { %1872 = vrot.lane.b32.xlu1 %v1783_v26, %s4937_s13 }
 0xa04   :  { %1870 = vrot.lane.b32.xlu0 %v1782_v54, %s4937_s13 }
 0xa07   :  { %1876 = vrot.lane.b32.xlu1 %v1785_v11, %s4937_s13 }
 0xa08   :  { %1874 = vrot.lane.b32.xlu0 %v1784_v9, %s4937_s13 }
 0xa3d   :  { %v1789_v43 = vpop.permute.xlu1 %1788 }
 0xa3e   :  { %v1795_v47 = vmul.f32 %v5867_v6, %v1789_v43  ;;  %v1787_v24 = vpop.permute.xlu0 %1786 }
 0xa3f   :  { %v1794_v29 = vmul.f32 %v5867_v6, %v1787_v24 }
 0xa41   :  { %v4506_v3 = vpack.c.bf16 %v1795_v47, %v1794_v29  ;;  %v1837_v62 = vpop.permute.xlu1 %1836 }
 0xa42   :  { %v1835_v12 = vpop.permute.xlu0 %1834  ;;  %v1843_v45 = vmul.f32 %v5908_v53, %v1837_v62 }
 0xa43   :  { %4507 = vmatpush3.bf16.msra.mxu1 %v4506_v3  ;;  %v1842_v31 = vmul.f32 %v5908_v53, %v1835_v12 }
 0xa44   :  { %4509 = vmatprep.subr.bf16.mxu1 %v4508_v30 }
 0xa45   :  { %v1801_v49 = vpop.permute.xlu1 %1800  ;;  %v4512_v36 = vpack.c.bf16 %v1843_v45, %v1842_v31 }
 0xa46   :  { %v1799_v10 = vpop.permute.xlu0 %1798  ;;  %v1807_v48 = vmul.f32 %v5878_v17, %v1801_v49 }
 0xa47   :  { %v1806_v23 = vmul.f32 %v5878_v17, %v1799_v10 }
 0xa49   :  { %v1849_v63 = vpop.permute.xlu1 %1848  ;;  %v4514_v32 = vpack.c.bf16 %v1807_v48, %v1806_v23 }
 0xa4a   :  { %v1847_v57 = vpop.permute.xlu0 %1846  ;;  %v1855_v34 = vmul.f32 %v5920_v25, %v1849_v63 }
 0xa4d   :  { %v1813_v40 = vpop.permute.xlu1 %1812 }
 0xa4e   :  { %v1811_v41 = vpop.permute.xlu0 %1810  ;;  %v1819_v33 = vmul.f32 %v5887_v51, %v1813_v40 }
 0xa51   :  { %v1861_v37 = vpop.permute.xlu1 %1860 }
 0xa52   :  { %v1859_v58 = vpop.permute.xlu0 %1858 }
 0xa53   :  { %v1866_v47 = vmul.f32 %v5928_v8, %v1859_v58 }
 0xa55   :  { %v1825_v38 = vpop.permute.xlu1 %1824 }
 0xa56   :  { %v1823_v4 = vpop.permute.xlu0 %1822  ;;  %v1831_v62 = vmul.f32 %v5895_v7, %v1825_v38 }
 0xa59   :  { %v1793_v1 = vpop.permute.xlu1 %1792 }
 0xa5a   :  { %v1797_v21 = vmul.f32 %v5867_v6, %v1793_v1  ;;  %v1791_v14 = vpop.permute.xlu0 %1790 }
 0xa5b   :  { %v1796_v39 = vmul.f32 %v5867_v6, %v1791_v14  ;;  %v1854_v6 = vmul.f32 %v5920_v25, %v1847_v57 }
 0xa5d   :  { %v4510_v35 = vpack.c.bf16 %v1797_v21, %v1796_v39  ;;  %v1841_v18 = vpop.permute.xlu1 %1840  ;;  %v4520_v20 = vpack.c.bf16 %v1855_v34, %v1854_v6  ;;  %v1886_v39 = vld [vmem:[%s7751_s3 + $0xb0] sm:$0xff] }
 0xa5e   :  { %v1845_v16 = vmul.f32 %v5908_v53, %v1841_v18  ;;  %v1839_v13 = vpop.permute.xlu0 %1838  ;;  %v4904_v34 = vld [vmem:[%s7752_s1 + $0x50] sm:$0xff]  }
 0xa5f   :  { %v1844_v22 = vmul.f32 %v5908_v53, %v1839_v13  ;;  %4511 = vmatpush3.bf16.msra.mxu1 %v4510_v35  ;;  %v1818_v53 = vmul.f32 %v5887_v51, %v1811_v41  ;;  %v4905_v6 = vld [vmem:[%s7752_s1 + $0x10] sm:$0xff]  }
 0xa60   :  { %4513 = vmatprep.subr.bf16.mxu1 %v4512_v36  ;;  %v1885_v36 = vld [vmem:[%s7751_s3 + $0xa8] sm:$0xff] }
 0xa61   :  { %v4516_v28 = vpack.c.bf16 %v1845_v16, %v1844_v22  ;;  %v1805_v56 = vpop.permute.xlu1 %1804  ;;  %v4522_v30 = vpack.c.bf16 %v1819_v33, %v1818_v53  ;;  %v1884_v16 = vld [vmem:[%s7751_s3 + $0xa0] sm:$0xff]  ;;  %v4910_v53 = vld [vmem:[%s7752_s1 + $0x68] sm:$0xff]  }
 0xa62   :  { %v1809_v0 = vmul.f32 %v5878_v17, %v1805_v56  ;;  %v1803_v44 = vpop.permute.xlu0 %1802  ;;  %v4900_v22 = vld [vmem:[%s7752_s1 + $0x40] sm:$0xff]   ;;  %v4903_v56 = vld [vmem:[%s7752_s1 + $0x8] sm:$0xff]  }
 0xa63   :  { %v1808_v26 = vmul.f32 %v5878_v17, %v1803_v44  ;;  %4515 = vmatpush3.bf16.msra.mxu1 %v4514_v32  ;;  %v1867_v17 = vmul.f32 %v5928_v8, %v1861_v37  ;;  %v4901_v32 = vld [vmem:[%s7752_s1] sm:$0xff]   ;;  %v4907_v44 = vld [vmem:[%s7752_s1 + $0x18] sm:$0xff]  }
 0xa64   :  { %4517 = vmatprep.subr.bf16.mxu1 %v4516_v28  ;;  %v4902_v28 = vld [vmem:[%s7752_s1 + $0x48] sm:$0xff]   ;;  %v4909_v33 = vld [vmem:[%s7752_s1 + $0x20] sm:$0xff]  }
 0xa65   :  { %v4518_v54 = vpack.c.bf16 %v1809_v0, %v1808_v26  ;;  %v1853_v50 = vpop.permute.xlu1 %1852  ;;  %v4528_v10 = vpack.c.bf16 %v1867_v17, %v1866_v47  ;;  %v4906_v0 = vld [vmem:[%s7752_s1 + $0x58] sm:$0xff]   ;;  %v4908_v26 = vld [vmem:[%s7752_s1 + $0x60] sm:$0xff]  }
 0xa66   :  { %v1857_v11 = vmul.f32 %v5920_v25, %v1853_v50  ;;  %v1851_v5 = vpop.permute.xlu0 %1850  ;;  %v4912_v50 = vld [vmem:[%s7752_s1 + $0x70] sm:$0xff]  }
 0xa67   :  { %v1856_v9 = vmul.f32 %v5920_v25, %v1851_v5  ;;  %4519 = vmatpush3.bf16.msra.mxu1 %v4518_v54  ;;  %v1830_v25 = vmul.f32 %v5895_v7, %v1823_v4  ;;  %v4911_v54 = vld [vmem:[%s7752_s1 + $0x28] sm:$0xff]   ;;  %v4915_v5 = vld [vmem:[%s7752_s1 + $0x38] sm:$0xff]  }
 0xa68   :  { %4521 = vmatprep.subr.bf16.mxu1 %v4520_v20  ;;  %v4913_v20 = vld [vmem:[%s7752_s1 + $0x30] sm:$0xff]  }
 0xa69   :  { %v4524_v42 = vpack.c.bf16 %v1857_v11, %v1856_v9  ;;  %v1817_v43 = vpop.permute.xlu1 %1816  ;;  %v4530_v41 = vpack.c.bf16 %v1831_v62, %v1830_v25  ;;  %v4914_v11 = vld [vmem:[%s7752_s1 + $0x78] sm:$0xff]  }
 0xa6a   :  { %v1821_v24 = vmul.f32 %v5887_v51, %v1817_v43  ;;  %v1815_v29 = vpop.permute.xlu0 %1814 }
 0xa6b   :  { %v1820_v3 = vmul.f32 %v5887_v51, %v1815_v29  ;;  %4523 = vmatpush3.bf16.msra.mxu1 %v4522_v30 }
 0xa6c   :  { %4525 = vmatprep.subr.bf16.mxu1 %v4524_v42 }
 0xa6d   :  { %v4526_v12 = vpack.c.bf16 %v1821_v24, %v1820_v3  ;;  %v1865_v49 = vpop.permute.xlu1 %1864 }
 0xa6e   :  { %v1869_v63 = vmul.f32 %v5928_v8, %v1865_v49  ;;  %v1863_v57 = vpop.permute.xlu0 %1862 }
 0xa6f   :  { %v1868_v40 = vmul.f32 %v5928_v8, %v1863_v57  ;;  %4527 = vmatpush3.bf16.msra.mxu1 %v4526_v12  ;;  %v1882_v8 = vld [vmem:[%s7751_s3 + $0x90] sm:$0xff] }
 0xa70   :  { %4529 = vmatprep.subr.bf16.mxu1 %v4528_v10 }
 0xa71   :  { %v4532_v37 = vpack.c.bf16 %v1869_v63, %v1868_v40  ;;  %v1829_v58 = vpop.permute.xlu1 %1828 }
 0xa72   :  { %v1833_v51 = vmul.f32 %v5895_v7, %v1829_v58  ;;  %v1827_v1 = vpop.permute.xlu0 %1826 }
 0xa73   :  { %v1832_v38 = vmul.f32 %v5895_v7, %v1827_v1  ;;  %4531 = vmatpush3.bf16.msra.mxu1 %v4530_v41 }
 0xa74   :  { %4533 = vmatprep.subr.bf16.mxu1 %v4532_v37 }
 0xa75   :  { %v4534_v4 = vpack.c.bf16 %v1833_v51, %v1832_v38  ;;  %v1873_v45 = vpop.permute.xlu1 %1872 }
 0xa76   :  { %v1879_v31 = vmul.f32 %v5938_v60, %v1873_v45  ;;  %v1871_v21 = vpop.permute.xlu0 %1870 }
 0xa77   :  { %v1878_v14 = vmul.f32 %v5938_v60, %v1871_v21  ;;  %4535 = vmatpush3.bf16.msra.mxu1 %v4534_v4  ;;  %v2044_v21 = vld [vmem:[%s7753_s4 + $0x30] sm:$0xff] }
 0xa79   :  { %v4536_v48 = vpack.c.bf16 %v1879_v31, %v1878_v14  ;;  %v1877_v7 = vpop.permute.xlu1 %1876 }
 0xa7a   :  { %v1881_v23 = vmul.f32 %v5938_v60, %v1877_v7  ;;  %v1875_v35 = vpop.permute.xlu0 %1874  ;;  %1959 = vmatmul.mubr.f32.vlgmr.msra.gmra.mrb[20].mxu1 %v1882_v8  ;;  %v2045_v7 = vld [vmem:[%s7753_s4 + $0x38] sm:$0xff] }
 0xa7b   :  { %v1880_v18 = vmul.f32 %v5938_v60, %v1875_v35  ;;  %4537 = vmatprep.subr.bf16.mxu1 %v4536_v48  ;;  %1963 = vmatprep.mubr.f32.mxu1 %v1886_v39  ;;  %v1887_v60 = vld [vmem:[%s7751_s3 + $0xb8] sm:$0xff] }
 0xa7c   :  { %4539 = vmatpush3.bf16.msra.mxu1 %v4536_v48  ;;  %v2046_v39 = vld [vmem:[%s7753_s4 + $0x7f] sm:$0xff] }
 0xa7d   :  { %v4540_v13 = vpack.c.bf16 %v1881_v23, %v1880_v18 }
 0xa7e   :  { %1964 = vmatmul.mubr.f32.gmra.mrb[22].mxu1 %v1885_v36  ;;  %v2047_v36 = vld [vmem:[%s7753_s4 + $0x87] sm:$0xff] }
 0xa7f   :  { %4541 = vmatprep.subr.bf16.mxu1 %v4540_v13  ;;  %4298 = vmatprep.mubr.msk.f32.mxu1 %vm1636_vm7, %v1884_v16 }
 0xa80   :  { %4543 = vmatpush3.bf16.msra.mxu1 %v4540_v13 }
 0xa81   :  { %4545 = vmatprep.subr.bf16.mxu1 %v4900_v22 }
 0xa83   :  { %4299 = vmatmul.mubr.msk.f32.vlgmr.msra.gmra.mrb[24].mxu1 %vm1636_vm7, %v1887_v60 }
 0xa89   :  { %4547 = vmatpush3.bf16.xpose.msra.mxu1 %v4901_v32 }
 0xa8a   :  { %4549 = vmatprep.subr.bf16.mxu1 %v4902_v28 }
 0xa91   :  { %4551 = vmatpush3.bf16.xpose.msra.mxu1 %v4903_v56 }
 0xa92   :  { %4553 = vmatprep.subr.bf16.mxu1 %v4904_v34 }
 0xa99   :  { %4555 = vmatpush3.bf16.xpose.msra.mxu1 %v4905_v6 }
 0xa9a   :  { %4557 = vmatprep.subr.bf16.mxu1 %v4906_v0 }
 0xaa1   :  { %4559 = vmatpush3.bf16.xpose.msra.mxu1 %v4907_v44 }
 0xaa2   :  { %4561 = vmatprep.subr.bf16.mxu1 %v4908_v26 }
 0xaa9   :  { %4563 = vmatpush3.bf16.xpose.msra.mxu1 %v4909_v33 }
 0xaaa   :  { %4565 = vmatprep.subr.bf16.mxu1 %v4910_v53 }
 0xab1   :  { %4567 = vmatpush3.bf16.xpose.msra.mxu1 %v4911_v54 }
 0xab2   :  { %4569 = vmatprep.subr.bf16.mxu1 %v4912_v50 }
 0xab9   :  { %4571 = vmatpush3.bf16.xpose.msra.mxu1 %v4913_v20 }
 0xaba   :  { %4573 = vmatprep.subr.bf16.mxu1 %v4914_v11 }
 0xac1   :  { %4575 = vmatpush3.bf16.xpose.msra.mxu1 %v4915_v5 }
 0xb4d   :  { %v4122_v9 = vpop.f32.mrb[20].mxu1 }
 0xb4e   :  { %v4123_v30 = vpop.f32.mrb[21].mxu1 }
 0xb4f   :  { %v4124_v42 = vadd.f32 %v4123_v30, %v4122_v9 }
 0xb51   :  { %v4125_v43 = vpop.f32.mrb[22].mxu1 }
 0xb52   :  { %v4126_v17 = vpop.f32.mrb[23].mxu1 }
 0xb53   :  { %v4127_v47 = vadd.f32 %v4126_v17, %v4125_v43 }
 0xb56   :  { %v4300_v24 = vpop.f32.mrb[24].mxu1 }
 0xb57   :  { %v2041_v29 = vadd.f32 %v4300_v24, %v4127_v47  ;;  %v2035_v3 = vpop.f32.mrb[25].mxu1 }
 0xb58   :  { %v2036_v62 = vadd.f32 %v4124_v42, %v2035_v3 }
 0xb59   :  { %v2055_v12 = vmul.f32 %v2041_v29, %v2041_v29 }
 0xb5a   :  { %2048 = vadd.xlane.f32.xlu0 %v2036_v62  ;;  %v2054_v25 = vmul.f32 %v2036_v62, %v2036_v62 }
 0xb5c   :  { %2056 = vadd.xlane.f32.xlu1 %v2054_v25 }
 0xb5e   :  { %2050 = vadd.xlane.f32.xlu0 %v2041_v29 }
 0xb62   :  { %2058 = vadd.xlane.f32.xlu0 %v2055_v12 }
 0xbe7   :  { %v2049_v49 = vpop.xlane.xlu0 %2048 }
 0xbe8   :  { %v2052_v10 = vmul.f32 0.0078125, %v2049_v49 }
 0xbe9   :  { %v2057_v63 = vpop.xlane.xlu1 %2056 }
 0xbea   :  { %v2062_v57 = vmul.f32 %v2052_v10, %v2052_v10  ;;  %v2060_v40 = vmul.f32 0.0078125, %v2057_v63 }
 0xbeb   :  { %v2051_v41 = vpop.xlane.xlu0 %2050 }
 0xbec   :  { %v2064_v37 = vsub.f32 %v2060_v40, %v2062_v57  ;;  %v2053_v58 = vmul.f32 0.0078125, %v2051_v41 }
 0xbee   :  { %v2066_v51 = vadd.f32 1e-05, %v2064_v37  ;;  %v2063_v38 = vmul.f32 %v2053_v58, %v2053_v58 }
 0xbef   :  { %v2059_v1 = vpop.xlane.xlu0 %2058 }
 0xbf0   :  { %4878 = vrsqrt.f32 %v2066_v51  ;;  %v2061_v4 = vmul.f32 0.0078125, %v2059_v1 }
 0xbf2   :  { %v2065_v45 = vsub.f32 %v2061_v4, %v2063_v38 }
 0xbf4   :  { %v2067_v31 = vadd.f32 1e-05, %v2065_v45 }
 0xbf6   :  { %4880 = vrsqrt.f32 %v2067_v31 }
 0xbfa   :  { %v4879_v14 = vpop.eup %4878 }
 0xbfb   :  { %v2070_v8 = vmul.f32 %v4879_v14, %v2044_v21 }
 0xbfd   :  { %2074 = vperm.xlu1 %4848, %v2070_v8   ;;  %v2084_v48 = vmul.f32 %v2070_v8, %v2052_v10 }
 0xbff   :  { %v2086_v23 = vsub.f32 %v2046_v39, %v2084_v48 }
 0xc00   :  { %v4881_v35 = vpop.eup %4880 }
 0xc01   :  { %2090 = vperm.xlu0 %4849, %v2086_v23   ;;  %v2071_v18 = vmul.f32 %v4881_v35, %v2045_v7 }
 0xc03   :  { %2079 = vperm.xlu1 %4848, %v2071_v18   ;;  %v2085_v16 = vmul.f32 %v2071_v18, %v2053_v58 }
 0xc05   :  { %v2087_v13 = vsub.f32 %v2047_v36, %v2085_v16 }
 0xc07   :  { %2095 = vperm.xlu1 %4848, %v2087_v13  }
 0xc7c   :  { %v2075_v60 = vpop.permute.xlu1 %2074 }
 0xc7d   :  { %v2082_v22 = vmul.f32 %v2075_v60, %v2036_v62 }
 0xc80   :  { %v2091_v32 = vpop.permute.xlu0 %2090 }
 0xc81   :  { %v2098_v28 = vadd.f32 %v2091_v32, %v2082_v22 }
 0xc82   :  { %v2080_v56 = vpop.permute.xlu1 %2079 }
 0xc83   :  { %v2100_v34 = vmax.f32 %v2098_v28, 0.0  ;;  %v2083_v6 = vmul.f32 %v2080_v56, %v2041_v29 }
 0xc85   :  { %4166 = vmatprep.mubr.f32.mxu1 %v2100_v34  ;;  %4206 = vmatprep.mubr.f32.mxu0 %v2100_v34 }
 0xc86   :  { %v2096_v0 = vpop.permute.xlu1 %2095  ;;  %4167 = vmatmul.mubr.f32.vlgmr.msra.gmra.mrb[26].mxu1 %v2100_v34  ;;  %4207 = vmatmul.mubr.f32.vlgmr.msra.gmra.mrb[18].mxu0 %v2100_v34 }
 0xc87   :  { %v2099_v44 = vadd.f32 %v2096_v0, %v2083_v6 }
 0xc89   :  { %v2101_v26 = vmax.f32 %v2099_v44, 0.0 }
 0xc8b   :  { %4168 = vmatprep.mubr.f32.mxu1 %v2101_v26  ;;  %4208 = vmatprep.mubr.f32.mxu0 %v2101_v26 }
 0xc8c   :  { %4169 = vmatmul.mubr.f32.gmra.mrb[28].mxu1 %v2101_v26  ;;  %4209 = vmatmul.mubr.f32.gmra.mrb[20].mxu0 %v2101_v26 }
 0xc8d   :  { %4170 = vmatprep.mubr.f32.mxu1 %v5811_v59  ;;  %4210 = vmatprep.mubr.f32.mxu0 %v5811_v59 }
 0xc90   :  { %4171 = vmatmul.mubr.f32.gmra.mrb[30].mxu1 %v5811_v59  ;;  %4211 = vmatmul.mubr.f32.gmra.mrb[22].mxu0 %v5811_v59 }
 0xc91   :  { %4172 = vmatprep.mubr.f32.mxu1 %v5818_v61  ;;  %4212 = vmatprep.mubr.f32.mxu0 %v5818_v61 }
 0xc94   :  { %4173 = vmatmul.mubr.f32.gmra.mrb[32].mxu1 %v5818_v61  ;;  %4213 = vmatmul.mubr.f32.gmra.mrb[24].mxu0 %v5818_v61 }
 0xd59   :  { %v2168_v33 = vpop.f32.mrb[26].mxu1  ;;  %v2257_v53 = vpop.f32.mrb[18].mxu0 }
 0xd5a   :  { %v6292_v54 = vmul.f32 4.0, %v2168_v33  ;;  %v2170_v50 = vpop.f32.mrb[27].mxu1  ;;  %v2259_v20 = vpop.f32.mrb[19].mxu0  ;;  %v6296_v59 = vmul.f32 4.0, %v2257_v53 }
 0xd5b   :  { %v6380_v10 = vmul.f32 4.0, %v2170_v50  ;;  %v6386_v63 = vmul.f32 4.0, %v2259_v20 }
 0xd5c   :  { %8002 = vst [vmem:[#allocation55_spill] sm:$0xff] %v6292_v54  ;;  %2296 = vrot.lane.b32.xlu0 %v6292_v54, %s4923_s18  ;;  %8003 = vst [vmem:[#allocation56_spill] sm:$0xff] %v6296_v59 }
 0xd5d   :  { %8006 = vst [vmem:[#allocation59_spill] sm:$0xff] %v6386_v63 }
 0xd5f   :  { %v2174_v11 = vpop.f32.mrb[28].mxu1  ;;  %v2263_v5 = vpop.f32.mrb[20].mxu0 }
 0xd60   :  { %v6298_v9 = vmul.f32 4.0, %v2174_v11  ;;  %v6300_v30 = vmul.f32 4.0, %v2263_v5  ;;  %v2265_v42 = vpop.f32.mrb[21].mxu0  ;;  %2360 = vrot.lane.b32.xlu0 %v6292_v54, %s4922_s17  ;;  %v2176_v61 = vpop.f32.mrb[29].mxu1 }
 0xd61   :  { %v6390_v57 = vmul.f32 4.0, %v2176_v61  ;;  %v6396_v40 = vmul.f32 4.0, %v2265_v42 }
 0xd62   :  { %8004 = vst [vmem:[#allocation57_spill] sm:$0xff] %v6298_v9  ;;  %8005 = vst [vmem:[#allocation58_spill] sm:$0xff] %v6300_v30  ;;  %2298 = vrot.lane.b32.xlu1 %v6298_v9, %s4923_s18 }
 0xd63   :  { %v6310_v47 = vpop.f32.mrb[30].mxu1  ;;  %v6312_v24 = vpop.f32.mrb[22].mxu0  ;;  %8007 = vst [vmem:[#allocation60_spill] sm:$0xff] %v6390_v57  ;;  %8008 = vst [vmem:[#allocation61_spill] sm:$0xff] %v6396_v40 }
 0xd64   :  { %v6314_v29 = vpop.f32.mrb[23].mxu0  ;;  %2312 = vrot.lane.b32.xlu0 %v6296_v59, %s4923_s18  ;;  %v6318_v3 = vpop.f32.mrb[31].mxu1  ;;  %v6447_v37 = vmul.f32 4.0, %v6310_v47  ;;  %v6469_v45 = vmul.f32 4.0, %v6312_v24 }
 0xd65   :  { %v6571_v50 = vmul.f32 4.0, %v6318_v3  ;;  %v6582_v5 = vmul.f32 4.0, %v6314_v29 }
 0xd66   :  { %2362 = vrot.lane.b32.xlu1 %v6298_v9, %s4922_s17  ;;  %8009 = vst [vmem:[#allocation62_spill] sm:$0xff] %v6447_v37  ;;  %8011 = vst [vmem:[#allocation64_spill] sm:$0xff] %v6469_v45 }
 0xd67   :  { %v6322_v62 = vpop.f32.mrb[32].mxu1  ;;  %v6324_v25 = vpop.f32.mrb[24].mxu0  ;;  %8026 = vst [vmem:[#allocation79_spill] sm:$0xff] %v6571_v50  ;;  %8029 = vst [vmem:[#allocation82_spill] sm:$0xff] %v6582_v5 }
 0xd68   :  { %v6326_v12 = vpop.f32.mrb[25].mxu0  ;;  %2424 = vrot.lane.b32.xlu0 %v6292_v54, %s4924_s19  ;;  %v6330_v49 = vpop.f32.mrb[33].mxu1  ;;  %v6462_v38 = vmul.f32 4.0, %v6322_v62  ;;  %v6484_v8 = vmul.f32 4.0, %v6324_v25 }
 0xd69   :  { %v6587_v61 = vmul.f32 4.0, %v6330_v49  ;;  %v6599_v3 = vmul.f32 4.0, %v6326_v12 }
 0xd6a   :  { %2314 = vrot.lane.b32.xlu1 %v6300_v30, %s4923_s18  ;;  %8010 = vst [vmem:[#allocation63_spill] sm:$0xff] %v6462_v38  ;;  %8012 = vst [vmem:[#allocation65_spill] sm:$0xff] %v6484_v8 }
 0xd6b   :  { %8030 = vst [vmem:[#allocation83_spill] sm:$0xff] %v6587_v61  ;;  %8032 = vst [vmem:[#allocation85_spill] sm:$0xff] %v6599_v3 }
 0xd6c   :  { %2488 = vrot.lane.b32.xlu0 %v6292_v54, %s4925_s20 }
 0xd6e   :  { %2426 = vrot.lane.b32.xlu1 %v6298_v9, %s4924_s19 }
 0xd70   :  { %2376 = vrot.lane.b32.xlu0 %v6296_v59, %s4922_s17 }
 0xd72   :  { %2490 = vrot.lane.b32.xlu1 %v6298_v9, %s4925_s20 }
 0xd74   :  { %2440 = vrot.lane.b32.xlu0 %v6296_v59, %s4924_s19 }
 0xd76   :  { %2378 = vrot.lane.b32.xlu1 %v6300_v30, %s4922_s17 }
 0xd78   :  { %2504 = vrot.lane.b32.xlu0 %v6296_v59, %s4925_s20 }
 0xd7a   :  { %2442 = vrot.lane.b32.xlu1 %v6300_v30, %s4924_s19 }
 0xd7c   :  { %2568 = vrot.lane.b32.xlu0 %v6296_v59, %s4926_s21 }
 0xd7e   :  { %2506 = vrot.lane.b32.xlu1 %v6300_v30, %s4925_s20 }
 0xd80   :  { %2552 = vrot.lane.b32.xlu0 %v6292_v54, %s4926_s21 }
 0xd82   :  { %2570 = vrot.lane.b32.xlu1 %v6300_v30, %s4926_s21 }
 0xd84   :  { %2632 = vrot.lane.b32.xlu0 %v6296_v59, %s4927_s22 }
 0xd86   :  { %2554 = vrot.lane.b32.xlu1 %v6298_v9, %s4926_s21 }
 0xd88   :  { %2616 = vrot.lane.b32.xlu0 %v6292_v54, %s4927_s22 }
 0xd8a   :  { %2634 = vrot.lane.b32.xlu1 %v6300_v30, %s4927_s22 }
 0xd8c   :  { %2696 = vrot.lane.b32.xlu0 %v6296_v59, %s4928_s23 }
 0xd8e   :  { %2618 = vrot.lane.b32.xlu1 %v6298_v9, %s4927_s22 }
 0xd90   :  { %2680 = vrot.lane.b32.xlu0 %v6292_v54, %s4928_s23 }
 0xd92   :  { %2698 = vrot.lane.b32.xlu1 %v6300_v30, %s4928_s23 }
 0xd94   :  { %2760 = vrot.lane.b32.xlu0 %v6296_v59, %s4929_s24 }
 0xd96   :  { %2682 = vrot.lane.b32.xlu1 %v6298_v9, %s4928_s23 }
 0xd98   :  { %2744 = vrot.lane.b32.xlu0 %v6292_v54, %s4929_s24 }
 0xd9a   :  { %2762 = vrot.lane.b32.xlu1 %v6300_v30, %s4929_s24 }
 0xd9c   :  { %2304 = vrot.lane.b32.xlu0 %v6380_v10, %s4923_s18 }
 0xd9e   :  { %2746 = vrot.lane.b32.xlu1 %v6298_v9, %s4929_s24 }
 0xda0   :  { %2320 = vrot.lane.b32.xlu0 %v6386_v63, %s4923_s18 }
 0xda2   :  { %2306 = vrot.lane.b32.xlu1 %v6390_v57, %s4923_s18 }
 0xda4   :  { %2384 = vrot.lane.b32.xlu0 %v6386_v63, %s4922_s17 }
 0xda6   :  { %2322 = vrot.lane.b32.xlu1 %v6396_v40, %s4923_s18 }
 0xda8   :  { %2368 = vrot.lane.b32.xlu0 %v6380_v10, %s4922_s17 }
 0xdaa   :  { %2386 = vrot.lane.b32.xlu1 %v6396_v40, %s4922_s17 }
 0xdac   :  { %2432 = vrot.lane.b32.xlu0 %v6380_v10, %s4924_s19 }
 0xdae   :  { %2370 = vrot.lane.b32.xlu1 %v6390_v57, %s4922_s17 }
 0xdb0   :  { %2448 = vrot.lane.b32.xlu0 %v6386_v63, %s4924_s19 }
 0xdb2   :  { %2434 = vrot.lane.b32.xlu1 %v6390_v57, %s4924_s19 }
 0xdb4   :  { %2496 = vrot.lane.b32.xlu0 %v6380_v10, %s4925_s20 }
 0xdb6   :  { %2450 = vrot.lane.b32.xlu1 %v6396_v40, %s4924_s19 }
 0xdb8   :  { %2512 = vrot.lane.b32.xlu0 %v6386_v63, %s4925_s20 }
 0xdba   :  { %2498 = vrot.lane.b32.xlu1 %v6390_v57, %s4925_s20 }
 0xdbc   :  { %2560 = vrot.lane.b32.xlu0 %v6380_v10, %s4926_s21 }
 0xdbe   :  { %2514 = vrot.lane.b32.xlu1 %v6396_v40, %s4925_s20 }
 0xdc0   :  { %2624 = vrot.lane.b32.xlu0 %v6380_v10, %s4927_s22 }
 0xdc2   :  { %2562 = vrot.lane.b32.xlu1 %v6390_v57, %s4926_s21 }
 0xdc4   :  { %2576 = vrot.lane.b32.xlu0 %v6386_v63, %s4926_s21 }
 0xdc6   :  { %2626 = vrot.lane.b32.xlu1 %v6390_v57, %s4927_s22 }
 0xdc8   :  { %2688 = vrot.lane.b32.xlu0 %v6380_v10, %s4928_s23 }
 0xdca   :  { %2578 = vrot.lane.b32.xlu1 %v6396_v40, %s4926_s21 }
 0xdcc   :  { %2640 = vrot.lane.b32.xlu0 %v6386_v63, %s4927_s22 }
 0xdce   :  { %v6440_v41 = vpop.permute.xlu0 %2296  ;;  %2690 = vrot.lane.b32.xlu1 %v6390_v57, %s4928_s23 }
 0xdd0   :  { %2752 = vrot.lane.b32.xlu0 %v6380_v10, %s4929_s24 }
 0xdd2   :  { %v6449_v58 = vpop.permute.xlu0 %2360  ;;  %2642 = vrot.lane.b32.xlu1 %v6396_v40, %s4927_s22 }
 0xdd4   :  { %v6453_v51 = vpop.permute.xlu1 %2298  ;;  %2300 = vrot.lane.b32.xlu0 %v6447_v37, %s4923_s18 }
 0xdd6   :  { %v6457_v1 = vpop.permute.xlu0 %2312  ;;  %2754 = vrot.lane.b32.xlu1 %v6390_v57, %s4929_s24 }
 0xdd8   :  { %v6464_v4 = vpop.permute.xlu1 %2362  ;;  %2364 = vrot.lane.b32.xlu0 %v6447_v37, %s4922_s17 }
 0xdda   :  { %v6471_v31 = vpop.permute.xlu0 %2424  ;;  %2302 = vrot.lane.b32.xlu1 %v6462_v38, %s4923_s18 }
 0xddc   :  { %v6475_v21 = vpop.permute.xlu1 %2314  ;;  %2316 = vrot.lane.b32.xlu0 %v6469_v45, %s4923_s18 }
 0xdde   :  { %v6479_v14 = vpop.permute.xlu0 %2488  ;;  %2366 = vrot.lane.b32.xlu1 %v6462_v38, %s4922_s17 }
 0xde0   :  { %v6486_v39 = vpop.permute.xlu1 %2426  ;;  %2428 = vrot.lane.b32.xlu0 %v6447_v37, %s4924_s19 }
 0xde2   :  { %v6490_v48 = vpop.permute.xlu0 %2376  ;;  %2318 = vrot.lane.b32.xlu1 %v6484_v8, %s4923_s18 }
 0xde4   :  { %v6494_v7 = vpop.permute.xlu1 %2490  ;;  %2492 = vrot.lane.b32.xlu0 %v6447_v37, %s4925_s20 }
 0xde6   :  { %v6498_v23 = vpop.permute.xlu0 %2440  ;;  %2430 = vrot.lane.b32.xlu1 %v6462_v38, %s4924_s19 }
 0xde8   :  { %v6502_v35 = vpop.permute.xlu1 %2378  ;;  %2380 = vrot.lane.b32.xlu0 %v6469_v45, %s4922_s17 }
 0xdea   :  { %v6506_v18 = vpop.permute.xlu0 %2504  ;;  %2494 = vrot.lane.b32.xlu1 %v6462_v38, %s4925_s20 }
 0xdec   :  { %v6510_v36 = vpop.permute.xlu1 %2442  ;;  %2444 = vrot.lane.b32.xlu0 %v6469_v45, %s4924_s19 }
 0xdee   :  { %v6514_v16 = vpop.permute.xlu0 %2568  ;;  %2382 = vrot.lane.b32.xlu1 %v6484_v8, %s4922_s17 }
 0xdef   :  { %8013 = vst [vmem:[#allocation66_spill] sm:$0xff] %v6514_v16 }
 0xdf0   :  { %v6518_v13 = vpop.permute.xlu1 %2506  ;;  %2508 = vrot.lane.b32.xlu0 %v6469_v45, %s4925_s20 }
 0xdf2   :  { %v6522_v60 = vpop.permute.xlu0 %2552  ;;  %2446 = vrot.lane.b32.xlu1 %v6484_v8, %s4924_s19 }
 0xdf3   :  { %8014 = vst [vmem:[#allocation67_spill] sm:$0xff] %v6522_v60 }
 0xdf4   :  { %v6526_v22 = vpop.permute.xlu1 %2570  ;;  %2572 = vrot.lane.b32.xlu0 %v6469_v45, %s4926_s21 }
 0xdf5   :  { %8015 = vst [vmem:[#allocation68_spill] sm:$0xff] %v6526_v22 }
 0xdf6   :  { %v6530_v32 = vpop.permute.xlu0 %2632  ;;  %2510 = vrot.lane.b32.xlu1 %v6484_v8, %s4925_s20 }
 0xdf7   :  { %8016 = vst [vmem:[#allocation69_spill] sm:$0xff] %v6530_v32 }
 0xdf8   :  { %v6534_v28 = vpop.permute.xlu1 %2554  ;;  %2556 = vrot.lane.b32.xlu0 %v6447_v37, %s4926_s21 }
 0xdf9   :  { %8017 = vst [vmem:[#allocation70_spill] sm:$0xff] %v6534_v28 }
 0xdfa   :  { %v6538_v56 = vpop.permute.xlu0 %2616  ;;  %2574 = vrot.lane.b32.xlu1 %v6484_v8, %s4926_s21 }
 0xdfb   :  { %8018 = vst [vmem:[#allocation71_spill] sm:$0xff] %v6538_v56 }
 0xdfc   :  { %v6542_v34 = vpop.permute.xlu1 %2634  ;;  %2636 = vrot.lane.b32.xlu0 %v6469_v45, %s4927_s22 }
 0xdfd   :  { %8019 = vst [vmem:[#allocation72_spill] sm:$0xff] %v6542_v34 }
 0xdfe   :  { %v6546_v6 = vpop.permute.xlu0 %2696  ;;  %2558 = vrot.lane.b32.xlu1 %v6462_v38, %s4926_s21 }
 0xdff   :  { %8020 = vst [vmem:[#allocation73_spill] sm:$0xff] %v6546_v6 }
 0xe00   :  { %v6550_v0 = vpop.permute.xlu1 %2618  ;;  %2620 = vrot.lane.b32.xlu0 %v6447_v37, %s4927_s22 }
 0xe01   :  { %8021 = vst [vmem:[#allocation74_spill] sm:$0xff] %v6550_v0 }
 0xe02   :  { %v6554_v44 = vpop.permute.xlu0 %2680  ;;  %2638 = vrot.lane.b32.xlu1 %v6484_v8, %s4927_s22 }
 0xe03   :  { %8022 = vst [vmem:[#allocation75_spill] sm:$0xff] %v6554_v44 }
 0xe04   :  { %v6558_v26 = vpop.permute.xlu1 %2698  ;;  %2700 = vrot.lane.b32.xlu0 %v6469_v45, %s4928_s23 }
 0xe05   :  { %8023 = vst [vmem:[#allocation76_spill] sm:$0xff] %v6558_v26 }
 0xe06   :  { %v6562_v33 = vpop.permute.xlu0 %2760  ;;  %2622 = vrot.lane.b32.xlu1 %v6462_v38, %s4927_s22 }
 0xe07   :  { %8024 = vst [vmem:[#allocation77_spill] sm:$0xff] %v6562_v33 }
 0xe08   :  { %v6566_v53 = vpop.permute.xlu1 %2682  ;;  %2684 = vrot.lane.b32.xlu0 %v6447_v37, %s4928_s23 }
 0xe09   :  { %8025 = vst [vmem:[#allocation78_spill] sm:$0xff] %v6566_v53 }
 0xe0a   :  { %v6573_v20 = vpop.permute.xlu0 %2744  ;;  %2702 = vrot.lane.b32.xlu1 %v6484_v8, %s4928_s23 }
 0xe0b   :  { %8027 = vst [vmem:[#allocation80_spill] sm:$0xff] %v6573_v20 }
 0xe0c   :  { %v6577_v11 = vpop.permute.xlu1 %2762  ;;  %2308 = vrot.lane.b32.xlu0 %v6571_v50, %s4923_s18 }
 0xe0d   :  { %8028 = vst [vmem:[#allocation81_spill] sm:$0xff] %v6577_v11 }
 0xe0e   :  { %v2305_v42 = vpop.permute.xlu0 %2304  ;;  %2686 = vrot.lane.b32.xlu1 %v6462_v38, %s4928_s23 }
 0xe0f   :  { %v2336_v29 = vsel %vm744_vm2, %v6440_v41, %v2305_v42 }
 0xe10   :  { %v6589_v47 = vpop.permute.xlu1 %2746  ;;  %2324 = vrot.lane.b32.xlu0 %v6582_v5, %s4923_s18  ;;  %v2345_v49 = vmul.f32 %v5186_v46, %v2336_v29  ;;  %v2332_v29 = vsel %vm744_vm2, %v2305_v42, %v6457_v1 }
 0xe11   :  { %8031 = vst [vmem:[#allocation84_spill] sm:$0xff] %v6589_v47 }
 0xe12   :  { %v2321_v24 = vpop.permute.xlu0 %2320  ;;  %2310 = vrot.lane.b32.xlu1 %v6587_v61, %s4923_s18 }
 0xe13   :  { %v2340_v17 = vsel %vm744_vm2, %v2321_v24, %v6440_v41  ;;  %v2328_v47 = vsel %vm744_vm2, %v6457_v1, %v2321_v24 }
 0xe14   :  { %v2307_v62 = vpop.permute.xlu1 %2306  ;;  %2388 = vrot.lane.b32.xlu0 %v6582_v5, %s4922_s17  ;;  %v2347_v53 = vmul.f32 %v5268_v15, %v2328_v47 }
 0xe15   :  { %v2337_v25 = vsel %vm744_vm2, %v6453_v51, %v2307_v62  ;;  %v2333_v43 = vsel %vm744_vm2, %v2307_v62, %v6475_v21 }
 0xe16   :  { %v2349_v12 = vmul.f32 %v5186_v46, %v2337_v25  ;;  %v6614_v20 = vpop.permute.xlu0 %2384  ;;  %2326 = vrot.lane.b32.xlu1 %v6599_v3, %s4923_s18  ;;  %v2344_v25 = vmul.f32 %v5353_v52, %v2340_v17  ;;  %v2350_v11 = vmul.f32 %v5326_v27, %v2333_v43  ;;  %v2346_v43 = vmul.f32 %v5326_v27, %v2332_v29 }
 0xe18   :  { %v2323_v41 = vpop.permute.xlu1 %2322  ;;  %2372 = vrot.lane.b32.xlu0 %v6571_v50, %s4922_s17  ;;  %v4608_v62 = vpack.c.bf16 %v2349_v12, %v2345_v49  ;;  %v4682_v47 = vpack.c.bf16 %v2350_v11, %v2346_v43 }
 0xe19   :  { %v2329_v33 = vsel %vm744_vm2, %v6475_v21, %v2323_v41  ;;  %v2341_v24 = vsel %vm744_vm2, %v2323_v41, %v6453_v51 }
 0xe1a   :  { %v2348_v1 = vmul.f32 %v5353_v52, %v2341_v24  ;;  %v2351_v42 = vmul.f32 %v5268_v15, %v2329_v33  ;;  %v6637_v44 = vpop.permute.xlu0 %2368  ;;  %4609 = vmatprep.subr.bf16.mxu1 %v4608_v62  ;;  %2390 = vrot.lane.b32.xlu1 %v6599_v3, %s4922_s17 }
 0xe1c   :  { %v4610_v17 = vpack.c.bf16 %v2348_v1, %v2344_v25  ;;  %v6642_v21 = vpop.permute.xlu1 %2386  ;;  %2436 = vrot.lane.b32.xlu0 %v6571_v50, %s4924_s19  ;;  %v4680_v51 = vpack.c.bf16 %v2351_v42, %v2347_v53 }
 0xe1e   :  { %v6646_v49 = vpop.permute.xlu0 %2432  ;;  %4611 = vmatpush1.bf16.msra.mxu1 %v4610_v17  ;;  %4681 = vmatprep.subr.bf16.mxu0 %v4680_v51 }
 0xe1f   :  { %2374 = vrot.lane.b32.xlu1 %v6587_v61, %s4922_s17  ;;  %4683 = vmatpush1.bf16.msra.mxu0 %v4682_v47 }
 0xe20   :  { %v6650_v33 = vpop.permute.xlu1 %2370  ;;  %2452 = vrot.lane.b32.xlu0 %v6582_v5, %s4924_s19 }
 0xe22   :  { %v6654_v12 = vpop.permute.xlu0 %2448 }
 0xe23   :  { %2438 = vrot.lane.b32.xlu1 %v6587_v61, %s4924_s19 }
 0xe24   :  { %v6658_v53 = vpop.permute.xlu1 %2434  ;;  %2500 = vrot.lane.b32.xlu0 %v6571_v50, %s4925_s20 }
 0xe26   :  { %v6662_v11 = vpop.permute.xlu0 %2496 }
 0xe27   :  { %2454 = vrot.lane.b32.xlu1 %v6599_v3, %s4924_s19 }
 0xe28   :  { %v6666_v29 = vpop.permute.xlu1 %2450  ;;  %2516 = vrot.lane.b32.xlu0 %v6582_v5, %s4925_s20 }
 0xe2a   :  { %v6670_v41 = vpop.permute.xlu0 %2512 }
 0xe2b   :  { %2502 = vrot.lane.b32.xlu1 %v6587_v61, %s4925_s20 }
 0xe2c   :  { %v6674_v62 = vpop.permute.xlu1 %2498  ;;  %2764 = vrot.lane.b32.xlu0 %v6469_v45, %s4929_s24 }
 0xe2e   :  { %v6678_v25 = vpop.permute.xlu0 %2560 }
 0xe2f   :  { %8033 = vst [vmem:[#allocation86_spill] sm:$0xff] %v6678_v25  ;;  %2518 = vrot.lane.b32.xlu1 %v6599_v3, %s4925_s20 }
 0xe30   :  { %v6682_v24 = vpop.permute.xlu1 %2514  ;;  %2564 = vrot.lane.b32.xlu0 %v6571_v50, %s4926_s21 }
 0xe32   :  { %v6686_v1 = vpop.permute.xlu0 %2624 }
 0xe33   :  { %8034 = vst [vmem:[#allocation87_spill] sm:$0xff] %v6686_v1  ;;  %2766 = vrot.lane.b32.xlu1 %v6484_v8, %s4929_s24 }
 0xe34   :  { %v6690_v42 = vpop.permute.xlu1 %2562  ;;  %2628 = vrot.lane.b32.xlu0 %v6571_v50, %s4927_s22 }
 0xe35   :  { %8035 = vst [vmem:[#allocation88_spill] sm:$0xff] %v6690_v42 }
 0xe36   :  { %v6694_v43 = vpop.permute.xlu0 %2576 }
 0xe37   :  { %8036 = vst [vmem:[#allocation89_spill] sm:$0xff] %v6694_v43  ;;  %2750 = vrot.lane.b32.xlu1 %v6462_v38, %s4929_s24 }
 0xe38   :  { %v6698_v17 = vpop.permute.xlu1 %2626  ;;  %2580 = vrot.lane.b32.xlu0 %v6582_v5, %s4926_s21 }
 0xe39   :  { %8037 = vst [vmem:[#allocation90_spill] sm:$0xff] %v6698_v17 }
 0xe3a   :  { %v6702_v51 = vpop.permute.xlu0 %2688 }
 0xe3b   :  { %8038 = vst [vmem:[#allocation91_spill] sm:$0xff] %v6702_v51  ;;  %2706 = vrot.lane.b32.xlu1 %v6396_v40, %s4928_s23 }
 0xe3c   :  { %v6706_v47 = vpop.permute.xlu1 %2578  ;;  %2692 = vrot.lane.b32.xlu0 %v6571_v50, %s4928_s23 }
 0xe3d   :  { %8039 = vst [vmem:[#allocation92_spill] sm:$0xff] %v6706_v47 }
 0xe3e   :  { %v6710_v26 = vpop.permute.xlu0 %2640 }
 0xe3f   :  { %8040 = vst [vmem:[#allocation93_spill] sm:$0xff] %v6710_v26  ;;  %2566 = vrot.lane.b32.xlu1 %v6587_v61, %s4926_s21 }
 0xe40   :  { %v6714_v6 = vpop.permute.xlu1 %2690  ;;  %2644 = vrot.lane.b32.xlu0 %v6582_v5, %s4927_s22 }
 0xe41   :  { %8041 = vst [vmem:[#allocation94_spill] sm:$0xff] %v6714_v6 }
 0xe42   :  { %v6718_v56 = vpop.permute.xlu0 %2752 }
 0xe43   :  { %8042 = vst [vmem:[#allocation95_spill] sm:$0xff] %v6718_v56  ;;  %2770 = vrot.lane.b32.xlu1 %v6396_v40, %s4929_s24  ;;  %v2809_v56 = vld [vmem:[%s7751_s3 + $0xc8] sm:$0xff]  ;;  %v2464_v40 = vsel %vm8063_vm15, %v6471_v31, %v6646_v49  ;;  %vm8078_vm15 = vmmov %vm8064_vm0 }
 0xe44   :  { %v6722_v51 = vpop.permute.xlu1 %2642  ;;  %2756 = vrot.lane.b32.xlu0 %v6571_v50, %s4929_s24  ;;  %2878 = vmatprep.mubr.f32.mxu1 %v2809_v56 }
 0xe45   :  { %8043 = vst [vmem:[#allocation96_spill] sm:$0xff] %v6722_v51  ;;  %3020 = vmatprep.mubr.f32.mxu0 %v2809_v56 }
 0xe46   :  { %v6726_v1 = vpop.permute.xlu0 %2300 }
 0xe47   :  { %2630 = vrot.lane.b32.xlu1 %v6587_v61, %s4927_s22 }
 0xe48   :  { %v6730_v26 = vpop.permute.xlu1 %2754  ;;  %2748 = vrot.lane.b32.xlu0 %v6447_v37, %s4929_s24 }
 0xe49   :  { %8044 = vst [vmem:[#allocation97_spill] sm:$0xff] %v6730_v26 }
 0xe4a   :  { %v6737_v6 = vpop.permute.xlu0 %2364 }
 0xe4b   :  { %2582 = vrot.lane.b32.xlu1 %v6599_v3, %s4926_s21 }
 0xe4c   :  { %2704 = vrot.lane.b32.xlu0 %v6386_v63, %s4928_s23  ;;  %v6743_v51 = vpop.permute.xlu1 %2302 }
 0xe4e   :  { %v2317_v26 = vpop.permute.xlu0 %2316 }
 0xe4f   :  { %2694 = vrot.lane.b32.xlu1 %v6587_v61, %s4928_s23 }
 0xe50   :  { %2768 = vrot.lane.b32.xlu0 %v6386_v63, %s4929_s24  ;;  %v6749_v32 = vpop.permute.xlu1 %2366 }
 0xe52   :  { %v6751_v34 = vpop.permute.xlu0 %2428 }
 0xe53   :  { %2646 = vrot.lane.b32.xlu1 %v6599_v3, %s4927_s22 }
 0xe54   :  { %2708 = vrot.lane.b32.xlu0 %v6582_v5, %s4928_s23  ;;  %v2319_v56 = vpop.permute.xlu1 %2318 }
 0xe56   :  { %v6757_v8 = vpop.permute.xlu0 %2492 }
 0xe57   :  { %2758 = vrot.lane.b32.xlu1 %v6587_v61, %s4929_s24 }
 0xe58   :  { %2772 = vrot.lane.b32.xlu0 %v6582_v5, %s4929_s24  ;;  %v6763_v45 = vpop.permute.xlu1 %2430 }
 0xe5a   :  { %v6765_v0 = vpop.permute.xlu0 %2380 }
 0xe5b   :  { %2710 = vrot.lane.b32.xlu1 %v6599_v3, %s4928_s23 }
 0xe5c   :  { %v6769_v17 = vpop.permute.xlu1 %2494 }
 0xe5e   :  { %v6771_v38 = vpop.permute.xlu0 %2444 }
 0xe5f   :  { %2774 = vrot.lane.b32.xlu1 %v6599_v3, %s4929_s24 }
 0xe60   :  { %v6775_v37 = vpop.permute.xlu1 %2382 }
 0xe62   :  { %v6777_v59 = vpop.permute.xlu0 %2508 }
 0xe64   :  { %v6779_v30 = vpop.permute.xlu1 %2446 }
 0xe66   :  { %v6781_v5 = vpop.permute.xlu0 %2572 }
 0xe67   :  { %8045 = vst [vmem:[#allocation98_spill] sm:$0xff] %v6781_v5 }
 0xe68   :  { %v6783_v54 = vpop.permute.xlu1 %2510 }
 0xe6a   :  { %v6785_v9 = vpop.permute.xlu0 %2556 }
 0xe6b   :  { %8046 = vst [vmem:[#allocation99_spill] sm:$0xff] %v6785_v9 }
 0xe6c   :  { %v6787_v61 = vpop.permute.xlu1 %2574 }
 0xe6d   :  { %8047 = vst [vmem:[#allocation100_spill] sm:$0xff] %v6787_v61 }
 0xe6e   :  { %v6789_v50 = vpop.permute.xlu0 %2636 }
 0xe6f   :  { %8048 = vst [vmem:[#allocation101_spill] sm:$0xff] %v6789_v50  ;;  %v2405_v50 = vsel %vm8056_vm4, %v6642_v21, %v6464_v4  ;;  %vm8070_vm4 = vmmov %vm8069_vm3 }
 0xe70   :  { %v6791_v43 = vpop.permute.xlu1 %2558 }
 0xe71   :  { %8049 = vst [vmem:[#allocation102_spill] sm:$0xff] %v6791_v43 }
 0xe72   :  { %v6793_v60 = vpop.permute.xlu0 %2620 }
 0xe73   :  { %8050 = vst [vmem:[#allocation103_spill] sm:$0xff] %v6793_v60  ;;  %v2392_v60 = vsel %vm8061_vm13, %v6490_v48, %v6614_v20  ;;  %vm8075_vm13 = vmmov %vm8069_vm3 }
 0xe74   :  { %v6795_v3 = vpop.permute.xlu1 %2638 }
 0xe75   :  { %8051 = vst [vmem:[#allocation104_spill] sm:$0xff] %v6795_v3  ;;  %v2404_v3 = vsel %vm8058_vm6, %v6614_v20, %v6449_v58  ;;  %vm8071_vm6 = vmmov %vm8069_vm3 }
 0xe76   :  { %v6797_v25 = vpop.permute.xlu0 %2700  ;;  %v6836_v43 = vmul.f32 %v5363_v55, %v2404_v3 }
 0xe77   :  { %8052 = vst [vmem:[#allocation105_spill] sm:$0xff] %v6797_v25 }
 0xe78   :  { %v6799_v16 = vpop.permute.xlu1 %2622 }
 0xe79   :  { %8053 = vst [vmem:[#allocation106_spill] sm:$0xff] %v6799_v16  ;;  %v6826_v16 = vmul.f32 %v5363_v55, %v2405_v50 }
 0xe7a   :  { %v6801_v47 = vpop.permute.xlu0 %2684 }
 0xe7b   :  { %8054 = vst [vmem:[#allocation107_spill] sm:$0xff] %v6801_v47  ;;  %v2396_v47 = vsel %vm8059_vm11, %v6637_v44, %v6490_v48  ;;  %v4618_v42 = vpack.c.bf16 %v6826_v16, %v6836_v43  ;;  %v2401_v16 = vsel %vm8067_vm8, %v6464_v4, %v6650_v33  ;;  %vm8072_vm11 = vmmov %vm8069_vm3 }
 0xe7c   :  { %v6803_v5 = vpop.permute.xlu1 %2702  ;;  %v6843_v50 = vmul.f32 %v5291_v19, %v2396_v47 }
 0xe7d   :  { %8055 = vst [vmem:[#allocation108_spill] sm:$0xff] %v6803_v5  ;;  %v6823_v5 = vsel %vm8060_vm12, %v6502_v35, %v6642_v21  ;;  %v2400_v21 = vsel %vm8062_vm14, %v6449_v58, %v6637_v44  ;;  %v2397_v58 = vsel %vm8064_vm0, %v6650_v33, %v6502_v35  ;;  %vm8073_vm12 = vmmov %vm8064_vm0 }
 0xe7e   :  { %v2309_v28 = vpop.permute.xlu0 %2308  ;;  %v4688_v20 = vpack.c.bf16 %v6823_v5, %v2392_v60  ;;  %v2460_v60 = vsel %vm8065_vm5, %v6646_v49, %v6498_v23  ;;  %v2414_v22 = vmul.f32 %v5291_v19, %v2397_v58  ;;  %v8068_v58 = vld [vmem:[#allocation16_spill] sm:$0xff]  ;;  %vm8076_vm14 = vmmov %vm8064_vm0  ;;  %vm8079_vm0 = vcmp.lt.s32.totalorder %v4969_v2, 1 }
 0xe7f   :  { %v2334_v43 = vsel %vm744_vm2, %v2309_v28, %v2317_v26  ;;  %vm8080_vm5 = vmmov %vm8067_vm8 }
 0xe80   :  { %v6809_v61 = vpop.permute.xlu1 %2686  ;;  %vm8081_vm8 = vmmov %vm8069_vm3 }
 0xe81   :  { %8057 = vst [vmem:[#allocation109_spill] sm:$0xff] %v6809_v61  ;;  %v2338_v61 = vsel %vm744_vm2, %v6726_v1, %v2309_v28 }
 0xe82   :  { %v2325_v25 = vpop.permute.xlu0 %2324  ;;  %v2353_v44 = vmul.f32 %v5186_v46, %v2338_v61  ;;  %v8066_v61 = vld [vmem:[#allocation8_spill] sm:$0xff] }
 0xe83   :  { %v2330_v5 = vsel %vm744_vm2, %v2317_v26, %v2325_v25  ;;  %v2342_v35 = vsel %vm744_vm2, %v2325_v25, %v6726_v1 }
 0xe84   :  { %v2311_v9 = vpop.permute.xlu1 %2310  ;;  %v2352_v1 = vmul.f32 %v5353_v52, %v2342_v35  ;;  %v2355_v4 = vmul.f32 %v5268_v15, %v2330_v5  ;;  %v2465_v5 = vsel %vm8071_vm6, %v6486_v39, %v6658_v53 }
 0xe85   :  { %v2339_v48 = vsel %vm744_vm2, %v6743_v51, %v2311_v9  ;;  %v2335_v3 = vsel %vm744_vm2, %v2311_v9, %v2319_v56  ;;  %v6873_v9 = vmul.f32 %v8066_v61, %v2464_v40 }
 0xe86   :  { %v2357_v47 = vmul.f32 %v5186_v46, %v2339_v48  ;;  %v2389_v63 = vpop.permute.xlu0 %2388  ;;  %v2358_v57 = vmul.f32 %v5326_v27, %v2335_v3  ;;  %v4616_v3 = vpack.c.bf16 %v2401_v16, %v2400_v21 }
 0xe88   :  { %v2327_v48 = vpop.permute.xlu1 %2326  ;;  %v4612_v49 = vpack.c.bf16 %v2357_v47, %v2353_v44  ;;  %v6893_v44 = vmul.f32 %v8068_v58, %v2460_v60  ;;  %v2456_v47 = vsel %vm8070_vm4, %v6498_v23, %v6654_v12 }
 0xe89   :  { %v2331_v25 = vsel %vm744_vm2, %v2319_v56, %v2327_v48  ;;  %v2343_v40 = vsel %vm744_vm2, %v2327_v48, %v6743_v51  ;;  %v2468_v56 = vsel %vm8069_vm3, %v6654_v12, %v6471_v31  ;;  %v2354_v51 = vmul.f32 %v5326_v27, %v2334_v43  ;;  %v8074_v12 = vld [vmem:[#allocation22_spill] sm:$0xff]  ;;  %vm8082_vm3 = vmmov %vm8080_vm5 }
 0xe8a   :  { %v2356_v33 = vmul.f32 %v5353_v52, %v2343_v40  ;;  %v2359_v28 = vmul.f32 %v5268_v15, %v2331_v25  ;;  %v2373_v26 = vpop.permute.xlu0 %2372  ;;  %4613 = vmatprep.subr.bf16.mxu1 %v4612_v49  ;;  %v4690_v49 = vpack.c.bf16 %v2414_v22, %v6843_v50  ;;  %v2461_v31 = vsel %vm8072_vm11, %v6658_v53, %v6510_v36  ;;  %vm8083_vm4 = vmmov %vm8082_vm3 }
 0xe8b   :  { %v4686_v21 = vpack.c.bf16 %v2358_v57, %v2354_v51  ;;  %v6917_v16 = vmul.f32 %v8074_v12, %v2468_v56  ;;  %v2457_v43 = vsel %vm8075_vm13, %v6510_v36, %v6666_v29  ;;  %v2406_v22 = vsel %vm8076_vm14, %v2389_v63, %v6737_v6  ;;  %v8077_v57 = vld [vmem:[#allocation10_spill] sm:$0xff]  ;;  %vm8084_vm6 = vmmov %vm8082_vm3 }
 0xe8c   :  { %v4614_v60 = vpack.c.bf16 %v2356_v33, %v2352_v1  ;;  %v2391_v35 = vpop.permute.xlu1 %2390  ;;  %v4684_v48 = vpack.c.bf16 %v2359_v28, %v2355_v4  ;;  %v2475_v53 = vmul.f32 %v8077_v57, %v2456_v47  ;;  %v2477_v25 = vmul.f32 %v8066_v61, %v2465_v5  ;;  %vm8085_vm11 = vmmov %vm8082_vm3 }
 0xe8d   :  { %v2407_v23 = vsel %vm8073_vm12, %v2391_v35, %v6749_v32  ;;  %v2395_v40 = vsel %vm8078_vm15, %v6775_v37, %v2391_v35  ;;  %v6932_v1 = vmul.f32 %v8068_v58, %v2461_v31  ;;  %v2528_v36 = vsel %vm8079_vm0, %v6479_v14, %v6662_v11  ;;  %vm8086_vm12 = vmmov %vm8079_vm0 }
 0xe8e   :  { %v2437_v50 = vpop.permute.xlu0 %2436  ;;  %4615 = vmatpush1.bf16.msra.mxu1 %v4614_v60  ;;  %4685 = vmatprep.subr.bf16.mxu0 %v4684_v48  ;;  %v2398_v4 = vsel %vm8080_vm5, %v2373_v26, %v6765_v0  ;;  %v2420_v33 = vmul.f32 %v5363_v55, %v2407_v23  ;;  %v2469_v28 = vsel %vm8081_vm8, %v6666_v29, %v6486_v39  ;;  %vm8087_vm13 = vmmov %vm8081_vm8 }
 0xe8f   :  { %4617 = vmatprep.subr.bf16.mxu1 %v4616_v3  ;;  %4687 = vmatpush1.bf16.msra.mxu0 %v4686_v21  ;;  %v2479_v56 = vmul.f32 %v8077_v57, %v2457_v43  ;;  %v2394_v51 = vsel %vm8082_vm3, %v6765_v0, %v2389_v63  ;;  %v2416_v3 = vmul.f32 %v5363_v55, %v2406_v22  ;;  %vm8088_vm14 = vmmov %vm8079_vm0  ;;  %v8184_v55 = vld [vmem:[#allocation49_spill] sm:$0xff] }
 0xe90   :  { %4689 = vmatprep.subr.bf16.mxu0 %v4688_v20  ;;  %v2402_v5 = vsel %vm8083_vm4, %v6737_v6, %v2373_v26  ;;  %v4692_v60 = vpack.c.bf16 %v2395_v40, %v2394_v51  ;;  %v6964_v63 = vsel %vm8086_vm12, %v6662_v11, %v6506_v18  ;;  %v2418_v0 = vmul.f32 %v5291_v19, %v2398_v4  ;;  %vm8089_vm15 = vmmov %vm8079_vm0 }
 0xe91   :  { %v2375_v47 = vpop.permute.xlu1 %2374  ;;  %v2476_v35 = vmul.f32 %v8074_v12, %v2469_v28  ;;  %v6975_v11 = vmul.f32 %v5186_v46, %v2528_v36  ;;  %v2520_v48 = vsel %vm8088_vm14, %v6506_v18, %v6670_v41  ;;  %v2532_v21 = vsel %vm8089_vm15, %v6670_v41, %v6479_v14  ;;  %vm8090_vm5 = vmmov %vm8081_vm8 }
 0xe92   :  { %v2399_v20 = vsel %vm8084_vm6, %v2375_v47, %v6775_v37  ;;  %v2403_v39 = vsel %vm8085_vm11, %v6749_v32, %v2375_v47  ;;  %v2453_v29 = vpop.permute.xlu0 %2452  ;;  %4619 = vmatpush1.bf16.msra.mxu1 %v4618_v42  ;;  %v4698_v37 = vpack.c.bf16 %v6932_v1, %v6893_v44  ;;  %v4622_v32 = vpack.c.bf16 %v2420_v33, %v2416_v3  ;;  %vm8091_vm8 = vmmov %vm8079_vm0  ;;  %v8100_v47 = vld [vmem:[#allocation19_spill] sm:$0xff] }
 0xe93   :  { %v2422_v6 = vmul.f32 %v5291_v19, %v2399_v20  ;;  %v4620_v26 = vpack.c.bf16 %v2403_v39, %v2402_v5  ;;  %4691 = vmatpush1.bf16.msra.mxu0 %v4690_v49  ;;  %v2466_v42 = vsel %vm8087_vm13, %v6751_v34, %v2437_v50  ;;  %v4624_v44 = vpack.c.bf16 %v2477_v25, %v6873_v9  ;;  %vm8092_vm3 = vmmov %vm8090_vm5  ;;  %v8101_v20 = vld [vmem:[#allocation11_spill] sm:$0xff] }
 0xe94   :  { %4693 = vmatprep.subr.bf16.mxu0 %v4692_v60  ;;  %v2529_v23 = vsel %vm8079_vm0, %v6494_v7, %v6674_v62  ;;  %v4696_v22 = vpack.c.bf16 %v2479_v56, %v2475_v53  ;;  %v2521_v9 = vsel %vm8091_vm8, %v6518_v13, %v6682_v24  ;;  %v2481_v25 = vmul.f32 %v8066_v61, %v2466_v42  ;;  %vm8093_vm4 = vmmov %vm8079_vm0 }
 0xe95   :  { %v4694_v49 = vpack.c.bf16 %v2422_v6, %v2418_v0  ;;  %4621 = vmatprep.subr.bf16.mxu1 %v4620_v26  ;;  %v2439_v31 = vpop.permute.xlu1 %2438  ;;  %v4626_v40 = vpack.c.bf16 %v2476_v35, %v6917_v16  ;;  %v2525_v53 = vsel %vm8093_vm4, %v6674_v62, %v6518_v13  ;;  %vm8094_vm6 = vmmov %vm8092_vm3  ;;  %v2541_v4 = vmul.f32 %v5186_v46, %v2529_v23 }
 0xe96   :  { %v2467_v43 = vsel %vm8090_vm5, %v6763_v45, %v2439_v31  ;;  %v2501_v18 = vpop.permute.xlu0 %2500  ;;  %4623 = vmatpush1.bf16.msra.mxu1 %v4622_v32  ;;  %v2463_v14 = vsel %vm8092_vm3, %v2439_v31, %v6779_v30  ;;  %v2458_v1 = vsel %vm8094_vm6, %v6771_v38, %v2453_v29  ;;  %vm8095_vm11 = vmmov %vm8092_vm3  ;;  %v2543_v28 = vmul.f32 %v5268_v15, %v2521_v9 }
 0xe97   :  { %v2485_v41 = vmul.f32 %v8066_v61, %v2467_v43  ;;  %4625 = vmatprep.subr.bf16.mxu1 %v4624_v44  ;;  %v2470_v36 = vsel %vm8095_vm11, %v2453_v29, %v6751_v34  ;;  %4695 = vmatpush1.bf16.msra.mxu0 %v4694_v49  ;;  %vm8096_vm12 = vmmov %vm8079_vm0  ;;  %v2486_v56 = vmul.f32 %v8068_v58, %v2463_v14 }
 0xe98   :  { %v2533_v16 = vsel %vm8096_vm12, %v6682_v24, %v6494_v7  ;;  %vm8097_vm13 = vmmov %vm8092_vm3  ;;  %4697 = vmatprep.subr.bf16.mxu0 %v4696_v22  ;;  %v2480_v24 = vmul.f32 %v8074_v12, %v2470_v36  ;;  %v2536_v5 = vmul.f32 %v8100_v47, %v2532_v21  ;;  %v2539_v60 = vmul.f32 %v5268_v15, %v2520_v48 }
 0xe99   :  { %v2462_v13 = vsel %vm8097_vm13, %v2437_v50, %v6771_v38  ;;  %v2455_v62 = vpop.permute.xlu1 %2454  ;;  %v4628_v33 = vpack.c.bf16 %v2485_v41, %v2481_v25  ;;  %vm8098_vm14 = vmmov %vm8092_vm3  ;;  %v2483_v38 = vmul.f32 %v8077_v57, %v2458_v1  ;;  %v2542_v39 = vmul.f32 %v8101_v20, %v2525_v53 }
 0xe9a   :  { %v2459_v34 = vsel %vm8098_vm14, %v6779_v30, %v2455_v62  ;;  %vm8099_vm15 = vmmov %vm8092_vm3  ;;  %v2517_v7 = vpop.permute.xlu0 %2516  ;;  %4627 = vmatpush1.bf16.msra.mxu1 %v4626_v40  ;;  %v2482_v30 = vmul.f32 %v8068_v58, %v2462_v13  ;;  %v2540_v29 = vmul.f32 %v8100_v47, %v2533_v16  ;;  %v4632_v48 = vpack.c.bf16 %v2541_v4, %v6975_v11 }
 0xe9b   :  { %v2471_v51 = vsel %vm8099_vm15, %v2455_v62, %v6763_v45  ;;  %v2487_v3 = vmul.f32 %v8077_v57, %v2459_v34  ;;  %4629 = vmatprep.subr.bf16.mxu1 %v4628_v33  ;;  %v2530_v45 = vsel %vm8079_vm0, %v6757_v8, %v2501_v18  ;;  %4699 = vmatpush1.bf16.msra.mxu0 %v4698_v37  ;;  %vm8102_vm5 = vmmov %vm8079_vm0  ;;  %v8109_v62 = vld [vmem:[#allocation60_spill] sm:$0xff]  ;;  %vm8112_vm13 = vcmp.lt.s32.totalorder %v4969_v2, 127 }
 0xe9c   :  { %v2484_v50 = vmul.f32 %v8074_v12, %v2471_v51  ;;  %v4702_v35 = vpack.c.bf16 %v2486_v56, %v2482_v30  ;;  %v4704_v49 = vpack.c.bf16 %v2543_v28, %v2539_v60  ;;  %v2545_v31 = vmul.f32 %v5186_v46, %v2530_v45  ;;  %vm8103_vm8 = vmmov %vm8079_vm0  ;;  %v8110_v28 = vld [vmem:[#allocation68_spill] sm:$0xff]  ;;  %v8113_v51 = vld [vmem:[#allocation59_spill] sm:$0xff] }
 0xe9d   :  { %v2503_v6 = vpop.permute.xlu1 %2502  ;;  %v4700_v26 = vpack.c.bf16 %v2487_v3, %v2483_v38  ;;  %v2538_v21 = vmul.f32 %v8101_v20, %v6964_v63  ;;  %vm8104_vm3 = vmmov %vm8079_vm0  ;;  %v4634_v43 = vpack.c.bf16 %v2540_v29, %v2536_v5  ;;  %v4640_v33 = vpack.c.bf16 %v8109_v62, %v6380_v10  ;;  %v8111_v56 = vld [vmem:[#allocation88_spill] sm:$0xff]  ;;  %v8115_v38 = vld [vmem:[#allocation70_spill] sm:$0xff] }
 0xe9e   :  { %v4630_v0 = vpack.c.bf16 %v2484_v50, %v2480_v24  ;;  %v2531_v32 = vsel %vm8102_vm5, %v6769_v17, %v2503_v6  ;;  %v7044_v42 = vpop.permute.xlu0 %2764  ;;  %v2527_v37 = vsel %vm8103_vm8, %v2503_v6, %v6783_v54  ;;  %v2522_v23 = vsel %vm8104_vm3, %v6777_v59, %v2517_v7  ;;  %vm8105_vm4 = vmmov %vm8079_vm0  ;;  %v8116_v50 = vld [vmem:[#allocation92_spill] sm:$0xff]  ;;  %v8118_v5 = vld [vmem:[#allocation66_spill] sm:$0xff] }
 0xe9f   :  { %v2549_v44 = vmul.f32 %v5186_v46, %v2531_v32  ;;  %4701 = vmatprep.subr.bf16.mxu0 %v4700_v26  ;;  %v2534_v11 = vsel %vm8105_vm4, %v2517_v7, %v6757_v8  ;;  %vm8106_vm6 = vmmov %vm8079_vm0  ;;  %v4706_v14 = vpack.c.bf16 %v2542_v39, %v2538_v21  ;;  %v2550_v63 = vmul.f32 %v8101_v20, %v2527_v37  ;;  %v8114_v7 = vld [vmem:[#allocation61_spill] sm:$0xff]  ;;  %v8119_v60 = vld [vmem:[#allocation86_spill] sm:$0xff] }
 0xea0   :  { %4631 = vmatpush1.bf16.msra.mxu1 %v4630_v0  ;;  %4703 = vmatpush1.bf16.msra.mxu0 %v4702_v35  ;;  %v2526_v22 = vsel %vm8106_vm6, %v2501_v18, %v6777_v59  ;;  %vm8107_vm11 = vmmov %vm8079_vm0  ;;  %v2544_v53 = vmul.f32 %v8100_v47, %v2534_v11  ;;  %v2547_v1 = vmul.f32 %v5268_v15, %v2522_v23  ;;  %v8122_v29 = vld [vmem:[#allocation67_spill] sm:$0xff]  ;;  %v8123_v0 = vld [vmem:[#allocation89_spill] sm:$0xff] }
 0xea1   :  { %4633 = vmatprep.subr.bf16.mxu1 %v4632_v48  ;;  %4705 = vmatprep.subr.bf16.mxu0 %v4704_v49  ;;  %v2519_v9 = vpop.permute.xlu1 %2518  ;;  %v4636_v25 = vpack.c.bf16 %v2549_v44, %v2545_v31  ;;  %vm8108_vm12 = vmmov %vm8079_vm0  ;;  %v2546_v36 = vmul.f32 %v8101_v20, %v2526_v22  ;;  %v2589_v34 = vsel %vm8112_vm13, %v8111_v56, %v8110_v28  ;;  %v8125_v35 = vld [vmem:[#allocation79_spill] sm:$0xff]  ;;  %v8128_v37 = vld [vmem:[#allocation57_spill] sm:$0xff] }
 0xea2   :  { %v2523_v41 = vsel %vm8107_vm11, %v6783_v54, %v2519_v9  ;;  %v2535_v8 = vsel %vm8108_vm12, %v2519_v9, %v6769_v17  ;;  %v2565_v40 = vpop.permute.xlu0 %2564  ;;  %v4712_v24 = vpack.c.bf16 %v8114_v7, %v8113_v51  ;;  %vm8117_vm14 = vmmov %vm8112_vm13  ;;  %v2605_v39 = vmul.f32 %v8066_v61, %v2589_v34  ;;  %v8126_v32 = vld [vmem:[#allocation83_spill] sm:$0xff]  ;;  %v8131_v23 = vld [vmem:[#allocation82_spill] sm:$0xff] }
 0xea3   :  { %v2548_v59 = vmul.f32 %v8100_v47, %v2535_v8  ;;  %v2551_v18 = vmul.f32 %v5268_v15, %v2523_v41  ;;  %v4710_v13 = vpack.c.bf16 %v2550_v63, %v2546_v36  ;;  %v2597_v3 = vsel %vm8117_vm14, %v8116_v50, %v8115_v38  ;;  %vm8120_vm15 = vmmov %vm8112_vm13  ;;  %v8129_v44 = vld [vmem:[#allocation55_spill] sm:$0xff]  ;;  %v8132_v11 = vld [vmem:[#allocation85_spill] sm:$0xff] }
 0xea4   :  { %4635 = vmatpush1.bf16.msra.mxu1 %v4634_v43  ;;  %4707 = vmatpush1.bf16.msra.mxu0 %v4706_v14  ;;  %v2588_v10 = vsel %vm8120_vm15, %v8119_v60, %v8118_v5  ;;  %vm8121_vm0 = vmmov %vm8112_vm13  ;;  %v4644_v48 = vpack.c.bf16 %v8126_v32, %v8125_v35  ;;  %v2607_v31 = vmul.f32 %v8077_v57, %v2597_v3  ;;  %v8135_v14 = vld [vmem:[#allocation56_spill] sm:$0xff]  ;;  %v8137_v41 = vld [vmem:[#allocation13_spill] sm:$0xff]  ;;  %vm8161_vm14 = vcmp.lt.s32.totalorder %v4969_v2, 112 }
 0xea5   :  { %4637 = vmatprep.subr.bf16.mxu1 %v4636_v25  ;;  %v4638_v4 = vpack.c.bf16 %v2548_v59, %v2544_v53  ;;  %v7075_v54 = vpop.permute.xlu1 %2766  ;;  %v4708_v16 = vpack.c.bf16 %v2551_v18, %v2547_v1  ;;  %v2593_v45 = vsel %vm8121_vm0, %v8115_v38, %v8111_v56  ;;  %vm8124_vm5 = vmmov %vm8121_vm0  ;;  %v8130_v21 = vpack.c.bf16 %v8128_v37, %v8129_v44  ;;  %v8134_v25 = vld [vmem:[#allocation58_spill] sm:$0xff]  ;;  %v8140_v36 = vld [vmem:[#allocation63_spill] sm:$0xff] }
 0xea6   :  { %v7077_v17 = vpop.permute.xlu0 %2628  ;;  %v2596_v6 = vsel %vm8124_vm5, %v8123_v0, %v8122_v29  ;;  %vm8127_vm8 = vmmov %vm8121_vm0  ;;  %v4716_v43 = vpack.c.bf16 %v8132_v11, %v8131_v23  ;;  %v2601_v9 = vmul.f32 %v8066_v61, %v2588_v10  ;;  %v8136_v63 = vpack.c.bf16 %v8134_v25, %v8135_v14  ;;  %v8139_v18 = vld [vmem:[#allocation62_spill] sm:$0xff]  ;;  %v8144_v51 = vld [vmem:[#allocation64_spill] sm:$0xff] }
 0xea7   :  { %4709 = vmatprep.subr.bf16.mxu0 %v4708_v16  ;;  %v2585_v49 = vsel %vm8127_vm8, %v8110_v28, %v8116_v50  ;;  %vm8133_vm3 = vmmov %vm8121_vm0  ;;  %v2604_v8 = vmul.f32 %v8137_v41, %v2593_v45  ;;  %v2603_v1 = vmul.f32 %v8077_v57, %v2596_v6  ;;  %v8141_v16 = vld [vmem:[#allocation90_spill] sm:$0xff]  ;;  %v8145_v7 = vld [vmem:[#allocation65_spill] sm:$0xff] }
 0xea8   :  { %4639 = vmatpush1.bf16.msra.mxu1 %v4638_v4  ;;  %4711 = vmatpush1.bf16.msra.mxu0 %v4710_v13  ;;  %v2592_v22 = vsel %vm8133_vm3, %v8122_v29, %v8119_v60  ;;  %vm8138_vm4 = vmmov %vm8121_vm0  ;;  %v4646_v4 = vpack.c.bf16 %v8140_v36, %v8139_v18  ;;  %v8142_v13 = vld [vmem:[#allocation74_spill] sm:$0xff]  ;;  %v4648_v34 = vpack.c.bf16 %v2605_v39, %v2601_v9  ;;  %v8146_v50 = vld [vmem:[#allocation72_spill] sm:$0xff] }
 0xea9   :  { %4641 = vmatprep.subr.bf16.mxu1 %v4640_v33  ;;  %4713 = vmatprep.subr.bf16.mxu0 %v4712_v24  ;;  %v7095_v30 = vpop.permute.xlu1 %2750  ;;  %v2584_v53 = vsel %vm8138_vm4, %v8118_v5, %v8123_v0  ;;  %v2657_v62 = vsel %vm829_vm10, %v8142_v13, %v8141_v16  ;;  %v8143_v33 = vld [vmem:[#allocation17_spill] sm:$0xff]  ;;  %v4718_v24 = vpack.c.bf16 %v8145_v7, %v8144_v51  ;;  %v8147_v10 = vld [vmem:[#allocation98_spill] sm:$0xff]  ;;  %vm8148_vm6 = vmmov %vm8121_vm0 }
 0xeaa   :  { %v7106_v26 = vpop.permute.xlu0 %2580  ;;  %v2606_v28 = vmul.f32 %v8143_v33, %v2585_v49  ;;  %v2600_v38 = vmul.f32 %v8137_v41, %v2592_v22  ;;  %v2653_v3 = vsel %vm829_vm10, %v8141_v16, %v8146_v50  ;;  %v4720_v5 = vpack.c.bf16 %v2607_v31, %v2603_v1  ;;  %v8149_v29 = vld [vmem:[#allocation99_spill] sm:$0xff]  ;;  %vm8150_vm11 = vmmov %vm8121_vm0  ;;  %v8151_v0 = vld [vmem:[#allocation69_spill] sm:$0xff] }
 0xeab   :  { %v2602_v60 = vmul.f32 %v8143_v33, %v2584_v53  ;;  %v2590_v45 = vsel %vm8148_vm6, %v2565_v40, %v8147_v10  ;;  %v2594_v39 = vsel %vm8150_vm11, %v8149_v29, %v2565_v40  ;;  %v8152_v6 = vld [vmem:[#allocation87_spill] sm:$0xff]  ;;  %v2668_v31 = vmul.f32 %v8100_v47, %v2657_v62  ;;  %v8154_v44 = vld [vmem:[#allocation36_spill] sm:$0xff]  ;;  %vm8156_vm12 = vmmov %vm8121_vm0 }
 0xeac   :  { %4643 = vmatpush1.bf16.msra.mxu1 %v8130_v21  ;;  %4715 = vmatpush1.bf16.msra.mxu0 %v8136_v63  ;;  %v2652_v35 = vsel %vm829_vm10, %v8152_v6, %v8151_v0  ;;  %v8153_v32 = vld [vmem:[#allocation71_spill] sm:$0xff]  ;;  %v4650_v49 = vpack.c.bf16 %v2604_v8, %v2600_v38  ;;  %v2669_v21 = vmul.f32 %v8154_v44, %v2653_v3  ;;  %v8155_v23 = vld [vmem:[#allocation100_spill] sm:$0xff]  ;;  %vm8158_vm13 = vmmov %vm8121_vm0 }
 0xead   :  { %4645 = vmatprep.subr.bf16.mxu1 %v4644_v48  ;;  %4717 = vmatprep.subr.bf16.mxu0 %v4716_v43  ;;  %v7134_v59 = vpop.permute.xlu1 %2706  ;;  %v2656_v48 = vsel %vm829_vm10, %v8153_v32, %v8152_v6  ;;  %v4722_v40 = vpack.c.bf16 %v2606_v28, %v2602_v60  ;;  %v8157_v43 = vld [vmem:[#allocation102_spill] sm:$0xff]  ;;  %v2608_v25 = vmul.f32 %v8137_v41, %v2594_v39  ;;  %v8159_v18 = vld [vmem:[#allocation73_spill] sm:$0xff]  ;;  %v8160_v36 = vld [vmem:[#allocation91_spill] sm:$0xff] }
 0xeae   :  { %v7143_v56 = vpop.permute.xlu0 %2692  ;;  %v2609_v14 = vmul.f32 %v8066_v61, %v2590_v45  ;;  %v2664_v53 = vmul.f32 %v8100_v47, %v2656_v48  ;;  %v2665_v1 = vmul.f32 %v8154_v44, %v2652_v35  ;;  %v8162_v16 = vld [vmem:[#allocation93_spill] sm:$0xff]  ;;  %v8164_v51 = vld [vmem:[#allocation94_spill] sm:$0xff]  ;;  %vm8165_vm15 = vmmov %vm8161_vm14 }
 0xeaf   :  { %v2648_v62 = vsel %vm829_vm10, %v8151_v0, %v8162_v16  ;;  %v2660_v28 = vsel %vm829_vm10, %v8162_v16, %v8153_v32  ;;  %vm8167_vm0 = vmmov %vm8161_vm14  ;;  %v8168_v0 = vld [vmem:[#allocation14_spill] sm:$0xff]  ;;  %v8169_v48 = vld [vmem:[#allocation40_spill] sm:$0xff] }
 0xeb0   :  { %4647 = vmatpush1.bf16.msra.mxu1 %v4646_v4  ;;  %4719 = vmatpush1.bf16.msra.mxu0 %v4718_v24  ;;  %v2716_v4 = vsel %vm8161_vm14, %v8160_v36, %v8159_v18  ;;  %v4658_v39 = vpack.c.bf16 %v2668_v31, %v2664_v53  ;;  %v7211_v35 = vmul.f32 %v8101_v20, %v2648_v62  ;;  %vm8173_vm5 = vmmov %vm8167_vm0  ;;  %v8176_v53 = vld [vmem:[#allocation96_spill] sm:$0xff]  ;;  %v8178_v16 = vld [vmem:[#allocation97_spill] sm:$0xff] }
 0xeb1   :  { %4649 = vmatprep.subr.bf16.mxu1 %v4648_v34  ;;  %4721 = vmatprep.subr.bf16.mxu0 %v4720_v5  ;;  %v2567_v37 = vpop.permute.xlu1 %2566  ;;  %v8163_v34 = vld [vmem:[#allocation76_spill] sm:$0xff]  ;;  %v8166_v5 = vld [vmem:[#allocation75_spill] sm:$0xff]  ;;  %v2729_v6 = vmul.f32 %v8168_v0, %v2716_v4  ;;  %v4656_v32 = vpack.c.bf16 %v2669_v21, %v2665_v1  ;;  %v2649_v1 = vsel %vm829_vm10, %v8146_v50, %v8176_v53  ;;  %v8177_v4 = vld [vmem:[#allocation81_spill] sm:$0xff] }
 0xeb2   :  { %v2591_v11 = vsel %vm8156_vm12, %v2567_v37, %v8155_v23  ;;  %v2595_v22 = vsel %vm8158_vm13, %v8157_v43, %v2567_v37  ;;  %v7175_v9 = vpop.permute.xlu0 %2644  ;;  %v2717_v7 = vsel %vm8165_vm15, %v8164_v51, %v8163_v34  ;;  %v7205_v60 = vsel %vm8167_vm0, %v8166_v5, %v8160_v36  ;;  %vm8183_vm8 = vmmov %vm8133_vm3 }
 0xeb3   :  { %v2612_v63 = vmul.f32 %v8137_v41, %v2595_v22  ;;  %v2613_v8 = vmul.f32 %v8066_v61, %v2591_v11  ;;  %v2733_v37 = vmul.f32 %v8168_v0, %v2717_v7  ;;  %v8171_v22 = vld [vmem:[#allocation103_spill] sm:$0xff]  ;;  %v2781_v62 = vsel %vm863_vm1, %v8178_v16, %v8177_v4  ;;  %v8180_v7 = vld [vmem:[#allocation104_spill] sm:$0xff]  ;;  %vm8185_vm4 = vmmov %vm8133_vm3 }
 0xeb4   :  { %4651 = vmatpush1.bf16.msra.mxu1 %v4650_v49  ;;  %4723 = vmatpush1.bf16.msra.mxu0 %v4722_v40  ;;  %v7214_v49 = vmul.f32 %v8169_v48, %v2660_v28  ;;  %v8170_v40 = vld [vmem:[#allocation101_spill] sm:$0xff]  ;;  %v2658_v31 = vsel %vm829_vm10, %v8171_v22, %v7077_v17  ;;  %v8179_v28 = vld [vmem:[#allocation84_spill] sm:$0xff]  ;;  %v2797_v15 = vmul.f32 %v8184_v55, %v2781_v62  ;;  %vm8186_vm6 = vmmov %vm8133_vm3 }
 0xeb5   :  { %v4654_v24 = vpack.c.bf16 %v2612_v63, %v2608_v25  ;;  %v7199_v38 = vpop.permute.xlu1 %2770  ;;  %v4652_v3 = vpack.c.bf16 %v2613_v8, %v2609_v14  ;;  %v2654_v11 = vsel %vm829_vm10, %v7077_v17, %v8170_v40  ;;  %v8172_v25 = vld [vmem:[#allocation78_spill] sm:$0xff]  ;;  %v8174_v14 = vld [vmem:[#allocation77_spill] sm:$0xff]  ;;  %v8175_v63 = vld [vmem:[#allocation95_spill] sm:$0xff]  ;;  %v2661_v17 = vsel %vm829_vm10, %v8176_v53, %v8142_v13 }
 0xeb6   :  { %v7207_v45 = vpop.permute.xlu0 %2756  ;;  %v2721_v21 = vsel %vm8173_vm5, %v8172_v25, %v8164_v51  ;;  %v2780_v8 = vsel %vm863_vm1, %v8175_v63, %v8174_v14  ;;  %v2785_v51 = vsel %vm863_vm1, %v8179_v28, %v8178_v16  ;;  %v2673_v53 = vmul.f32 %v8154_v44, %v2654_v11  ;;  %v8182_v16 = vld [vmem:[#allocation80_spill] sm:$0xff]  ;;  %vm8188_vm11 = vmmov %vm8167_vm0 }
 0xeb7   :  { %4653 = vmatprep.subr.bf16.mxu1 %v4652_v3  ;;  %v2784_v61 = vsel %vm863_vm1, %v8182_v16, %v8175_v63  ;;  %v4664_v11 = vpack.c.bf16 %v2733_v37, %v2729_v6  ;;  %v7276_v63 = vmul.f32 %v8137_v41, %v2785_v51  ;;  %v4666_v37 = vpack.c.bf16 %v2721_v21, %v7205_v60  ;;  %vm8189_vm12 = vmmov %vm8167_vm0 }
 0xeb8   :  { %4655 = vmatpush1.bf16.msra.mxu1 %v4654_v24  ;;  %v8181_v24 = vld [vmem:[#allocation106_spill] sm:$0xff]  ;;  %vm8191_vm13 = vmmov %vm8167_vm0 }
 0xeb9   :  { %v2631_v36 = vpop.permute.xlu1 %2630  ;;  %4657 = vmatprep.subr.bf16.mxu1 %v4656_v32  ;;  %v2672_v32 = vmul.f32 %v8100_v47, %v2658_v31  ;;  %v2598_v31 = vsel %vm8133_vm3, %v7106_v26, %v8149_v29  ;;  %vm8193_vm14 = vmmov %vm8167_vm0 }
 0xeba   :  { %v2655_v50 = vsel %vm829_vm10, %v2631_v36, %v8180_v7  ;;  %v2659_v13 = vsel %vm829_vm10, %v8181_v24, %v2631_v36  ;;  %v7255_v3 = vpop.permute.xlu0 %2748  ;;  %v2586_v36 = vsel %vm8183_vm8, %v8147_v10, %v7106_v26  ;;  %vm8194_vm15 = vmmov %vm8167_vm0 }
 0xebb   :  { %v2676_v58 = vmul.f32 %v8100_v47, %v2659_v13  ;;  %v2677_v12 = vmul.f32 %v8154_v44, %v2655_v50  ;;  %v2670_v13 = vmul.f32 %v8101_v20, %v2649_v1  ;;  %v2671_v50 = vmul.f32 %v8169_v48, %v2661_v17  ;;  %v8187_v17 = vld [vmem:[#allocation105_spill] sm:$0xff]  ;;  %vm8197_vm5 = vmmov %vm8167_vm0 }
 0xebc   :  { %4659 = vmatpush1.bf16.msra.mxu1 %v4658_v39  ;;  %v2610_v39 = vmul.f32 %v8143_v33, %v2586_v36  ;;  %v7293_v1 = vmul.f32 %v8137_v41, %v2784_v61  ;;  %vm8199_vm8 = vmmov %vm8167_vm0 }
 0xebd   :  { %v4662_v44 = vpack.c.bf16 %v2676_v58, %v2672_v32  ;;  %v2583_v47 = vpop.permute.xlu1 %2582  ;;  %v4660_v19 = vpack.c.bf16 %v2677_v12, %v2673_v53  ;;  %v2611_v58 = vmul.f32 %v8077_v57, %v2598_v31  ;;  %v4728_v32 = vpack.c.bf16 %v2671_v50, %v7214_v49  ;;  %v8192_v53 = vld [vmem:[#allocation109_spill] sm:$0xff]  ;;  %v8196_v50 = vld [vmem:[#allocation107_spill] sm:$0xff]  ;;  %vm8200_vm3 = vmmov %vm8167_vm0 }
 0xebe   :  { %v2587_v10 = vsel %vm8185_vm4, %v8155_v23, %v2583_v47  ;;  %v2599_v26 = vsel %vm8186_vm6, %v2583_v47, %v8157_v43  ;;  %v7285_v29 = vpop.permute.xlu0 %2704  ;;  %v2793_v23 = vmul.f32 %v8184_v55, %v2780_v8  ;;  %v2718_v47 = vsel %vm8188_vm11, %v7143_v56, %v8187_v17  ;;  %vm8202_vm4 = vmmov %vm8167_vm0 }
 0xebf   :  { %v2614_v12 = vmul.f32 %v8143_v33, %v2587_v10  ;;  %v2615_v6 = vmul.f32 %v8077_v57, %v2599_v26  ;;  %4661 = vmatprep.subr.bf16.mxu1 %v4660_v19  ;;  %v4730_v43 = vpack.c.bf16 %v2670_v13, %v7211_v35  ;;  %v2725_v19 = vsel %vm8189_vm12, %v7134_v59, %v8172_v25  ;;  %v8195_v13 = vld [vmem:[#allocation42_spill] sm:$0xff]  ;;  %vm8203_vm6 = vmmov %vm8167_vm0 }
 0xec0   :  { %4663 = vmatpush1.bf16.msra.mxu1 %v4662_v44  ;;  %v4674_v21 = vpack.c.bf16 %v7276_v63, %v7293_v1  ;;  %v2650_v8 = vsel %vm829_vm10, %v8170_v40, %v7175_v9  ;;  %v8190_v44 = vld [vmem:[#allocation108_spill] sm:$0xff]  ;;  %v2737_v25 = vmul.f32 %v8168_v0, %v2718_v47  ;;  %v7324_v40 = vsel %vm8194_vm15, %v8163_v34, %v7134_v59  ;;  %vm8204_vm11 = vmmov %vm8167_vm0 }
 0xec1   :  { %v4726_v62 = vpack.c.bf16 %v2614_v12, %v2610_v39  ;;  %v2695_v60 = vpop.permute.xlu1 %2694  ;;  %4665 = vmatprep.subr.bf16.mxu1 %v4664_v11  ;;  %v4724_v61 = vpack.c.bf16 %v2615_v6, %v2611_v58  ;;  %v4672_v11 = vpack.c.bf16 %v2797_v15, %v2793_v23  ;;  %v2735_v63 = vmul.f32 %v8195_v13, %v2725_v19 }
 0xec2   :  { %v2719_v35 = vsel %vm8191_vm13, %v2695_v60, %v8190_v44  ;;  %v2769_v51 = vpop.permute.xlu0 %2768  ;;  %v2723_v36 = vsel %vm8193_vm14, %v8192_v53, %v2695_v60  ;;  %v2662_v49 = vsel %vm829_vm10, %v7175_v9, %v8171_v22  ;;  %v2722_v15 = vsel %vm8167_vm0, %v8196_v50, %v7143_v56 }
 0xec3   :  { %v2741_v31 = vmul.f32 %v8168_v0, %v2719_v35  ;;  %4725 = vmatprep.subr.bf16.mxu0 %v4724_v61  ;;  %v2674_v10 = vmul.f32 %v8101_v20, %v2650_v8  ;;  %v2724_v59 = vsel %vm8197_vm5, %v7285_v29, %v8166_v5  ;;  %v2782_v9 = vsel %vm863_vm1, %v7207_v45, %v7044_v42 }
 0xec4   :  { %4667 = vmatpush1.bf16.msra.mxu1 %v4666_v37  ;;  %4727 = vmatpush1.bf16.msra.mxu0 %v4726_v62  ;;  %v4670_v22 = vpack.c.bf16 %v2723_v36, %v2722_v15  ;;  %v2675_v5 = vmul.f32 %v8169_v48, %v2662_v49  ;;  %v2788_v12 = vsel %vm863_vm1, %v2769_v51, %v8182_v16  ;;  %v2808_v16 = vld [vmem:[%s7751_s3 + $0xc0] sm:$0xff]  ;;  %v8201_v49 = vmov 0.0  }
 0xec5   :  { %4729 = vmatprep.subr.bf16.mxu0 %v4728_v32  ;;  %v2647_v34 = vpop.permute.xlu1 %2646  ;;  %v4668_v26 = vpack.c.bf16 %v2741_v31, %v2737_v25  ;;  %v2731_v1 = vmul.f32 %v8195_v13, %v2724_v59  ;;  %v2789_v23 = vsel %vm863_vm1, %v7199_v38, %v8179_v28  ;;  %v2712_v8 = vsel %vm8199_vm8, %v8159_v18, %v7285_v29 }
 0xec6   :  { %v2651_v56 = vsel %vm829_vm10, %v8180_v7, %v2647_v34  ;;  %v2663_v39 = vsel %vm829_vm10, %v2647_v34, %v8181_v24  ;;  %v2709_v58 = vpop.permute.xlu0 %2708  ;;  %v2777_v7 = vsel %vm863_vm1, %v8177_v4, %v7199_v38  ;;  %v2786_v24 = vsel %vm863_vm1, %v7255_v3, %v7207_v45 }
 0xec7   :  { %v2678_v6 = vmul.f32 %v8101_v20, %v2651_v56  ;;  %v2679_v37 = vmul.f32 %v8169_v48, %v2663_v39  ;;  %4669 = vmatprep.subr.bf16.mxu1 %v4668_v26  ;;  %v2801_v4 = vmul.f32 %v8184_v55, %v2782_v9  ;;  %v2776_v45 = vsel %vm863_vm1, %v8174_v14, %v2769_v51 }
 0xec8   :  { %4671 = vmatpush1.bf16.msra.mxu1 %v4670_v22  ;;  %4731 = vmatpush1.bf16.msra.mxu0 %v4730_v43  ;;  %v8198_v43 = vld [vmem:[#allocation51_spill] sm:$0xff]  ;;  %v2800_v28 = vmul.f32 %v8137_v41, %v2786_v24  ;;  %v2726_v32 = vsel %vm8200_vm3, %v2709_v58, %v8196_v50  ;;  %v4736_v36 = vpack.c.bf16 %v2735_v63, %v2731_v1  ;;  %vm8220_vm13 = vcmp.lt.s32.totalorder %v4969_v2, 15 }
 0xec9   :  { %v4734_v47 = vpack.c.bf16 %v2678_v6, %v2674_v10  ;;  %v2759_v19 = vpop.permute.xlu1 %2758  ;;  %4673 = vmatprep.subr.bf16.mxu1 %v4672_v11  ;;  %v4732_v62 = vpack.c.bf16 %v2679_v37, %v2675_v5  ;;  %v2795_v60 = vmul.f32 %v8198_v43, %v2788_v12  ;;  %v2799_v51 = vmul.f32 %v8198_v43, %v2789_v23  ;;  %vm8223_vm14 = vmmov %vm8220_vm13 }
 0xeca   :  { %v2783_v61 = vsel %vm863_vm1, %v2759_v19, %v7075_v54  ;;  %v2787_v38 = vsel %vm863_vm1, %v7095_v30, %v2759_v19  ;;  %v2773_v25 = vpop.permute.xlu0 %2772  ;;  %v2794_v31 = vmul.f32 %v8143_v33, %v2776_v45  ;;  %v2798_v15 = vmul.f32 %v8143_v33, %v2777_v7  ;;  %vm8224_vm15 = vmmov %vm8220_vm13 }
 0xecb   :  { %v2804_v35 = vmul.f32 %v8137_v41, %v2787_v38  ;;  %v2805_v14 = vmul.f32 %v8184_v55, %v2783_v61  ;;  %2879 = vmatmul.mubr.f32.vlgmr.msra.gmra.mrb[34].mxu1 %v2808_v16  ;;  %4733 = vmatprep.subr.bf16.mxu0 %v4732_v62  ;;  %v4738_v10 = vpack.c.bf16 %v7324_v40, %v2712_v8  ;;  %vm8225_vm0 = vmmov %vm8220_vm13  ;;  %vm8231_vm5 = vcmp.lt.s32.totalorder %v4969_v2, 1 }
 0xecc   :  { %4675 = vmatpush1.bf16.msra.mxu1 %v4674_v21  ;;  %4735 = vmatpush1.bf16.msra.mxu0 %v4734_v47  ;;  %v4744_v59 = vpack.c.bf16 %v2799_v51, %v2795_v60  ;;  %v2739_v21 = vmul.f32 %v8195_v13, %v2726_v32  ;;  %v2778_v63 = vsel %vm863_vm1, %v7044_v42, %v2773_v25  ;;  %vm8233_vm8 = vmmov %vm8231_vm5 }
 0xecd   :  { %v4678_v11 = vpack.c.bf16 %v2804_v35, %v2800_v28  ;;  %v2711_v18 = vpop.permute.xlu1 %2710  ;;  %v4676_v29 = vpack.c.bf16 %v2805_v14, %v2801_v4  ;;  %2949 = vmatprep.mubr.f32.mxu1 %v8201_v49  ;;  %4737 = vmatprep.subr.bf16.mxu0 %v4736_v36  ;;  %v2790_v34 = vsel %vm863_vm1, %v2773_v25, %v7255_v3  ;;  %vm8234_vm3 = vmmov %vm8231_vm5 }
 0xece   :  { %v2727_v50 = vsel %vm8202_vm4, %v2711_v18, %v8192_v53  ;;  %v2715_v40 = vsel %vm8203_vm6, %v8190_v44, %v2711_v18  ;;  %v2810_v53 = vld [vmem:[%s7751_s3 + $0xd0] sm:$0xff]  ;;  %v4746_v9 = vpack.c.bf16 %v2798_v15, %v2794_v31  ;;  %v2714_v42 = vsel %vm8204_vm11, %v8187_v17, %v2709_v58  ;;  %v3098_v18 = vld [vmem:[%s7753_s4 + $0x40] sm:$0xff]  ;;  %vm8235_vm4 = vmmov %vm8234_vm3 }
 0xecf   :  { %v2743_v26 = vmul.f32 %v8195_v13, %v2727_v50  ;;  %4677 = vmatprep.subr.bf16.mxu1 %v4676_v29  ;;  %v2802_v56 = vmul.f32 %v8143_v33, %v2778_v63  ;;  %v2803_v39 = vmul.f32 %v8198_v43, %v2790_v34  ;;  %v4742_v12 = vpack.c.bf16 %v2715_v40, %v2714_v42  ;;  %v3099_v15 = vld [vmem:[%s7753_s4 + $0x8f] sm:$0xff] }
 0xed0   :  { %4679 = vmatpush1.bf16.msra.mxu1 %v4678_v11  ;;  %4739 = vmatpush1.bf16.msra.mxu0 %v4738_v10  ;;  %vm8241_vm6 = vcmp.lt.s32.totalorder %v4969_v2, 127 }
 0xed1   :  { %v2775_v22 = vpop.permute.xlu1 %2774  ;;  %4745 = vmatprep.subr.bf16.mxu1 %v4744_v59  ;;  %v4740_v3 = vpack.c.bf16 %v2743_v26, %v2739_v21  ;;  %vm8245_vm11 = vmmov %vm8241_vm6 }
 0xed2   :  { %v2779_v44 = vsel %vm863_vm1, %v7075_v54, %v2775_v22  ;;  %v2791_v5 = vsel %vm863_vm1, %v2775_v22, %v7095_v30 }
 0xed3   :  { %v2806_v6 = vmul.f32 %v8143_v33, %v2779_v44  ;;  %v2807_v17 = vmul.f32 %v8198_v43, %v2791_v5  ;;  %3772 = vmatmul.mubr.msk.f32.vlgmr.msra.gmra.mrb[34].mxu1 %vm1636_vm7, %v2810_v53  ;;  %4741 = vmatprep.subr.bf16.mxu0 %v4740_v3  ;;  %v3275_v5 = vld [vmem:[%s7751_s3 + $0xe0] sm:$0x7f] }
 0xed4   :  { %4747 = vmatpush1.bf16.msra.mxu1 %v4746_v9  ;;  %3091 = vmatprep.mubr.f32.mxu1 %v8201_v49 }
 0xed5   :  { %v4750_v58 = vpack.c.bf16 %v2806_v6, %v2802_v56  ;;  %4743 = vmatpush1.bf16.msra.mxu0 %v4742_v12  ;;  %v4748_v37 = vpack.c.bf16 %v2807_v17, %v2803_v39  ;;  %v3145_v12 = vld [vmem:[%s7753_s4 + $0x48] sm:$0x7f] }
 0xed7   :  { %4749 = vmatprep.subr.bf16.mxu1 %v4748_v37 }
 0xed8   :  { %4751 = vmatpush1.bf16.msra.mxu1 %v4750_v58  ;;  %3021 = vmatmul.mubr.f32.vlgmr.msra.gmra.mrb[26].mxu0 %v2808_v16 }
 0xed9   :  { %3775 = vmatprep.mubr.msk.f32.mxu0 %vm1336_vm9, %v3275_v5 }
 0xedb   :  { %3773 = vmatmul.mubr.msk.f32.vlgmr.msra.gmra.mrb[36].mxu1 %vm1636_vm7, %v2810_v53 }
 0xedc   :  { %3774 = vmatprep.mubr.msk.f32.mxu1 %vm1336_vm9, %v3275_v5  ;;  %vm8210_vm9 = vcmp.lt.s32.totalorder %v4969_v2, 16 }
 0xfa6   :  { %v2951_v54 = vpop.f32.mrb[34].mxu1 }
 0xfa7   :  { %v3106_v30 = vmul.f32 %v2951_v54, %v2951_v54  ;;  %v2953_v7 = vpop.f32.mrb[35].mxu1 }
 0xfa8   :  { %v3100_v24 = vadd.f32 %v2953_v7, %v2951_v54  ;;  %v3107_v1 = vmul.f32 %v2953_v7, %v2953_v7 }
 0xfaa   :  { %v3110_v23 = vadd.f32 %v3107_v1, %v3106_v30 }
 0xfab   :  { %v3022_v4 = vpop.f32.mrb[26].mxu0 }
 0xfac   :  { %v3024_v47 = vpop.f32.mrb[27].mxu0 }
 0xfae   :  { %v3093_v19 = vpop.f32.mrb[36].mxu1 }
 0xfaf   :  { %v3094_v62 = vadd.f32 %v3093_v19, %v3022_v4  ;;  %v3095_v45 = vpop.f32.mrb[37].mxu1 }
 0xfb0   :  { %v3096_v60 = vadd.f32 %v3095_v45, %v3024_v47 }
 0xfb1   :  { %v3101_v61 = vadd.f32 %v3100_v24, %v3094_v62  ;;  %v3108_v38 = vmul.f32 %v3094_v62, %v3094_v62 }
 0xfb2   :  { %v3109_v28 = vmul.f32 %v3096_v60, %v3096_v60 }
 0xfb3   :  { %v3102_v8 = vadd.f32 %v3101_v61, %v3096_v60  ;;  %v3111_v35 = vadd.f32 %v3110_v23, %v3108_v38  ;;  %v8208_v38 = vld [vmem:[#allocation21_spill] sm:$0xff] }
 0xfb5   :  { %3103 = vadd.xlane.f32.xlu0 %v3102_v8  ;;  %v3112_v16 = vadd.f32 %v3111_v35, %v3109_v28 }
 0xfb7   :  { %3113 = vadd.xlane.f32.xlu1 %v3112_v16  ;;  %v8209_v16 = vld [vmem:[#allocation24_spill] sm:$0xff] }
0x1042   :  { %v3104_v14 = vpop.xlane.xlu0 %3103 }
0x1043   :  { %v3105_v51 = vmul.f32 0.001953125, %v3104_v14 }
0x1044   :  { %v3114_v32 = vpop.xlane.xlu1 %3113 }
0x1045   :  { %v3116_v25 = vmul.f32 %v3105_v51, %v3105_v51  ;;  %v3115_v36 = vmul.f32 0.001953125, %v3114_v32  ;;  %v8211_v32 = vld [vmem:[#allocation7_spill] sm:$0xff] }
0x1047   :  { %v3117_v31 = vsub.f32 %v3115_v36, %v3116_v25 }
0x1049   :  { %v3118_v11 = vadd.f32 1e-05, %v3117_v31 }
0x104b   :  { %4882 = vrsqrt.f32 %v3118_v11 }
0x1055   :  { %v4883_v29 = vpop.eup %4882 }
0x1056   :  { %v3120_v49 = vmul.f32 %v4883_v29, %v3098_v18  ;;  %v8215_v18 = vld [vmem:[#allocation20_spill] sm:$0xff] }
0x1058   :  { %3123 = vperm.xlu0 %4849, %v3120_v49   ;;  %v3130_v10 = vmul.f32 %v3120_v49, %v3105_v51  ;;  %v8216_v49 = vld [vmem:[#allocation12_spill] sm:$0xff] }
0x105a   :  { %v3131_v50 = vsub.f32 %v3099_v15, %v3130_v10  ;;  %v8217_v10 = vld [vmem:[#allocation25_spill] sm:$0xff] }
0x105c   :  { %3134 = vperm.xlu1 %4848, %v3131_v50  }
0x10d7   :  { %v3124_v59 = vpop.permute.xlu0 %3123 }
0x10d8   :  { %v3126_v21 = vmul.f32 %v3124_v59, %v2951_v54  ;;  %v3127_v63 = vmul.f32 %v3124_v59, %v2953_v7  ;;  %v3128_v26 = vmul.f32 %v3124_v59, %v3094_v62  ;;  %v3129_v40 = vmul.f32 %v3124_v59, %v3096_v60  ;;  %v8205_v7 = vld [vmem:[#allocation6_spill] sm:$0xff]  ;;  %v8206_v62 = vld [vmem:[#allocation9_spill] sm:$0xff]  ;;  %v8218_v59 = vld [vmem:[#allocation27_spill] sm:$0xff] }
0x10d9   :  { %v8207_v60 = vld [vmem:[#allocation26_spill] sm:$0xff] }
0x10db   :  { %v3135_v34 = vpop.permute.xlu1 %3134 }
0x10dc   :  { %v3137_v53 = vadd.f32 %v3135_v34, %v3126_v21  ;;  %v3138_v9 = vadd.f32 %v3135_v34, %v3127_v63  ;;  %v3139_v42 = vadd.f32 %v3135_v34, %v3128_v26  ;;  %v3140_v22 = vadd.f32 %v3135_v34, %v3129_v40  ;;  %v8219_v63 = vld [vmem:[#allocation23_spill] sm:$0xff] }
0x10de   :  { %v7437_v3 = vmax.f32 %v3137_v53, 0.0  ;;  %v7439_v56 = vmax.f32 %v3138_v9, 0.0  ;;  %v7445_v39 = vmax.f32 %v3139_v42, 0.0  ;;  %v7447_v44 = vmax.f32 %v3140_v22, 0.0  ;;  %v8221_v9 = vld [vmem:[#allocation8_spill] sm:$0xff] }
0x10e0   :  { %3148 = vrot.lane.b32.xlu1 %v7439_v56, %s4923_s18  ;;  %3146 = vrot.lane.b32.xlu0 %v7437_v3, %s4923_s18 }
0x10e4   :  { %3152 = vrot.lane.b32.xlu1 %v7447_v44, %s4923_s18  ;;  %3150 = vrot.lane.b32.xlu0 %v7445_v39, %s4923_s18 }
0x10e8   :  { %3164 = vrot.lane.b32.xlu1 %v7439_v56, %s4922_s17  ;;  %3162 = vrot.lane.b32.xlu0 %v7437_v3, %s4922_s17 }
0x10ec   :  { %3168 = vrot.lane.b32.xlu1 %v7447_v44, %s4922_s17  ;;  %3166 = vrot.lane.b32.xlu0 %v7445_v39, %s4922_s17 }
0x10f0   :  { %3180 = vrot.lane.b32.xlu1 %v7439_v56, %s4924_s19  ;;  %3178 = vrot.lane.b32.xlu0 %v7437_v3, %s4924_s19 }
0x10f4   :  { %3184 = vrot.lane.b32.xlu1 %v7447_v44, %s4924_s19  ;;  %3182 = vrot.lane.b32.xlu0 %v7445_v39, %s4924_s19 }
0x10f8   :  { %3196 = vrot.lane.b32.xlu1 %v7439_v56, %s4925_s20  ;;  %3194 = vrot.lane.b32.xlu0 %v7437_v3, %s4925_s20 }
0x10fc   :  { %3200 = vrot.lane.b32.xlu1 %v7447_v44, %s4925_s20  ;;  %3198 = vrot.lane.b32.xlu0 %v7445_v39, %s4925_s20 }
0x1100   :  { %3212 = vrot.lane.b32.xlu1 %v7439_v56, %s4926_s21  ;;  %3210 = vrot.lane.b32.xlu0 %v7437_v3, %s4926_s21 }
0x1104   :  { %3216 = vrot.lane.b32.xlu1 %v7447_v44, %s4926_s21  ;;  %3214 = vrot.lane.b32.xlu0 %v7445_v39, %s4926_s21 }
0x1108   :  { %3228 = vrot.lane.b32.xlu1 %v7439_v56, %s4927_s22  ;;  %3226 = vrot.lane.b32.xlu0 %v7437_v3, %s4927_s22 }
0x110c   :  { %3232 = vrot.lane.b32.xlu1 %v7447_v44, %s4927_s22  ;;  %3230 = vrot.lane.b32.xlu0 %v7445_v39, %s4927_s22 }
0x1110   :  { %3244 = vrot.lane.b32.xlu1 %v7439_v56, %s4928_s23  ;;  %3242 = vrot.lane.b32.xlu0 %v7437_v3, %s4928_s23 }
0x1114   :  { %3248 = vrot.lane.b32.xlu1 %v7447_v44, %s4928_s23  ;;  %3246 = vrot.lane.b32.xlu0 %v7445_v39, %s4928_s23 }
0x1118   :  { %3260 = vrot.lane.b32.xlu1 %v7439_v56, %s4929_s24  ;;  %3258 = vrot.lane.b32.xlu0 %v7437_v3, %s4929_s24 }
0x111c   :  { %3264 = vrot.lane.b32.xlu1 %v7447_v44, %s4929_s24  ;;  %3262 = vrot.lane.b32.xlu0 %v7445_v39, %s4929_s24 }
0x1120   :  { %3278 = vperm.xlu0 %4849, %v3145_v12   ;;  %v8222_v12 = vld [vmem:[#allocation18_spill] sm:$0xff] }
0x1152   :  { %v3149_v6 = vpop.permute.xlu1 %3148  ;;  %v3147_v17 = vpop.permute.xlu0 %3146 }
0x1153   :  { %v3156_v58 = vsel %vm744_vm2, %v3147_v17, %v3149_v6 }
0x1154   :  { %v3159_v37 = vmul.f32 %v5186_v46, %v3156_v58 }
0x1156   :  { %v3153_v54 = vpop.permute.xlu1 %3152  ;;  %v3151_v30 = vpop.permute.xlu0 %3150  ;;  %v4752_v24 = vpack.c.bf16 %v8205_v7, %v3159_v37  ;;  %v8227_v7 = vld [vmem:[#allocation16_spill] sm:$0xff] }
0x1157   :  { %v3157_v1 = vsel %vm744_vm2, %v3153_v54, %v3147_v17  ;;  %v3154_v23 = vsel %vm744_vm2, %v3151_v30, %v3153_v54  ;;  %v3155_v4 = vsel %vm744_vm2, %v3149_v6, %v3151_v30  ;;  %vm8212_vm2 = vmmov %vm8210_vm9  ;;  %v8226_v54 = vld [vmem:[#allocation22_spill] sm:$0xff] }
0x1158   :  { %v3158_v47 = vmul.f32 %v5353_v52, %v3157_v1  ;;  %v3160_v19 = vmul.f32 %v5326_v27, %v3155_v4  ;;  %v3161_v45 = vmul.f32 %v8206_v62, %v3154_v23  ;;  %4753 = vmatprep.subr.bf16.mxu1 %v4752_v24  ;;  %vm8213_vm7 = vmmov %vm8212_vm2  ;;  %v8228_v23 = vld [vmem:[#allocation32_spill] sm:$0xff] }
0x1159   :  { %vm8214_vm12 = vmmov %vm8212_vm2 }
0x115a   :  { %v4754_v61 = vpack.c.bf16 %v8207_v60, %v3158_v47  ;;  %v4790_v28 = vpack.c.bf16 %v8208_v38, %v3160_v19  ;;  %v3165_v8 = vpop.permute.xlu1 %3164  ;;  %v3163_v35 = vpop.permute.xlu0 %3162  ;;  %v4788_v14 = vpack.c.bf16 %v8209_v16, %v3161_v45  ;;  %v8229_v47 = vld [vmem:[#allocation29_spill] sm:$0xff] }
0x115b   :  { %v3172_v51 = vsel %vm8210_vm9, %v3163_v35, %v3165_v8  ;;  %vm8246_vm9 = vmmov %vm8241_vm6 }
0x115c   :  { %v4756_v25 = vpack.c.bf16 %v8211_v32, %v3172_v51  ;;  %4755 = vmatpush1.bf16.msra.mxu1 %v4754_v61  ;;  %4789 = vmatprep.subr.bf16.mxu0 %v4788_v14  ;;  %v8230_v61 = vld [vmem:[#allocation33_spill] sm:$0xff]  ;;  %v8232_v14 = vld [vmem:[#allocation15_spill] sm:$0xff] }
0x115d   :  { %4791 = vmatpush1.bf16.msra.mxu0 %v4790_v28 }
0x115e   :  { %v3169_v27 = vpop.permute.xlu1 %3168  ;;  %4757 = vmatprep.subr.bf16.mxu1 %v4756_v25  ;;  %v3167_v52 = vpop.permute.xlu0 %3166 }
0x115f   :  { %v3173_v36 = vsel %vm8212_vm2, %v3169_v27, %v3163_v35  ;;  %v3170_v31 = vsel %vm8213_vm7, %v3167_v52, %v3169_v27  ;;  %v3171_v11 = vsel %vm8214_vm12, %v3165_v8, %v3167_v52  ;;  %v8236_v52 = vld [vmem:[#allocation19_spill] sm:$0xff]  ;;  %vm8247_vm2 = vmmov %vm8241_vm6 }
0x1160   :  { %v3174_v29 = vmul.f32 %v8215_v18, %v3173_v36  ;;  %v3176_v15 = vmul.f32 %v8216_v49, %v3171_v11  ;;  %v4792_v50 = vpack.c.bf16 %v8217_v10, %v3170_v31  ;;  %v8237_v11 = vld [vmem:[#allocation30_spill] sm:$0xff] }
0x1162   :  { %v4758_v21 = vpack.c.bf16 %v8218_v59, %v3174_v29  ;;  %v4794_v34 = vpack.c.bf16 %v8219_v63, %v3176_v15  ;;  %v3181_v26 = vpop.permute.xlu1 %3180  ;;  %4793 = vmatprep.subr.bf16.mxu0 %v4792_v50  ;;  %v3179_v40 = vpop.permute.xlu0 %3178  ;;  %v8238_v29 = vld [vmem:[#allocation35_spill] sm:$0xff] }
0x1163   :  { %v3188_v53 = vsel %vm8220_vm13, %v3179_v40, %v3181_v26  ;;  %v8239_v50 = vld [vmem:[#allocation31_spill] sm:$0xff] }
0x1164   :  { %v3191_v42 = vmul.f32 %v8221_v9, %v3188_v53  ;;  %4759 = vmatpush1.bf16.msra.mxu1 %v4758_v21  ;;  %4795 = vmatpush1.bf16.msra.mxu0 %v4794_v34  ;;  %v8240_v21 = vld [vmem:[#allocation3_spill] sm:$0xff] }
0x1165   :  { %v4768_v63 = vpack.c.bf16 %v8240_v21, %v7439_v56 }
0x1166   :  { %v3185_v22 = vpop.permute.xlu1 %3184  ;;  %v3183_v5 = vpop.permute.xlu0 %3182  ;;  %v4760_v6 = vpack.c.bf16 %v8222_v12, %v3191_v42  ;;  %v8243_v42 = vld [vmem:[#allocation2_spill] sm:$0xff] }
0x1167   :  { %v3189_v17 = vsel %vm8223_vm14, %v3185_v22, %v3179_v40  ;;  %v3186_v58 = vsel %vm8224_vm15, %v3183_v5, %v3185_v22  ;;  %v3187_v37 = vsel %vm8225_vm0, %v3181_v26, %v3183_v5  ;;  %v8242_v26 = vld [vmem:[#allocation5_spill] sm:$0xff]  ;;  %v4770_v22 = vpack.c.bf16 %v8243_v42, %v7437_v3  ;;  %v8244_v5 = vld [vmem:[#allocation4_spill] sm:$0xff] }
0x1168   :  { %v3190_v30 = vmul.f32 %v8226_v54, %v3189_v17  ;;  %v3192_v24 = vmul.f32 %v8227_v7, %v3187_v37  ;;  %v3193_v1 = vmul.f32 %v8077_v57, %v3186_v58  ;;  %4761 = vmatprep.subr.bf16.mxu1 %v4760_v6  ;;  %v4806_v12 = vpack.c.bf16 %v8244_v5, %v7445_v39  ;;  %v8248_v39 = vld [vmem:[#allocation39_spill] sm:$0xff] }
0x1169   :  { %vm3571_vm14 = vcmask 1042432   ;;  %vm3668_vm15 = vcmask 1040384   ;;  %vm8269_vm0 = vcmask 1041408  }
0x116a   :  { %v4762_v4 = vpack.c.bf16 %v8228_v23, %v3190_v30  ;;  %v4798_v19 = vpack.c.bf16 %v8229_v47, %v3192_v24  ;;  %v3197_v45 = vpop.permute.xlu1 %3196  ;;  %v3195_v60 = vpop.permute.xlu0 %3194  ;;  %v4796_v38 = vpack.c.bf16 %v8230_v61, %v3193_v1  ;;  %v8249_v24 = vld [vmem:[#allocation28_spill] sm:$0xff]  ;;  %v8250_v23 = vld [vmem:[#allocation34_spill] sm:$0xff]  ;;  %v8251_v47 = vld [vmem:[#allocation37_spill] sm:$0xff] }
0x116b   :  { %v3204_v28 = vsel %vm8231_vm5, %v3195_v60, %v3197_v45  ;;  %vm8270_vm5 = vmmov %vm8269_vm0 }
0x116c   :  { %v3207_v8 = vmul.f32 %v5186_v46, %v3204_v28  ;;  %4763 = vmatpush1.bf16.msra.mxu1 %v4762_v4  ;;  %4797 = vmatprep.subr.bf16.mxu0 %v4796_v38 }
0x116d   :  { %4799 = vmatpush1.bf16.msra.mxu0 %v4798_v19 }
0x116e   :  { %v3201_v35 = vpop.permute.xlu1 %3200  ;;  %v3199_v16 = vpop.permute.xlu0 %3198  ;;  %v4764_v51 = vpack.c.bf16 %v8232_v14, %v3207_v8 }
0x116f   :  { %v3205_v32 = vsel %vm8233_vm8, %v3201_v35, %v3195_v60  ;;  %v3202_v25 = vsel %vm8234_vm3, %v3199_v16, %v3201_v35  ;;  %v3203_v27 = vsel %vm8235_vm4, %v3197_v45, %v3199_v16  ;;  %v8252_v35 = vld [vmem:[#allocation36_spill] sm:$0xff]  ;;  %vm8271_vm8 = vmmov %vm8269_vm0 }
0x1170   :  { %v3206_v36 = vmul.f32 %v8236_v52, %v3205_v32  ;;  %v3208_v46 = vmul.f32 %v8101_v20, %v3203_v27  ;;  %v3209_v31 = vmul.f32 %v8206_v62, %v3202_v25  ;;  %4765 = vmatprep.subr.bf16.mxu1 %v4764_v51  ;;  %v4804_v62 = vpack.c.bf16 %v8242_v26, %v7447_v44  ;;  %v8253_v51 = vld [vmem:[#allocation48_spill] sm:$0xff]  ;;  %vm8272_vm3 = vmmov %vm8269_vm0 }
0x1172   :  { %v4766_v18 = vpack.c.bf16 %v8237_v11, %v3206_v36  ;;  %v4802_v49 = vpack.c.bf16 %v8238_v29, %v3208_v46  ;;  %v3213_v15 = vpop.permute.xlu1 %3212  ;;  %v3211_v10 = vpop.permute.xlu0 %3210  ;;  %v4800_v59 = vpack.c.bf16 %v8239_v50, %v3209_v31  ;;  %v8255_v46 = vld [vmem:[#allocation45_spill] sm:$0xff]  ;;  %v8256_v11 = vld [vmem:[#allocation44_spill] sm:$0xff] }
0x1173   :  { %v3220_v34 = vsel %vm8241_vm6, %v3211_v10, %v3213_v15 }
0x1174   :  { %4767 = vmatpush1.bf16.msra.mxu1 %v4766_v18  ;;  %4801 = vmatprep.subr.bf16.mxu0 %v4800_v59  ;;  %v3222_v56 = vmul.f32 %v8137_v41, %v3220_v34  ;;  %v8261_v34 = vld [vmem:[#allocation38_spill] sm:$0xff] }
0x1175   :  { %4769 = vmatprep.subr.bf16.mxu1 %v4768_v63  ;;  %4803 = vmatpush1.bf16.msra.mxu0 %v4802_v49 }
0x1176   :  { %v3217_v40 = vpop.permute.xlu1 %3216  ;;  %4805 = vmatprep.subr.bf16.mxu0 %v4804_v62  ;;  %v3215_v53 = vpop.permute.xlu0 %3214  ;;  %v4774_v19 = vpack.c.bf16 %v8251_v47, %v3222_v56  ;;  %v8262_v62 = vld [vmem:[#allocation47_spill] sm:$0xff] }
0x1177   :  { %v3221_v6 = vsel %vm8245_vm11, %v3217_v40, %v3211_v10  ;;  %v3218_v17 = vsel %vm8246_vm9, %v3215_v53, %v3217_v40  ;;  %v3219_v44 = vsel %vm8247_vm2, %v3213_v15, %v3215_v53  ;;  %v8263_v53 = vld [vmem:[#allocation43_spill] sm:$0xff] }
0x1178   :  { %v3225_v58 = vmul.f32 %v8077_v57, %v3221_v6  ;;  %v3223_v37 = vmul.f32 %v8221_v9, %v3219_v44  ;;  %v3224_v3 = vmul.f32 %v8143_v33, %v3218_v17  ;;  %4771 = vmatpush1.bf16.msra.mxu1 %v4770_v22  ;;  %v8264_v22 = vld [vmem:[#allocation46_spill] sm:$0xff] }
0x1179   :  { %4807 = vmatpush1.bf16.msra.mxu0 %v4806_v12 }
0x117a   :  { %v4810_v54 = vpack.c.bf16 %v8248_v39, %v3224_v3  ;;  %v3229_v30 = vpop.permute.xlu1 %3228  ;;  %v3227_v7 = vpop.permute.xlu0 %3226  ;;  %v4772_v1 = vpack.c.bf16 %v8249_v24, %v3223_v37  ;;  %v4808_v4 = vpack.c.bf16 %v8250_v23, %v3225_v58  ;;  %v8265_v39 = vld [vmem:[#allocation53_spill] sm:$0xff] }
0x117b   :  { %v3236_v45 = vsel %vm829_vm10, %v3227_v7, %v3229_v30 }
0x117c   :  { %4773 = vmatprep.subr.bf16.mxu1 %v4772_v1  ;;  %4809 = vmatprep.subr.bf16.mxu0 %v4808_v4  ;;  %v3238_v60 = vmul.f32 %v8236_v52, %v3236_v45  ;;  %v8254_v52 = vld [vmem:[#allocation41_spill] sm:$0xff]  ;;  %v8268_v1 = vld [vmem:[#allocation52_spill] sm:$0xff] }
0x117d   :  { %4775 = vmatpush1.bf16.msra.mxu1 %v4774_v19  ;;  %4811 = vmatpush1.bf16.msra.mxu0 %v4810_v54 }
0x117e   :  { %v3233_v57 = vpop.permute.xlu1 %3232  ;;  %v3231_v9 = vpop.permute.xlu0 %3230  ;;  %v4778_v18 = vpack.c.bf16 %v8256_v11, %v3238_v60 }
0x117f   :  { %v3237_v61 = vsel %vm829_vm10, %v3233_v57, %v3227_v7  ;;  %v3234_v38 = vsel %vm829_vm10, %v3231_v9, %v3233_v57  ;;  %v3235_v28 = vsel %vm829_vm10, %v3229_v30, %v3231_v9  ;;  %vm8257_vm10 = vcmp.lt.s32.totalorder %v4969_v2, 112  ;;  %v8266_v30 = vld [vmem:[#allocation50_spill] sm:$0xff]  ;;  %v3274_v2 = vld [vmem:[%s7751_s3 + $0xd8] sm:$0x7f] }
0x1180   :  { %v3241_v8 = vmul.f32 %v8169_v48, %v3237_v61  ;;  %v3239_v16 = vmul.f32 %v8252_v35, %v3235_v28  ;;  %v3240_v14 = vmul.f32 %v8101_v20, %v3234_v38  ;;  %vm8258_vm7 = vmmov %vm8257_vm10 }
0x1181   :  { %vm8259_vm12 = vmmov %vm8258_vm7 }
0x1182   :  { %v4814_v32 = vpack.c.bf16 %v8253_v51, %v3240_v14  ;;  %v3245_v25 = vpop.permute.xlu1 %3244  ;;  %v3243_v27 = vpop.permute.xlu0 %3242  ;;  %v4776_v36 = vpack.c.bf16 %v8254_v52, %v3239_v16  ;;  %v4812_v31 = vpack.c.bf16 %v8255_v46, %v3241_v8  ;;  %vm8260_vm13 = vmmov %vm8258_vm7 }
0x1183   :  { %v3252_v15 = vsel %vm8259_vm12, %v3243_v27, %v3245_v25 }
0x1184   :  { %4777 = vmatprep.subr.bf16.mxu1 %v4776_v36  ;;  %4813 = vmatprep.subr.bf16.mxu0 %v4812_v31  ;;  %v4782_v42 = vpack.c.bf16 %v8263_v53, %v3252_v15 }
0x1185   :  { %4779 = vmatpush1.bf16.msra.mxu1 %v4778_v18  ;;  %4815 = vmatpush1.bf16.msra.mxu0 %v4814_v32 }
0x1186   :  { %v3249_v29 = vpop.permute.xlu1 %3248  ;;  %v3247_v48 = vpop.permute.xlu0 %3246 }
0x1187   :  { %v3253_v49 = vsel %vm8257_vm10, %v3249_v29, %v3243_v27  ;;  %v3251_v20 = vsel %vm8258_vm7, %v3245_v25, %v3247_v48  ;;  %v3250_v50 = vsel %vm8260_vm13, %v3247_v48, %v3249_v29 }
0x1188   :  { %v3257_v10 = vmul.f32 %v8195_v13, %v3253_v49  ;;  %v3255_v59 = vmul.f32 %v8168_v0, %v3251_v20  ;;  %v4818_v5 = vpack.c.bf16 %v8264_v22, %v3250_v50 }
0x118a   :  { %v3261_v21 = vpop.permute.xlu1 %3260  ;;  %v3259_v63 = vpop.permute.xlu0 %3258  ;;  %v4780_v26 = vpack.c.bf16 %v8261_v34, %v3255_v59  ;;  %v4816_v40 = vpack.c.bf16 %v8262_v62, %v3257_v10 }
0x118b   :  { %v3268_v12 = vsel %vm863_vm1, %v3259_v63, %v3261_v21 }
0x118c   :  { %4781 = vmatprep.subr.bf16.mxu1 %v4780_v26  ;;  %4817 = vmatprep.subr.bf16.mxu0 %v4816_v40  ;;  %v3270_v0 = vmul.f32 %v8137_v41, %v3268_v12  ;;  %v8267_v41 = vld [vmem:[#allocation54_spill] sm:$0xff] }
0x118d   :  { %4783 = vmatpush1.bf16.msra.mxu1 %v4782_v42  ;;  %4819 = vmatpush1.bf16.msra.mxu0 %v4818_v5 }
0x118e   :  { %v3265_v13 = vpop.permute.xlu1 %3264  ;;  %v3263_v56 = vpop.permute.xlu0 %3262  ;;  %v4786_v23 = vpack.c.bf16 %v8268_v1, %v3270_v0 }
0x118f   :  { %v3269_v6 = vsel %vm863_vm1, %v3265_v13, %v3259_v63  ;;  %v3266_v17 = vsel %vm863_vm1, %v3263_v56, %v3265_v13  ;;  %v3267_v44 = vsel %vm863_vm1, %v3261_v21, %v3263_v56  ;;  %vm3426_vm1 = vcmask 1044480  }
0x1190   :  { %v3273_v58 = vmul.f32 %v8198_v43, %v3269_v6  ;;  %v3271_v37 = vmul.f32 %v8184_v55, %v3267_v44  ;;  %v3272_v3 = vmul.f32 %v8143_v33, %v3266_v17 }
0x1192   :  { %v4822_v54 = vpack.c.bf16 %v8265_v39, %v3272_v3  ;;  %v4784_v7 = vpack.c.bf16 %v8266_v30, %v3271_v37  ;;  %v4820_v24 = vpack.c.bf16 %v8267_v41, %v3273_v58 }
0x1194   :  { %4785 = vmatprep.subr.bf16.mxu1 %v4784_v7  ;;  %4821 = vmatprep.subr.bf16.mxu0 %v4820_v24 }
0x1195   :  { %4787 = vmatpush1.bf16.msra.mxu1 %v4786_v23  ;;  %4823 = vmatpush1.bf16.msra.mxu0 %v4822_v54 }
0x1198   :  { %3349 = vmatmul.mubr.f32.vlgmr.msra.gmra.mrb[38].mxu1 %v3274_v2  ;;  %3420 = vmatmul.mubr.f32.vlgmr.msra.gmra.mrb[28].mxu0 %v3274_v2 }
0x119f   :  { %v3279_v55 = vpop.permute.xlu0 %3278 }
0x126b   :  { %v3350_v33 = vpop.f32.mrb[38].mxu1  ;;  %v3421_v43 = vpop.f32.mrb[28].mxu0 }
0x126c   :  { %v7652_v4 = vadd.f32 %v3350_v33, %v3279_v55  ;;  %v7654_v47 = vadd.f32 %v3421_v43, %v3279_v55  ;;  %v3352_v19 = vpop.f32.mrb[39].mxu1  ;;  %v3423_v45 = vpop.f32.mrb[29].mxu0 }
0x126d   :  { %v7656_v57 = vadd.f32 %v3352_v19, %v3279_v55  ;;  %v7658_v9 = vadd.f32 %v3423_v45, %v3279_v55 }
0x126e   :  { %v3427_v60 = vsel %vm3426_vm1, %v7652_v4, -inf  ;;  %v3441_v61 = vsel %vm3426_vm1, %v7654_v47, -inf }
0x126f   :  { %v3428_v38 = vrot.slane %v3427_v60, 4  ;;  %v3442_v28 = vrot.slane %v3441_v61, 4  ;;  %v3434_v8 = vsel %vm3426_vm1, %v7656_v57, -inf  ;;  %v3448_v35 = vsel %vm3426_vm1, %v7658_v9, -inf }
0x1270   :  { %v3435_v16 = vrot.slane %v3434_v8, 4  ;;  %v3449_v14 = vrot.slane %v3448_v35, 4 }
0x1271   :  { %v3429_v51 = vmax.f32 %v3427_v60, %v3428_v38  ;;  %v3443_v32 = vmax.f32 %v3441_v61, %v3442_v28 }
0x1272   :  { %v3436_v25 = vmax.f32 %v3434_v8, %v3435_v16  ;;  %v3450_v27 = vmax.f32 %v3448_v35, %v3449_v14 }
0x1273   :  { %v3430_v52 = vrot.slane %v3429_v51, 2  ;;  %v3444_v36 = vrot.slane %v3443_v32, 2 }
0x1274   :  { %v3437_v46 = vrot.slane %v3436_v25, 2  ;;  %v3451_v31 = vrot.slane %v3450_v27, 2 }
0x1275   :  { %v3431_v11 = vmax.f32 %v3429_v51, %v3430_v52  ;;  %v3445_v18 = vmax.f32 %v3443_v32, %v3444_v36  ;;  %v3503_v32 = vld [vmem:[%s7750_s0 + $0x40] sm:$0xff]  ;;  %v3505_v52 = vld [vmem:[%s7750_s0 + $0x50] sm:$0xff] }
0x1276   :  { %v3438_v29 = vmax.f32 %v3436_v25, %v3437_v46  ;;  %v3452_v48 = vmax.f32 %v3450_v27, %v3451_v31  ;;  %v3507_v46 = vld [vmem:[%s7750_s0 + $0x60] sm:$0x3] }
0x1277   :  { %v3432_v49 = vrot.slane %v3431_v11, 1  ;;  %v3446_v20 = vrot.slane %v3445_v18, 1 }
0x1278   :  { %v3439_v15 = vrot.slane %v3438_v29, 1  ;;  %v3453_v10 = vrot.slane %v3452_v48, 1 }
0x1279   :  { %v3433_v50 = vmax.f32 %v3431_v11, %v3432_v49  ;;  %v3447_v59 = vmax.f32 %v3445_v18, %v3446_v20  ;;  %v3504_v11 = vld [vmem:[%s7750_s0 + $0x48] sm:$0xff]  ;;  %v3509_v49 = vld [vmem:[%s7750_s0 + $0x70] sm:$0x3] }
0x127a   :  { %v3440_v21 = vmax.f32 %v3438_v29, %v3439_v15  ;;  %v3454_v63 = vmax.f32 %v3452_v48, %v3453_v10 }
0x127b   :  { %v3455_v34 = vsub.f32 %v7652_v4, %v3433_v50  ;;  %v3457_v26 = vsub.f32 %v7654_v47, %v3447_v59 }
0x127c   :  { %v3456_v62 = vsub.f32 %v7656_v57, %v3440_v21  ;;  %v3458_v40 = vsub.f32 %v7658_v9, %v3454_v63 }
0x127d   :  { %v3459_v53 = vmul.f32 1.442695, %v3455_v34  ;;  %v3463_v42 = vmul.f32 1.442695, %v3457_v26 }
0x127e   :  { %v3461_v22 = vmul.f32 1.442695, %v3456_v62  ;;  %v3465_v5 = vmul.f32 1.442695, %v3458_v40 }
0x127f   :  { %4884 = vpow2.f32 %v3459_v53 }
0x1280   :  { %4886 = vpow2.f32 %v3463_v42  ;;  %v3506_v42 = vld [vmem:[%s7750_s0 + $0x58] sm:$0xff] }
0x1281   :  { %4888 = vpow2.f32 %v3461_v22 }
0x1282   :  { %4890 = vpow2.f32 %v3465_v5 }
0x1289   :  { %v4885_v12 = vpop.eup %4884 }
0x128a   :  { %v4887_v13 = vpop.eup %4886  ;;  %v3467_v56 = vsel %vm3426_vm1, %v4885_v12, 0.0 }
0x128b   :  { %v4889_v0 = vpop.eup %4888  ;;  %v3468_v6 = vrot.slane %v3467_v56, 4  ;;  %v3481_v17 = vsel %vm3426_vm1, %v4887_v13, 0.0 }
0x128c   :  { %v4891_v44 = vpop.eup %4890  ;;  %v3482_v58 = vrot.slane %v3481_v17, 4  ;;  %v3474_v37 = vsel %vm3426_vm1, %v4889_v0, 0.0 }
0x128d   :  { %v3469_v3 = vadd.f32 %v3468_v6, %v3467_v56  ;;  %v3475_v39 = vrot.slane %v3474_v37, 4  ;;  %v3488_v54 = vsel %vm3426_vm1, %v4891_v44, 0.0 }
0x128e   :  { %v3483_v30 = vadd.f32 %v3482_v58, %v3481_v17  ;;  %v3489_v7 = vrot.slane %v3488_v54, 4  ;;  %v3508_v58 = vld [vmem:[%s7750_s0 + $0x68] sm:$0x3] }
0x128f   :  { %v3470_v41 = vrot.slane %v3469_v3, 2  ;;  %v3476_v24 = vadd.f32 %v3475_v39, %v3474_v37 }
0x1290   :  { %v3484_v1 = vrot.slane %v3483_v30, 2  ;;  %v3490_v23 = vadd.f32 %v3489_v7, %v3488_v54 }
0x1291   :  { %v3471_v2 = vadd.f32 %v3470_v41, %v3469_v3  ;;  %v3477_v55 = vrot.slane %v3476_v24, 2 }
0x1292   :  { %v3485_v33 = vadd.f32 %v3484_v1, %v3483_v30  ;;  %v3491_v43 = vrot.slane %v3490_v23, 2 }
0x1293   :  { %v3472_v19 = vrot.slane %v3471_v2, 1  ;;  %v3478_v45 = vadd.f32 %v3477_v55, %v3476_v24 }
0x1294   :  { %v3486_v60 = vrot.slane %v3485_v33, 1  ;;  %v3492_v61 = vadd.f32 %v3491_v43, %v3490_v23 }
0x1295   :  { %v3473_v38 = vadd.f32 %v3472_v19, %v3471_v2  ;;  %v3479_v28 = vrot.slane %v3478_v45, 1 }
0x1296   :  { %v3487_v8 = vadd.f32 %v3486_v60, %v3485_v33  ;;  %v3493_v35 = vrot.slane %v3492_v61, 1 }
0x1297   :  { %4892 = vrcp.f32 %v3473_v38  ;;  %v3480_v16 = vadd.f32 %v3479_v28, %v3478_v45 }
0x1298   :  { %4894 = vrcp.f32 %v3487_v8  ;;  %v3494_v14 = vadd.f32 %v3493_v35, %v3492_v61 }
0x1299   :  { %4896 = vrcp.f32 %v3480_v16 }
0x129a   :  { %4898 = vrcp.f32 %v3494_v14 }
0x12a1   :  { %v4893_v51 = vpop.eup %4892 }
0x12a2   :  { %v4895_v25 = vpop.eup %4894  ;;  %v3496_v27 = vmul.f32 %v4893_v51, %v4885_v12 }
0x12a3   :  { %v4897_v36 = vpop.eup %4896  ;;  %v3500_v31 = vmul.f32 %v4895_v25, %v4887_v13 }
0x12a4   :  { %v4899_v18 = vpop.eup %4898  ;;  %v3511_v29 = vmul.f32 %v3503_v32, %v3496_v27  ;;  %v3547_v48 = vrot.slane %v3496_v27, 3  ;;  %v3498_v20 = vmul.f32 %v4897_v36, %v4889_v0 }
0x12a5   :  { %v3513_v15 = vmul.f32 %v3505_v52, %v3500_v31  ;;  %v3549_v10 = vrot.slane %v3500_v31, 3  ;;  %v7691_v50 = vmul.f32 %v4899_v18, %v4891_v44 }
0x12a6   :  { %v3515_v59 = vsel %vm3426_vm1, %v3511_v29, 0.0  ;;  %v3555_v21 = vmul.f32 %v3547_v48, %v3503_v32  ;;  %v3559_v63 = vmul.f32 %v3547_v48, %v3507_v46  ;;  %v3512_v34 = vmul.f32 %v3504_v11, %v3498_v20  ;;  %v3510_v29 = vld [vmem:[%s7750_s0 + $0x78] sm:$0x3] }
0x12a7   :  { %v3516_v26 = vrot.slane %v3515_v59, 4  ;;  %v3529_v62 = vsel %vm3426_vm1, %v3513_v15, 0.0  ;;  %v3557_v40 = vmul.f32 %v3549_v10, %v3505_v52  ;;  %v3561_v53 = vmul.f32 %v3549_v10, %v3509_v49 }
0x12a8   :  { %v3572_v22 = vrot.slane %v3555_v21, 5  ;;  %v3573_v5 = vrot.slane %v3559_v63, 5  ;;  %v3530_v12 = vrot.slane %v3529_v62, 4  ;;  %v3522_v13 = vsel %vm3426_vm1, %v3512_v34, 0.0  ;;  %v4916_v21 = vld [vmem:[%s7750_s0 + $0x60] sm:$0xc] }
0x12a9   :  { %v3517_v56 = vadd.f32 %v3516_v26, %v3515_v59  ;;  %v3578_v0 = vrot.slane %v3557_v40, 5  ;;  %v3579_v6 = vrot.slane %v3561_v53, 5  ;;  %v3523_v17 = vrot.slane %v3522_v13, 4 }
0x12aa   :  { %v3574_v44 = vsel %vm3571_vm14, %v3572_v22, %v3573_v5  ;;  %v3548_v37 = vrot.slane %v3498_v20, 3  ;;  %v3514_v3 = vmul.f32 %v3506_v42, %v7691_v50  ;;  %v3531_v24 = vadd.f32 %v3530_v12, %v3529_v62 }
0x12ab   :  { %v3518_v39 = vrot.slane %v3517_v56, 2  ;;  %v3588_v54 = vsel %vm3426_vm1, %v3574_v44, 0.0  ;;  %v3580_v30 = vsel %vm3571_vm14, %v3578_v0, %v3579_v6  ;;  %v3524_v7 = vadd.f32 %v3523_v17, %v3522_v13  ;;  %v4917_v6 = vld [vmem:[%s7750_s0 + $0x68] sm:$0xc] }
0x12ac   :  { %v3589_v41 = vrot.slane %v3588_v54, 4  ;;  %v3602_v1 = vsel %vm3426_vm1, %v3580_v30, 0.0  ;;  %v3556_v23 = vmul.f32 %v3548_v37, %v3504_v11  ;;  %v3560_v43 = vmul.f32 %v3548_v37, %v3508_v58 }
0x12ad   :  { %v3519_v2 = vadd.f32 %v3518_v39, %v3517_v56  ;;  %v3603_v55 = vrot.slane %v3602_v1, 4  ;;  %v3525_v33 = vrot.slane %v3524_v7, 2  ;;  %v3536_v60 = vsel %vm3426_vm1, %v3514_v3, 0.0 }
0x12ae   :  { %v3590_v19 = vadd.f32 %v3589_v41, %v3588_v54  ;;  %v3575_v45 = vrot.slane %v3556_v23, 5  ;;  %v3576_v8 = vrot.slane %v3560_v43, 5  ;;  %v3532_v16 = vrot.slane %v3531_v24, 2  ;;  %v4918_v43 = vld [vmem:[%s7750_s0 + $0x70] sm:$0xc] }
0x12af   :  { %v3520_v61 = vrot.slane %v3519_v2, 1  ;;  %v3604_v38 = vadd.f32 %v3603_v55, %v3602_v1  ;;  %v3526_v28 = vadd.f32 %v3525_v33, %v3524_v7  ;;  %v3537_v14 = vrot.slane %v3536_v60, 4 }
0x12b0   :  { %v3591_v35 = vrot.slane %v3590_v19, 2  ;;  %v3550_v51 = vrot.slane %v7691_v50, 3  ;;  %v3577_v25 = vsel %vm3571_vm14, %v3575_v45, %v3576_v8  ;;  %v3533_v49 = vadd.f32 %v3532_v16, %v3531_v24 }
0x12b1   :  { %v3605_v32 = vrot.slane %v3604_v38, 2  ;;  %v3521_v27 = vadd.f32 %v3520_v61, %v3519_v2  ;;  %v3595_v36 = vsel %vm3426_vm1, %v3577_v25, 0.0  ;;  %v3538_v46 = vadd.f32 %v3537_v14, %v3536_v60 }
0x12b2   :  { %v3592_v52 = vadd.f32 %v3591_v35, %v3590_v19  ;;  %v3527_v11 = vrot.slane %v3526_v28, 1  ;;  %v3596_v18 = vrot.slane %v3595_v36, 4  ;;  %v3558_v20 = vmul.f32 %v3550_v51, %v3506_v42 }
0x12b3   :  { %v3606_v31 = vadd.f32 %v3605_v32, %v3604_v38  ;;  %v3539_v10 = vrot.slane %v3538_v46, 2  ;;  %v3616_v59 = vadd.f32 %v3521_v27, %v7652_v4  ;;  %v3624_v63 = vrot.slane %v4916_v21, 5 }
0x12b4   :  { %v3593_v48 = vrot.slane %v3592_v52, 1  ;;  %v3597_v15 = vadd.f32 %v3596_v18, %v3595_v36  ;;  %v3562_v34 = vmul.f32 %v3550_v51, %v3510_v29  ;;  %v3528_v62 = vadd.f32 %v3527_v11, %v3526_v28 }
0x12b5   :  { %v3607_v26 = vrot.slane %v3606_v31, 1  ;;  %v3534_v22 = vrot.slane %v3533_v49, 1  ;;  %v3581_v5 = vrot.slane %v3558_v20, 5  ;;  %v3540_v42 = vadd.f32 %v3539_v10, %v3538_v46 }
0x12b6   :  { %v3594_v50 = vadd.f32 %v3593_v48, %v3592_v52  ;;  %v3598_v40 = vrot.slane %v3597_v15, 2  ;;  %v3582_v13 = vrot.slane %v3562_v34, 5  ;;  %v3632_v56 = vadd.f32 %v3624_v63, %v3616_v59 }
0x12b7   :  { %v3625_v17 = vrot.slane %v4917_v6, 5  ;;  %v3608_v44 = vadd.f32 %v3607_v26, %v3606_v31  ;;  %v3617_v37 = vadd.f32 %v3528_v62, %v7656_v57  ;;  %v3535_v39 = vadd.f32 %v3534_v22, %v3533_v49 }
0x12b8   :  { %v3636_v53 = vadd.f32 %v3594_v50, %v7652_v4  ;;  %v3599_v12 = vadd.f32 %v3598_v40, %v3597_v15  ;;  %v3583_v3 = vsel %vm3571_vm14, %v3581_v5, %v3582_v13  ;;  %v3541_v7 = vrot.slane %v3540_v42, 1 }
0x12b9   :  { %v3609_v4 = vsel %vm3426_vm1, %v3583_v3, 0.0  ;;  %v3648_v24 = vrot.slane %v3632_v56, 5  ;;  %v3638_v1 = vadd.f32 %v3608_v44, %v7654_v47  ;;  %v3633_v23 = vadd.f32 %v3625_v17, %v3617_v37 }
0x12ba   :  { %v3640_v0 = vadd.f32 %v3636_v53, %v3624_v63  ;;  %v3600_v58 = vrot.slane %v3599_v12, 1  ;;  %v3610_v41 = vrot.slane %v3609_v4, 4  ;;  %v3618_v33 = vadd.f32 %v3535_v39, %v7654_v47  ;;  %v4919_v47 = vld [vmem:[%s7750_s0 + $0x78] sm:$0xc] }
0x12bb   :  { %v3626_v19 = vrot.slane %v4918_v43, 5  ;;  %v3542_v61 = vadd.f32 %v3541_v7, %v3540_v42  ;;  %v3649_v8 = vrot.slane %v3633_v23, 5 }
0x12bc   :  { %v3660_v54 = vrot.slane %v3640_v0, 5  ;;  %v3601_v30 = vadd.f32 %v3600_v58, %v3599_v12  ;;  %v3611_v55 = vadd.f32 %v3610_v41, %v3609_v4 }
0x12bd   :  { %v3642_v28 = vadd.f32 %v3638_v1, %v3626_v19  ;;  %v3634_v51 = vadd.f32 %v3626_v19, %v3618_v33  ;;  %v3619_v27 = vadd.f32 %v3542_v61, %v7658_v9 }
0x12be   :  { %v3637_v2 = vadd.f32 %v3601_v30, %v7656_v57  ;;  %v3669_v45 = vsel %vm3668_vm15, %v3648_v24, %v3660_v54  ;;  %v3612_v38 = vrot.slane %v3611_v55, 2  ;;  %v3627_v57 = vrot.slane %v4919_v47, 5 }
0x12bf   :  { %v3673_v14 = vsel %vm8269_vm0, %v3669_v45, 0.0  ;;  %v3662_v36 = vrot.slane %v3642_v28, 5  ;;  %v3650_v11 = vrot.slane %v3634_v51, 5 }
0x12c0   :  { %v3641_v60 = vadd.f32 %v3637_v2, %v3625_v17  ;;  %v3613_v16 = vadd.f32 %v3612_v38, %v3611_v55  ;;  %v3635_v18 = vadd.f32 %v3627_v57, %v3619_v27 }
0x12c1   :  { %v3671_v48 = vsel %vm3668_vm15, %v3650_v11, %v3662_v36 }
0x12c2   :  { %v3661_v35 = vrot.slane %v3641_v60, 5  ;;  %v3614_v25 = vrot.slane %v3613_v16, 1  ;;  %v3651_v20 = vrot.slane %v3635_v18, 5  ;;  %v3675_v10 = vsel %vm8271_vm8, %v3671_v48, 0.0 }
0x12c4   :  { %v3670_v32 = vsel %vm3668_vm15, %v3649_v8, %v3661_v35  ;;  %v3615_v31 = vadd.f32 %v3614_v25, %v3613_v16 }
0x12c5   :  { %v3674_v52 = vsel %vm8270_vm5, %v3670_v32, 0.0 }
0x12c6   :  { %v3681_v46 = vcombine.low %v3673_v14, %v3674_v52  ;;  %v3639_v29 = vadd.f32 %v3615_v31, %v7658_v9 }
0x12c8   :  { %3685 = vst [vmem:[%s7755_s5] sm:$0x77] %v3681_v46  ;;  %v3643_v49 = vadd.f32 %v3639_v29, %v3627_v57 }
0x12ca   :  { %v3663_v15 = vrot.slane %v3643_v49, 5 }
0x12cc   :  { %v3672_v50 = vsel %vm3668_vm15, %v3651_v20, %v3663_v15 }
0x12cd   :  { %v3676_v59 = vsel %vm8272_vm3, %v3672_v50, 0.0 }
0x12ce   :  { %v3682_v21 = vcombine.low %v3675_v10, %v3676_v59 }
0x12d0   :  { %3686 = vst [vmem:[%s7755_s5 + $0x8] sm:$0x77] %v3682_v21 }

</bundles_post_ra>
